<compile_context>
chip_gen: v5e
topology: v5e:2x2
jax: 0.10.0
libtpu: 0.0.40
codegen_flags: <defaults>
</compile_context>

<pallas_src>
import functools

import jax
import jax.numpy as jnp
from jax.experimental import pallas as pl
from jax.experimental.pallas import tpu as pltpu

D_IN = 32 * 32 * 3      # 3072 input features
HID_PAD = 128           # hidden 100 -> 128 (zero-padded, lane-aligned MXU tile)
CLS_PAD = 128           # classes 9 -> 128 (lane-dense, unmasked output stores)


def net_kernel(x_ref, w1_ref, b1_ref, w2_ref, b2_ref, o_ref):
    # x_ref : (TILE_M, 3072) f32     w1_ref: (3072, 128) bf16   b1_ref: (1, 128) f32
    # w2_ref: (128, 128)    bf16     b2_ref: (1, 128)    f32    o_ref : (TILE_M, 128) f32
    # x is read from HBM exactly once (as f32) and cast to bf16 on the VPU here;
    # the kernel is memory-bound on x, so the cast is free and avoids an extra
    # HBM round trip for a wrapper-side bf16 copy.
    x = x_ref[...].astype(jnp.bfloat16)
    h = jnp.dot(x, w1_ref[...], preferred_element_type=jnp.float32)
    h = jnp.maximum(h + b1_ref[...], 0.0)          # (1,128) bias broadcasts along sublanes
    o = jnp.dot(h.astype(jnp.bfloat16), w2_ref[...],
                preferred_element_type=jnp.float32)
    o_ref[...] = o + b2_ref[...]


def _resident_spec(shape):
    # Grid-invariant operand (weights/biases): constant index_map -> fetched once.
    # Buffered(1) drops the never-used second pipeline buffer (frees VMEM headroom).
    idx = lambda i: (0,) * len(shape)
    try:
        return pl.BlockSpec(shape, idx, pipeline_mode=pl.Buffered(1))
    except Exception:  # older jax without pipeline_mode / Buffered
        return pl.BlockSpec(shape, idx)


def _max_tile_rows():
    # x tiles are f32: rows * 3072 * 4 B, double-buffered by the pipeline.
    #   v5e (16 MiB default scoped VMEM): 512 rows -> 12 MiB of x buffers.
    #   v6e / v7x (32 MiB scoped):       1024 rows -> 24 MiB of x buffers.
    try:
        kind = jax.devices()[0].device_kind.lower()
    except Exception:
        kind = ""
    return 1024 if ("v6" in kind or "v7" in kind) else 512


def _choose_tile_m(n, max_tile):
    # Lane/sublane-friendly row tiles (multiples of 128). Ensure >= 2 grid steps
    # whenever the batch allows so both v7x TensorCores get work ("parallel" axis).
    if n <= 128:
        return 128
    t = max_tile
    while t > 128 and pl.cdiv(n, t) < 2:
        t //= 2
    return t


def prepare_params(w1, b1, w2, b2):
    """Zero-pad hidden/class dims to 128 and cast weights to bf16 (biases stay f32)."""
    hid = w1.shape[1]
    cls = w2.shape[1]
    w1p = jnp.zeros((D_IN, HID_PAD), jnp.bfloat16).at[:, :hid].set(w1.astype(jnp.bfloat16))
    b1p = jnp.zeros((1, HID_PAD), jnp.float32).at[:, :hid].set(b1.astype(jnp.float32))
    w2p = jnp.zeros((HID_PAD, CLS_PAD), jnp.bfloat16).at[:hid, :cls].set(w2.astype(jnp.bfloat16))
    b2p = jnp.zeros((1, CLS_PAD), jnp.float32).at[:, :cls].set(b2.astype(jnp.float32))
    return w1p, b1p, w2p, b2p


@functools.partial(jax.jit, static_argnames=("cls", "max_tile"))
def _net_forward_impl(x_nchw, w1p, b1p, w2p, b2p, cls, max_tile):
    n = x_nchw.shape[0]
    x_flat = x_nchw.reshape(n, -1)            # Flatten (view); stays f32 — no bf16 HBM copy
    d = x_flat.shape[1]

    tile_m = _choose_tile_m(n, max_tile)
    if n < tile_m:
        # Tiny batch: pad up to a single full tile (negligible copy) -> unmasked stores.
        x_flat = jnp.pad(x_flat, ((0, tile_m - n), (0, 0)))
    n_rows = x_flat.shape[0]
    grid_m = pl.cdiv(n_rows, tile_m)          # large ragged batches: partial last tile,
                                              # no full-array pad copy of x

    flops = 2 * n_rows * d * HID_PAD + 2 * n_rows * HID_PAD * CLS_PAD
    bytes_accessed = (x_flat.size * 4 + w1p.size * 2 + w2p.size * 2
                      + b1p.size * 4 + b2p.size * 4 + n_rows * CLS_PAD * 4)

    # Double-buffered f32 x / out tiles + single-buffered resident weights + headroom.
    vmem_limit = (2 * tile_m * d * 4 + 2 * tile_m * CLS_PAD * 4
                  + d * HID_PAD * 2 + HID_PAD * CLS_PAD * 2 + (8 << 20))

    out = pl.pallas_call(
        net_kernel,
        out_shape=jax.ShapeDtypeStruct((n_rows, CLS_PAD), jnp.float32),
        grid_spec=pltpu.PrefetchScalarGridSpec(
            num_scalar_prefetch=0,
            grid=(grid_m,),
            in_specs=[
                pl.BlockSpec((tile_m, d), lambda i: (i, 0)),   # x: tiled over batch (f32)
                _resident_spec((d, HID_PAD)),                  # w1: resident, single buffer
                _resident_spec((1, HID_PAD)),                  # b1
                _resident_spec((HID_PAD, CLS_PAD)),            # w2
                _resident_spec((1, CLS_PAD)),                  # b2
            ],
            out_specs=pl.BlockSpec((tile_m, CLS_PAD), lambda i: (i, 0)),
        ),
        compiler_params=pltpu.CompilerParams(
            dimension_semantics=("parallel",),   # megacore sharding on v7x; harmless elsewhere
            vmem_limit_bytes=vmem_limit,
        ),
        cost_estimate=pl.CostEstimate(
            flops=flops, transcendentals=0, bytes_accessed=bytes_accessed),
    )(x_flat, w1p, b1p, w2p, b2p)

    return out[:n, :cls]


def net_forward(x_nchw, w1p, b1p, w2p, b2p, cls=9):
    """x_nchw: (N, 3, 32, 32) float32. Returns logits (N, cls) float32."""
    return _net_forward_impl(x_nchw, w1p, b1p, w2p, b2p, cls, _max_tile_rows())


def init_params(key, w=32, decompose=100, cls=9):
    # Deterministic synthetic init (uniform, roughly matching nn.Linear scale).
    d_in = w * w * 3
    k1, k2, k3, k4 = jax.random.split(key, 4)
    lim1 = 1.0 / jnp.sqrt(d_in)
    lim2 = 1.0 / jnp.sqrt(decompose)
    w1 = jax.random.uniform(k1, (d_in, decompose), jnp.float32, -lim1, lim1)
    b1 = jax.random.uniform(k2, (decompose,), jnp.float32, -lim1, lim1)
    w2 = jax.random.uniform(k3, (decompose, cls), jnp.float32, -lim2, lim2)
    b2 = jax.random.uniform(k4, (cls,), jnp.float32, -lim2, lim2)
    return w1, b1, w2, b2


if __name__ == "__main__":
    key = jax.random.PRNGKey(0)
    kx, kp = jax.random.split(key)

    batch, w_img, cls = 2, 32, 9                 # forward implies 3*32*32 = 3072 features
    x = jax.random.normal(kx, (batch, 3, w_img, w_img), jnp.float32)
    w1, b1, w2, b2 = init_params(kp, w=w_img, decompose=100, cls=cls)
    w1p, b1p, w2p, b2p = prepare_params(w1, b1, w2, b2)

    out = net_forward(x, w1p, b1p, w2p, b2p, cls=cls)
    out = jax.block_until_ready(out)
    assert out.shape == (batch, cls)

    xf = x.reshape(batch, -1)
    # Tight check against a reference mirroring the kernel's bf16-input / f32-accumulate path.
    h_ref = jnp.maximum(
        jnp.dot(xf.astype(jnp.bfloat16), w1.astype(jnp.bfloat16),
                preferred_element_type=jnp.float32) + b1, 0.0)
    ref_mixed = jnp.dot(h_ref.astype(jnp.bfloat16), w2.astype(jnp.bfloat16),
                        preferred_element_type=jnp.float32) + b2
    assert jnp.allclose(out, ref_mixed, atol=1e-4, rtol=1e-4)

    # Loose check against the full-f32 PyTorch-equivalent forward (bf16 rounding only).
    ref_f32 = jnp.maximum(xf @ w1 + b1, 0.0) @ w2 + b2
    assert jnp.allclose(out, ref_f32, atol=5e-2, rtol=5e-2)

    print("KERNEL_OK")
</pallas_src>

<mosaic_0001>
module attributes {stable_mosaic.version = 11 : i64} {
  func.func @net_kernel(%arg0: i32, %arg1: memref<128x3072xf32, #tpu.memory_space<vmem>>, %arg2: memref<3072x128xbf16, #tpu.memory_space<vmem>>, %arg3: memref<1x128xf32, #tpu.memory_space<vmem>>, %arg4: memref<128x128xbf16, #tpu.memory_space<vmem>>, %arg5: memref<1x128xf32, #tpu.memory_space<vmem>>, %arg6: memref<128x128xf32, #tpu.memory_space<vmem>>) attributes {dimension_semantics = [#tpu.dimension_semantics<parallel>], iteration_bounds = array<i64: 1>, scalar_prefetch = 0 : i64, scratch_operands = 0 : i64, tpu.core_type = #tpu.core_type<tc>, window_params = [{transform_indices = @transform_0, window_bounds = array<i64: 128, 3072>}, {pipeline_mode = #tpu.pipeline_mode<synchronous>, transform_indices = @transform_1, window_bounds = array<i64: 3072, 128>}, {pipeline_mode = #tpu.pipeline_mode<synchronous>, transform_indices = @transform_2, window_bounds = array<i64: 1, 128>}, {pipeline_mode = #tpu.pipeline_mode<synchronous>, transform_indices = @transform_3, window_bounds = array<i64: 128, 128>}, {pipeline_mode = #tpu.pipeline_mode<synchronous>, transform_indices = @transform_4, window_bounds = array<i64: 1, 128>}, {transform_indices = @transform_5, window_bounds = array<i64: 128, 128>}]} {
    %c0 = arith.constant 0 : index
    %c0_0 = arith.constant 0 : index
    %0 = vector.load %arg1[%c0, %c0_0] : memref<128x3072xf32, #tpu.memory_space<vmem>>, vector<128x3072xf32>
    %1 = arith.truncf %0 : vector<128x3072xf32> to vector<128x3072xbf16>
    %c0_1 = arith.constant 0 : index
    %c0_2 = arith.constant 0 : index
    %2 = vector.load %arg2[%c0_1, %c0_2] : memref<3072x128xbf16, #tpu.memory_space<vmem>>, vector<3072x128xbf16>
    %cst = arith.constant dense<0.000000e+00> : vector<128x128xf32>
    %3 = tpu.matmul %1, %2, %cst {dimension_numbers = #tpu.dot_dimension_numbers<[1], [0], [0], [1], [0, 0, 1, 1], [], []>} : vector<128x3072xbf16>, vector<3072x128xbf16>, vector<128x128xf32> -> vector<128x128xf32>
    %c0_3 = arith.constant 0 : index
    %c0_4 = arith.constant 0 : index
    %4 = vector.load %arg3[%c0_3, %c0_4] : memref<1x128xf32, #tpu.memory_space<vmem>>, vector<1x128xf32>
    %5 = vector.broadcast %4 : vector<1x128xf32> to vector<128x128xf32>
    %6 = arith.addf %3, %5 : vector<128x128xf32>
    %cst_5 = arith.constant 0.000000e+00 : f32
    %7 = vector.broadcast %cst_5 : f32 to vector<128x128xf32>
    %8 = arith.maximumf %6, %7 : vector<128x128xf32>
    %9 = arith.truncf %8 : vector<128x128xf32> to vector<128x128xbf16>
    %c0_6 = arith.constant 0 : index
    %c0_7 = arith.constant 0 : index
    %10 = vector.load %arg4[%c0_6, %c0_7] : memref<128x128xbf16, #tpu.memory_space<vmem>>, vector<128x128xbf16>
    %cst_8 = arith.constant dense<0.000000e+00> : vector<128x128xf32>
    %11 = tpu.matmul %9, %10, %cst_8 {dimension_numbers = #tpu.dot_dimension_numbers<[1], [0], [0], [1], [0, 0, 1, 1], [], []>} : vector<128x128xbf16>, vector<128x128xbf16>, vector<128x128xf32> -> vector<128x128xf32>
    %c0_9 = arith.constant 0 : index
    %c0_10 = arith.constant 0 : index
    %12 = vector.load %arg5[%c0_9, %c0_10] : memref<1x128xf32, #tpu.memory_space<vmem>>, vector<1x128xf32>
    %13 = vector.broadcast %12 : vector<1x128xf32> to vector<128x128xf32>
    %14 = arith.addf %11, %13 : vector<128x128xf32>
    %c0_11 = arith.constant 0 : index
    %c0_12 = arith.constant 0 : index
    %15 = vector.load %arg6[%c0_11, %c0_12] : memref<128x128xf32, #tpu.memory_space<vmem>>, vector<128x128xf32>
    tpu.vector_store %arg6[%c0_11, %c0_12], %14 {strides = array<i32>} : memref<128x128xf32, #tpu.memory_space<vmem>>, vector<128x128xf32>,
    return
  }
  func.func @transform_0(%arg0: i32) -> (i32, i32) {
    %c0_i32 = arith.constant 0 : i32
    %c0_i32_0 = arith.constant 0 : i32
    return %arg0, %c0_i32 : i32, i32
  }
  func.func @transform_1(%arg0: i32) -> (i32, i32) {
    %c0_i32 = arith.constant 0 : i32
    %c0_i32_0 = arith.constant 0 : i32
    %c0_i32_1 = arith.constant 0 : i32
    return %c0_i32, %c0_i32_0 : i32, i32
  }
  func.func @transform_2(%arg0: i32) -> (i32, i32) {
    %c0_i32 = arith.constant 0 : i32
    %c0_i32_0 = arith.constant 0 : i32
    %c0_i32_1 = arith.constant 0 : i32
    return %c0_i32, %c0_i32_0 : i32, i32
  }
  func.func @transform_3(%arg0: i32) -> (i32, i32) {
    %c0_i32 = arith.constant 0 : i32
    %c0_i32_0 = arith.constant 0 : i32
    %c0_i32_1 = arith.constant 0 : i32
    return %c0_i32, %c0_i32_0 : i32, i32
  }
  func.func @transform_4(%arg0: i32) -> (i32, i32) {
    %c0_i32 = arith.constant 0 : i32
    %c0_i32_0 = arith.constant 0 : i32
    %c0_i32_1 = arith.constant 0 : i32
    return %c0_i32, %c0_i32_0 : i32, i32
  }
  func.func @transform_5(%arg0: i32) -> (i32, i32) {
    %c0_i32 = arith.constant 0 : i32
    %c0_i32_0 = arith.constant 0 : i32
    return %arg0, %c0_i32 : i32, i32
  }
}

</mosaic_0001>

<bundles_post_ra>
// kernel: _net_forward_impl.1
= control target key start
LH: loop header
LB: loop body
LE: loop exit
PB: predicated region body
PF: predicated region fallthrough
CT: control target
= control target key end

     0   :  { %s6641_s1 = inlined_call_operand.vmem [shape: bf16[3072,128], index: 1, kind: input, shape index: {}]   ;;  %s6642_s2 = inlined_call_operand.vmem [shape: f32[1,128], index: 2, kind: input, shape index: {}]   ;;  %s6643_s0 = inlined_call_operand.vmem [shape: f32[128,3072], index: 0, kind: input, shape index: {}]   ;;  %s6644_s3 = inlined_call_operand.vmem [shape: bf16[128,128], index: 3, kind: input, shape index: {}]   ;;  %s6645_s4 = inlined_call_operand.vmem [shape: f32[1,128], index: 4, kind: input, shape index: {}]   ;;  %s6646_s5 = inlined_call_operand.vmem [shape: f32[128,128], index: 5, kind: output, shape index: {}]  }
   0x1   :  { %v4280_v0 = vld [vmem:[%s6641_s1 + $0x38] sm:$0xff]  ;;  %v4279_v1 = vld [vmem:[%s6641_s1 + $0x30] sm:$0xff]  ;;  %v4278_v2 = vld [vmem:[%s6641_s1 + $0x28] sm:$0xff] }
   0x2   :  { %4473 = vmatpush.bf16.msra.mxu1 %v4280_v0  ;;  %4474 = vmatpush.bf16.msra.mxu2 %v4280_v0  ;;  %v4277_v3 = vld [vmem:[%s6641_s1 + $0x20] sm:$0xff]  ;;  %v4276_v4 = vld [vmem:[%s6641_s1 + $0x18] sm:$0xff]  ;;  %v4275_v5 = vld [vmem:[%s6641_s1 + $0x10] sm:$0xff] }
   0x3   :  { %4475 = vmatpush.bf16.msra.mxu3 %v4280_v0  ;;  %2136 = vmatpush.bf16.msra.mxu0 %v4280_v0  ;;  %v4274_v6 = vld [vmem:[%s6641_s1 + $0x8] sm:$0xff]  ;;  %v4273_v7 = vld [vmem:[%s6641_s1] sm:$0xff]  ;;  %v4296_v14 = vld [vmem:[%s6641_s1 + $0xb8] sm:$0xff] }
   0x4   :  { %v116_v8 = vld [vmem:[%s6643_s0 + $0x300] sm:$0xff]  ;;  %v4288_v15 = vld [vmem:[%s6641_s1 + $0x78] sm:$0xff]  ;;  %v4295_v22 = vld [vmem:[%s6641_s1 + $0xb0] sm:$0xff] }
   0x5   :  { %v140_v9 = vld [vmem:[%s6643_s0 + $0x3c0] sm:$0xff]  ;;  %v4304_v16 = vld [vmem:[%s6641_s1 + $0xf8] sm:$0xff]  ;;  %v4287_v24 = vld [vmem:[%s6641_s1 + $0x70] sm:$0xff] }
   0x6   :  { %4476 = vmatpush.bf16.msra.mxu1 %v4279_v1  ;;  %4477 = vmatpush.bf16.msra.mxu2 %v4279_v1  ;;  %v212_v10 = vld [vmem:[%s6643_s0 + $0x600] sm:$0xff]  ;;  %v452_v17 = vpack.c.bf16 %v140_v9, %v116_v8  ;;  %v4312_v23 = vld [vmem:[%s6641_s1 + $0x138] sm:$0xff]  ;;  %v4303_v25 = vld [vmem:[%s6641_s1 + $0xf0] sm:$0xff] }
   0x7   :  { %4478 = vmatpush.bf16.msra.mxu3 %v4279_v1  ;;  %2137 = vmatpush.bf16.msra.mxu0 %v4279_v1  ;;  %v236_v11 = vld [vmem:[%s6643_s0 + $0x6c0] sm:$0xff]  ;;  %v4294_v27 = vld [vmem:[%s6641_s1 + $0xa8] sm:$0xff]  ;;  %v4311_v28 = vld [vmem:[%s6641_s1 + $0x130] sm:$0xff] }
   0x8   :  { %v308_v12 = vld [vmem:[%s6643_s0 + $0x900] sm:$0xff]  ;;  %v500_v18 = vpack.c.bf16 %v236_v11, %v212_v10  ;;  %v4286_v29 = vld [vmem:[%s6641_s1 + $0x68] sm:$0xff]  ;;  %v4292_v41 = vld [vmem:[%s6641_s1 + $0x98] sm:$0xff] }
   0x9   :  { %v332_v13 = vld [vmem:[%s6643_s0 + $0x9c0] sm:$0xff]  ;;  %v4302_v30 = vld [vmem:[%s6641_s1 + $0xe8] sm:$0xff]  ;;  %v4284_v43 = vld [vmem:[%s6641_s1 + $0x58] sm:$0xff] }
   0xa   :  { %4479 = vmatpush.bf16.msra.mxu1 %v4278_v2  ;;  %4480 = vmatpush.bf16.msra.mxu2 %v4278_v2  ;;  %v548_v19 = vpack.c.bf16 %v332_v13, %v308_v12  ;;  %v20_v20 = vld [vmem:[%s6643_s0] sm:$0xff]  ;;  %v4310_v32 = vld [vmem:[%s6641_s1 + $0x128] sm:$0xff]  ;;  %v4300_v44 = vld [vmem:[%s6641_s1 + $0xd8] sm:$0xff] }
   0xb   :  { %4481 = vmatpush.bf16.msra.mxu3 %v4278_v2  ;;  %2138 = vmatpush.bf16.msra.mxu0 %v4278_v2  ;;  %v44_v21 = vld [vmem:[%s6643_s0 + $0xc0] sm:$0xff]  ;;  %v4291_v50 = vld [vmem:[%s6641_s1 + $0x90] sm:$0xff]  ;;  %v4308_v51 = vld [vmem:[%s6641_s1 + $0x118] sm:$0xff] }
   0xc   :  { %v404_v26 = vpack.c.bf16 %v44_v21, %v20_v20  ;;  %v4293_v31 = vld [vmem:[%s6641_s1 + $0xa0] sm:$0xff]  ;;  %v4283_v52 = vld [vmem:[%s6641_s1 + $0x50] sm:$0xff]  ;;  %v4290_v55 = vld [vmem:[%s6641_s1 + $0x88] sm:$0xff] }
   0xd   :  { %v4285_v33 = vld [vmem:[%s6641_s1 + $0x60] sm:$0xff]  ;;  %v4299_v53 = vld [vmem:[%s6641_s1 + $0xd0] sm:$0xff]  ;;  %v4282_v57 = vld [vmem:[%s6641_s1 + $0x48] sm:$0xff] }
   0xe   :  { %4482 = vmatpush.bf16.msra.mxu1 %v4277_v3  ;;  %4483 = vmatpush.bf16.msra.mxu2 %v4277_v3  ;;  %v4301_v34 = vld [vmem:[%s6641_s1 + $0xe0] sm:$0xff]  ;;  %v4307_v56 = vld [vmem:[%s6641_s1 + $0x110] sm:$0xff]  ;;  %v4298_v58 = vld [vmem:[%s6641_s1 + $0xc8] sm:$0xff] }
   0xf   :  { %4484 = vmatpush.bf16.msra.mxu3 %v4277_v3  ;;  %2139 = vmatpush.bf16.msra.mxu0 %v4277_v3  ;;  %v164_v35 = vld [vmem:[%s6643_s0 + $0x480] sm:$0xff]  ;;  %v4306_v60 = vld [vmem:[%s6641_s1 + $0x108] sm:$0xff]  ;;  %v4328_v1 = vld [vmem:[%s6641_s1 + $0x1b8] sm:$0xff] }
  0x10   :  { %v188_v36 = vld [vmem:[%s6643_s0 + $0x540] sm:$0xff]  ;;  %v21_v63 = vld [vmem:[%s6643_s0 + $0x8] sm:$0xff]  ;;  %v4336_v2 = vld [vmem:[%s6641_s1 + $0x1f8] sm:$0xff] }
  0x11   :  { %v260_v37 = vld [vmem:[%s6643_s0 + $0x780] sm:$0xff]  ;;  %v476_v45 = vpack.c.bf16 %v188_v36, %v164_v35  ;;  %v45_v0 = vld [vmem:[%s6643_s0 + $0xc8] sm:$0xff]  ;;  %v22_v3 = vld [vmem:[%s6643_s0 + $0x10] sm:$0xff] }
  0x12   :  { %4485 = vmatpush.bf16.msra.mxu1 %v4276_v4  ;;  %4486 = vmatpush.bf16.msra.mxu2 %v4276_v4  ;;  %v284_v38 = vld [vmem:[%s6643_s0 + $0x840] sm:$0xff]  ;;  %v405_v9 = vpack.c.bf16 %v45_v0, %v21_v63  ;;  %v4318_v20 = vld [vmem:[%s6641_s1 + $0x168] sm:$0xff]  ;;  %v4323_v63 = vld [vmem:[%s6641_s1 + $0x190] sm:$0xff] }
  0x13   :  { %4487 = vmatpush.bf16.msra.mxu3 %v4276_v4  ;;  %2140 = vmatpush.bf16.msra.mxu0 %v4276_v4  ;;  %v356_v39 = vld [vmem:[%s6643_s0 + $0xa80] sm:$0xff]  ;;  %v524_v46 = vpack.c.bf16 %v284_v38, %v260_v37  ;;  %v46_v4 = vld [vmem:[%s6643_s0 + $0xd0] sm:$0xff]  ;;  %v69_v21 = vld [vmem:[%s6643_s0 + $0x188] sm:$0xff] }
  0x14   :  { %v380_v40 = vld [vmem:[%s6643_s0 + $0xb40] sm:$0xff]  ;;  %v406_v10 = vpack.c.bf16 %v46_v4, %v22_v3  ;;  %v117_v36 = vld [vmem:[%s6643_s0 + $0x308] sm:$0xff]  ;;  %v118_v38 = vld [vmem:[%s6643_s0 + $0x310] sm:$0xff] }
  0x15   :  { %v4309_v42 = vld [vmem:[%s6641_s1 + $0x120] sm:$0xff]  ;;  %v572_v47 = vpack.c.bf16 %v380_v40, %v356_v39  ;;  %v141_v37 = vld [vmem:[%s6643_s0 + $0x3c8] sm:$0xff]  ;;  %v142_v39 = vld [vmem:[%s6643_s0 + $0x3d0] sm:$0xff] }
  0x16   :  { %4488 = vmatpush.bf16.msra.mxu1 %v4275_v5  ;;  %4489 = vmatpush.bf16.msra.mxu2 %v4275_v5  ;;  %v68_v48 = vld [vmem:[%s6643_s0 + $0x180] sm:$0xff]  ;;  %v119_v40 = vld [vmem:[%s6643_s0 + $0x318] sm:$0xff]  ;;  %v4331_v0 = vld [vmem:[%s6641_s1 + $0x1d0] sm:$0xff] }
  0x17   :  { %4490 = vmatpush.bf16.msra.mxu3 %v4275_v5  ;;  %2141 = vmatpush.bf16.msra.mxu0 %v4275_v5  ;;  %v92_v49 = vld [vmem:[%s6643_s0 + $0x240] sm:$0xff]  ;;  %v4320_v5 = vld [vmem:[%s6641_s1 + $0x178] sm:$0xff]  ;;  %v237_v3 = vld [vmem:[%s6643_s0 + $0x6c8] sm:$0xff] }
  0x18   :  { %v428_v54 = vpack.c.bf16 %v92_v49, %v68_v48  ;;  %v4289_v59 = vld [vmem:[%s6641_s1 + $0x80] sm:$0xff]  ;;  %v4324_v48 = vld [vmem:[%s6641_s1 + $0x198] sm:$0xff]  ;;  %v214_v4 = vld [vmem:[%s6643_s0 + $0x610] sm:$0xff] }
  0x19   :  { %v4281_v61 = vld [vmem:[%s6641_s1 + $0x40] sm:$0xff]  ;;  %v4332_v49 = vld [vmem:[%s6641_s1 + $0x1d8] sm:$0xff] }
  0x1a   :  { %4491 = vmatpush.bf16.msra.mxu1 %v4274_v6  ;;  %4492 = vmatpush.bf16.msra.mxu2 %v4274_v6  ;;  %v4297_v62 = vld [vmem:[%s6641_s1 + $0xc0] sm:$0xff] }
  0x1b   :  { %4493 = vmatpush.bf16.msra.mxu3 %v4274_v6  ;;  %2142 = vmatpush.bf16.msra.mxu0 %v4274_v6  ;;  %v23_v6 = vld [vmem:[%s6643_s0 + $0x18] sm:$0xff]  ;;  %v4305_v8 = vld [vmem:[%s6641_s1 + $0x100] sm:$0xff] }
  0x1c   :  { %v24_v12 = vld [vmem:[%s6643_s0 + $0x20] sm:$0xff] }
  0x1d   :  { %v48_v13 = vld [vmem:[%s6643_s0 + $0xe0] sm:$0xff] }
  0x1e   :  { %4494 = vmatpush.bf16.msra.mxu1 %v4273_v7  ;;  %4495 = vmatpush.bf16.msra.mxu2 %v4273_v7  ;;  %v4317_v35 = vld [vmem:[%s6641_s1 + $0x160] sm:$0xff] }
  0x1f   :  { %4496 = vmatpush.bf16.msra.mxu3 %v4273_v7  ;;  %2143 = vmatpush.bf16.msra.mxu0 %v4273_v7  ;;  %v47_v7 = vld [vmem:[%s6643_s0 + $0xd8] sm:$0xff] }
  0x20   :  { %v407_v11 = vpack.c.bf16 %v47_v7, %v23_v6  ;;  %v215_v6 = vld [vmem:[%s6643_s0 + $0x618] sm:$0xff] }
  0x21   :  { %2154 = vmatmul.bf16.vlgmr.msra.gmra.mxu1 %v452_v17  ;;  %2164 = vmatmul.bf16.vlgmr.msra.gmra.mxu2 %v500_v18  ;;  %v408_v17 = vpack.c.bf16 %v48_v13, %v24_v12  ;;  %v4326_v18 = vld [vmem:[%s6641_s1 + $0x1a8] sm:$0xff]  ;;  %v239_v7 = vld [vmem:[%s6643_s0 + $0x6d8] sm:$0xff]  ;;  %v240_v12 = vld [vmem:[%s6643_s0 + $0x6e0] sm:$0xff] }
  0x22   :  { %2234 = vmatpush.bf16.msrb.mxu2 %v4296_v14  ;;  %2185 = vmatpush.bf16.msrb.mxu1 %v4288_v15  ;;  %v4327_v14 = vld [vmem:[%s6641_s1 + $0x1b0] sm:$0xff] }
  0x23   :  { %2283 = vmatpush.bf16.msrb.mxu3 %v4304_v16  ;;  %2332 = vmatpush.bf16.msrb.mxu0 %v4312_v23  ;;  %v4335_v15 = vld [vmem:[%s6641_s1 + $0x1f0] sm:$0xff] }
  0x24   :  { %2174 = vmatmul.bf16.vlgmr.msra.gmra.mxu3 %v548_v19  ;;  %2144 = vmatmul.bf16.vlgmr.msra.gmra.mxu0 %v404_v26  ;;  %v4319_v16 = vld [vmem:[%s6641_s1 + $0x170] sm:$0xff]  ;;  %v4334_v19 = vld [vmem:[%s6641_s1 + $0x1e8] sm:$0xff]  ;;  %v95_v26 = vld [vmem:[%s6643_s0 + $0x258] sm:$0xff] }
  0x25   :  { %v70_v23 = vld [vmem:[%s6643_s0 + $0x190] sm:$0xff] }
  0x26   :  { %2235 = vmatpush.bf16.msrb.mxu2 %v4295_v22  ;;  %2186 = vmatpush.bf16.msrb.mxu1 %v4287_v24  ;;  %v93_v22 = vld [vmem:[%s6643_s0 + $0x248] sm:$0xff]  ;;  %v94_v24 = vld [vmem:[%s6643_s0 + $0x250] sm:$0xff] }
  0x27   :  { %2284 = vmatpush.bf16.msrb.mxu3 %v4303_v25  ;;  %2333 = vmatpush.bf16.msrb.mxu0 %v4311_v28  ;;  %v71_v25 = vld [vmem:[%s6643_s0 + $0x198] sm:$0xff]  ;;  %v430_v28 = vpack.c.bf16 %v94_v24, %v70_v23 }
  0x28   :  { %v4344_v23 = vld [vmem:[%s6641_s1 + $0x238] sm:$0xff] }
  0x2a   :  { %2236 = vmatpush.bf16.msrb.mxu2 %v4294_v27  ;;  %2187 = vmatpush.bf16.msrb.mxu1 %v4286_v29  ;;  %v429_v27 = vpack.c.bf16 %v93_v22, %v69_v21  ;;  %v431_v29 = vpack.c.bf16 %v95_v26, %v71_v25  ;;  %v263_v21 = vld [vmem:[%s6643_s0 + $0x798] sm:$0xff] }
  0x2b   :  { %2285 = vmatpush.bf16.msrb.mxu3 %v4302_v30  ;;  %2334 = vmatpush.bf16.msrb.mxu0 %v4310_v32  ;;  %v72_v30 = vld [vmem:[%s6643_s0 + $0x1a0] sm:$0xff]  ;;  %v287_v22 = vld [vmem:[%s6643_s0 + $0x858] sm:$0xff] }
  0x2c   :  { %v527_v26 = vpack.c.bf16 %v287_v22, %v263_v21 }
  0x2e   :  { %2237 = vmatpush.bf16.msrb.mxu2 %v4293_v31  ;;  %2188 = vmatpush.bf16.msrb.mxu1 %v4285_v33  ;;  %v96_v31 = vld [vmem:[%s6643_s0 + $0x260] sm:$0xff] }
  0x2f   :  { %2286 = vmatpush.bf16.msrb.mxu3 %v4301_v34  ;;  %2335 = vmatpush.bf16.msrb.mxu0 %v4309_v42  ;;  %v432_v32 = vpack.c.bf16 %v96_v31, %v72_v30  ;;  %v4325_v33 = vld [vmem:[%s6641_s1 + $0x1a0] sm:$0xff]  ;;  %v453_v42 = vpack.c.bf16 %v141_v37, %v117_v36  ;;  %v309_v36 = vld [vmem:[%s6643_s0 + $0x908] sm:$0xff] }
  0x30   :  { %v4333_v34 = vld [vmem:[%s6641_s1 + $0x1e0] sm:$0xff]  ;;  %v333_v37 = vld [vmem:[%s6643_s0 + $0x9c8] sm:$0xff] }
  0x31   :  { %2159 = vmatmul.bf16.gmra.mxu1 %v476_v45  ;;  %2169 = vmatmul.bf16.gmra.mxu2 %v524_v46  ;;  %v120_v45 = vld [vmem:[%s6643_s0 + $0x320] sm:$0xff] }
  0x32   :  { %2238 = vmatpush.bf16.msrb.mxu2 %v4292_v41  ;;  %2189 = vmatpush.bf16.msrb.mxu1 %v4284_v43  ;;  %v143_v41 = vld [vmem:[%s6643_s0 + $0x3d8] sm:$0xff]  ;;  %v454_v43 = vpack.c.bf16 %v142_v39, %v118_v38  ;;  %v144_v46 = vld [vmem:[%s6643_s0 + $0x3e0] sm:$0xff]  ;;  %v310_v38 = vld [vmem:[%s6643_s0 + $0x910] sm:$0xff] }
  0x33   :  { %2287 = vmatpush.bf16.msrb.mxu3 %v4300_v44  ;;  %2336 = vmatpush.bf16.msrb.mxu0 %v4308_v51  ;;  %v455_v44 = vpack.c.bf16 %v143_v41, %v119_v40  ;;  %v165_v51 = vld [vmem:[%s6643_s0 + $0x488] sm:$0xff]  ;;  %v4321_v31 = vld [vmem:[%s6641_s1 + $0x180] sm:$0xff]  ;;  %v334_v39 = vld [vmem:[%s6643_s0 + $0x9d0] sm:$0xff] }
  0x34   :  { %2179 = vmatmul.bf16.gmra.mxu3 %v572_v47  ;;  %2149 = vmatmul.bf16.gmra.mxu0 %v428_v54  ;;  %v456_v47 = vpack.c.bf16 %v144_v46, %v120_v45  ;;  %v190_v54 = vld [vmem:[%s6643_s0 + $0x550] sm:$0xff]  ;;  %v311_v40 = vld [vmem:[%s6643_s0 + $0x918] sm:$0xff] }
  0x35   :  { %v335_v41 = vld [vmem:[%s6643_s0 + $0x9d8] sm:$0xff] }
  0x36   :  { %2239 = vmatpush.bf16.msrb.mxu2 %v4291_v50  ;;  %2190 = vmatpush.bf16.msrb.mxu1 %v4283_v52  ;;  %v4316_v50 = vld [vmem:[%s6641_s1 + $0x158] sm:$0xff]  ;;  %v189_v52 = vld [vmem:[%s6643_s0 + $0x548] sm:$0xff]  ;;  %v551_v46 = vpack.c.bf16 %v335_v41, %v311_v40 }
  0x37   :  { %2288 = vmatpush.bf16.msrb.mxu3 %v4299_v53  ;;  %2337 = vmatpush.bf16.msrb.mxu0 %v4307_v56  ;;  %v166_v53 = vld [vmem:[%s6643_s0 + $0x490] sm:$0xff]  ;;  %v191_v56 = vld [vmem:[%s6643_s0 + $0x558] sm:$0xff] }
  0x3a   :  { %2240 = vmatpush.bf16.msrb.mxu2 %v4290_v55  ;;  %2191 = vmatpush.bf16.msrb.mxu1 %v4282_v57  ;;  %v167_v55 = vld [vmem:[%s6643_s0 + $0x498] sm:$0xff]  ;;  %v477_v57 = vpack.c.bf16 %v189_v52, %v165_v51 }
  0x3b   :  { %2289 = vmatpush.bf16.msrb.mxu3 %v4298_v58  ;;  %2338 = vmatpush.bf16.msrb.mxu0 %v4306_v60  ;;  %v478_v58 = vpack.c.bf16 %v190_v54, %v166_v53  ;;  %v168_v60 = vld [vmem:[%s6643_s0 + $0x4a0] sm:$0xff]  ;;  %v4360_v52 = vld [vmem:[%s6641_s1 + $0x2b8] sm:$0xff] }
  0x3c   :  { %v4368_v53 = vld [vmem:[%s6641_s1 + $0x2f8] sm:$0xff]  ;;  %v4966_v54 = vld [vmem:[%s6642_s2] ss:$0 sm:$0xff] }
  0x3e   :  { %2241 = vmatpush.bf16.msrb.mxu2 %v4289_v59  ;;  %2192 = vmatpush.bf16.msrb.mxu1 %v4281_v61  ;;  %v479_v59 = vpack.c.bf16 %v191_v56, %v167_v55  ;;  %v192_v61 = vld [vmem:[%s6643_s0 + $0x560] sm:$0xff]  ;;  %v4338_v55 = vld [vmem:[%s6641_s1 + $0x208] sm:$0xff] }
  0x3f   :  { %2290 = vmatpush.bf16.msrb.mxu3 %v4297_v62  ;;  %2339 = vmatpush.bf16.msrb.mxu0 %v4305_v8  ;;  %v480_v62 = vpack.c.bf16 %v192_v61, %v168_v60  ;;  %v4352_v61 = vld [vmem:[%s6641_s1 + $0x278] sm:$0xff] }
  0x41   :  { %2193 = vmatmul.bf16.vlgmr.msrb.gmra.mxu1 %v405_v9  ;;  %2242 = vmatmul.bf16.vlgmr.msrb.gmra.mxu2 %v406_v10  ;;  %v503_v10 = vpack.c.bf16 %v239_v7, %v215_v6 }
  0x42   :  { %2430 = vmatpush.bf16.msra.mxu2 %v4328_v1  ;;  %2381 = vmatpush.bf16.msra.mxu1 %v4320_v5  ;;  %v4315_v1 = vld [vmem:[%s6641_s1 + $0x150] sm:$0xff] }
  0x43   :  { %2479 = vmatpush.bf16.msra.mxu3 %v4336_v2  ;;  %v213_v2 = vld [vmem:[%s6643_s0 + $0x608] sm:$0xff]  ;;  %v238_v5 = vld [vmem:[%s6643_s0 + $0x6d0] sm:$0xff]  ;;  %2528 = vmatpush.bf16.msra.mxu0 %v4344_v23 }
  0x44   :  { %2291 = vmatmul.bf16.vlgmr.msrb.gmra.mxu3 %v407_v11  ;;  %2340 = vmatmul.bf16.vlgmr.msrb.gmra.mxu0 %v408_v17  ;;  %v501_v8 = vpack.c.bf16 %v237_v3, %v213_v2  ;;  %v502_v9 = vpack.c.bf16 %v238_v5, %v214_v4  ;;  %v216_v11 = vld [vmem:[%s6643_s0 + $0x620] sm:$0xff]  ;;  %v261_v17 = vld [vmem:[%s6643_s0 + $0x788] sm:$0xff]  ;;  %v358_v2 = vld [vmem:[%s6643_s0 + $0xa90] sm:$0xff] }
  0x45   :  { %v504_v13 = vpack.c.bf16 %v240_v12, %v216_v11  ;;  %v382_v3 = vld [vmem:[%s6643_s0 + $0xb50] sm:$0xff]  ;;  %v359_v4 = vld [vmem:[%s6643_s0 + $0xa98] sm:$0xff] }
  0x46   :  { %2431 = vmatpush.bf16.msra.mxu2 %v4327_v14  ;;  %2382 = vmatpush.bf16.msra.mxu1 %v4319_v16  ;;  %v4322_v14 = vld [vmem:[%s6641_s1 + $0x188] sm:$0xff]  ;;  %v383_v5 = vld [vmem:[%s6643_s0 + $0xb58] sm:$0xff] }
  0x47   :  { %2480 = vmatpush.bf16.msra.mxu3 %v4335_v15  ;;  %v4330_v15 = vld [vmem:[%s6641_s1 + $0x1c8] sm:$0xff] }
  0x48   :  { %v4314_v16 = vld [vmem:[%s6641_s1 + $0x148] sm:$0xff] }
  0x4a   :  { %2432 = vmatpush.bf16.msra.mxu2 %v4326_v18  ;;  %2383 = vmatpush.bf16.msra.mxu1 %v4318_v20  ;;  %v285_v18 = vld [vmem:[%s6643_s0 + $0x848] sm:$0xff]  ;;  %v286_v20 = vld [vmem:[%s6643_s0 + $0x850] sm:$0xff] }
  0x4b   :  { %2481 = vmatpush.bf16.msra.mxu3 %v4334_v19  ;;  %v262_v19 = vld [vmem:[%s6643_s0 + $0x790] sm:$0xff]  ;;  %v525_v24 = vpack.c.bf16 %v285_v18, %v261_v17 }
  0x4c   :  { %v526_v25 = vpack.c.bf16 %v286_v20, %v262_v19  ;;  %v4359_v18 = vld [vmem:[%s6641_s1 + $0x2b0] sm:$0xff] }
  0x4d   :  { %v4367_v19 = vld [vmem:[%s6641_s1 + $0x2f0] sm:$0xff] }
  0x4e   :  { %2433 = vmatpush.bf16.msra.mxu2 %v4325_v33  ;;  %2384 = vmatpush.bf16.msra.mxu1 %v4317_v35  ;;  %v4342_v33 = vld [vmem:[%s6641_s1 + $0x228] sm:$0xff]  ;;  %v4341_v35 = vld [vmem:[%s6641_s1 + $0x220] sm:$0xff] }
  0x4f   :  { %2482 = vmatpush.bf16.msra.mxu3 %v4333_v34  ;;  %v4313_v34 = vld [vmem:[%s6641_s1 + $0x140] sm:$0xff] }
  0x51   :  { %2198 = vmatmul.bf16.gmra.mxu1 %v429_v27  ;;  %2247 = vmatmul.bf16.gmra.mxu2 %v430_v28  ;;  %v264_v27 = vld [vmem:[%s6643_s0 + $0x7a0] sm:$0xff] }
  0x52   :  { %2434 = vmatpush.bf16.msra.mxu2 %v4324_v48  ;;  %2385 = vmatpush.bf16.msra.mxu1 %v4316_v50  ;;  %v288_v28 = vld [vmem:[%s6643_s0 + $0x860] sm:$0xff] }
  0x53   :  { %2483 = vmatpush.bf16.msra.mxu3 %v4332_v49  ;;  %v528_v30 = vpack.c.bf16 %v288_v28, %v264_v27  ;;  %v336_v48 = vld [vmem:[%s6643_s0 + $0x9e0] sm:$0xff]  ;;  %v4339_v49 = vld [vmem:[%s6641_s1 + $0x210] sm:$0xff]  ;;  %v49_v28 = vld [vmem:[%s6643_s0 + $0xe8] sm:$0xff] }
  0x54   :  { %2296 = vmatmul.bf16.gmra.mxu3 %v431_v29  ;;  %2345 = vmatmul.bf16.gmra.mxu0 %v432_v32  ;;  %v4343_v29 = vld [vmem:[%s6641_s1 + $0x230] sm:$0xff]  ;;  %v4329_v32 = vld [vmem:[%s6641_s1 + $0x1c0] sm:$0xff] }
  0x55   :  { %2529 = vmatpush.bf16.msra.mxu0 %v4343_v29  ;;  %v26_v29 = vld [vmem:[%s6643_s0 + $0x30] sm:$0xff] }
  0x56   :  { %2435 = vmatpush.bf16.msra.mxu2 %v4323_v63  ;;  %2386 = vmatpush.bf16.msra.mxu1 %v4315_v1  ;;  %v357_v63 = vld [vmem:[%s6643_s0 + $0xa88] sm:$0xff] }
  0x57   :  { %2484 = vmatpush.bf16.msra.mxu3 %v4331_v0  ;;  %v381_v1 = vld [vmem:[%s6643_s0 + $0xb48] sm:$0xff] }
  0x59   :  { %2530 = vmatpush.bf16.msra.mxu0 %v4342_v33  ;;  %v51_v33 = vld [vmem:[%s6643_s0 + $0xf8] sm:$0xff] }
  0x5a   :  { %2436 = vmatpush.bf16.msra.mxu2 %v4322_v14  ;;  %2387 = vmatpush.bf16.msra.mxu1 %v4314_v16  ;;  %v360_v14 = vld [vmem:[%s6643_s0 + $0xaa0] sm:$0xff] }
  0x5b   :  { %2485 = vmatpush.bf16.msra.mxu3 %v4330_v15  ;;  %v384_v15 = vld [vmem:[%s6643_s0 + $0xb60] sm:$0xff] }
  0x5c   :  { %v576_v16 = vpack.c.bf16 %v384_v15, %v360_v14 }
  0x5d   :  { %2531 = vmatpush.bf16.msra.mxu0 %v4341_v35 }
  0x5e   :  { %2437 = vmatpush.bf16.msra.mxu2 %v4321_v31  ;;  %2388 = vmatpush.bf16.msra.mxu1 %v4313_v34 }
  0x5f   :  { %2486 = vmatpush.bf16.msra.mxu3 %v4329_v32  ;;  %v27_v32 = vld [vmem:[%s6643_s0 + $0x38] sm:$0xff] }
  0x60   :  { %v411_v41 = vpack.c.bf16 %v51_v33, %v27_v32 }
  0x61   :  { %2203 = vmatmul.bf16.gmra.mxu1 %v453_v42  ;;  %2252 = vmatmul.bf16.gmra.mxu2 %v454_v43  ;;  %v4340_v42 = vld [vmem:[%s6641_s1 + $0x218] sm:$0xff]  ;;  %v549_v43 = vpack.c.bf16 %v333_v37, %v309_v36 }
  0x62   :  { %2532 = vmatpush.bf16.msra.mxu0 %v4340_v42  ;;  %2626 = vmatpush.bf16.msrb.mxu2 %v4360_v52  ;;  %v28_v42 = vld [vmem:[%s6643_s0 + $0x40] sm:$0xff] }
  0x63   :  { %2675 = vmatpush.bf16.msrb.mxu3 %v4368_v53  ;;  %2577 = vmatpush.bf16.msrb.mxu1 %v4352_v61  ;;  %v4350_v61 = vld [vmem:[%s6641_s1 + $0x268] sm:$0xff] }
  0x64   :  { %2301 = vmatmul.bf16.gmra.mxu3 %v455_v44  ;;  %2350 = vmatmul.bf16.gmra.mxu0 %v456_v47  ;;  %v550_v44 = vpack.c.bf16 %v334_v39, %v310_v38  ;;  %v312_v47 = vld [vmem:[%s6643_s0 + $0x920] sm:$0xff] }
  0x65   :  { %v552_v50 = vpack.c.bf16 %v336_v48, %v312_v47  ;;  %v4358_v48 = vld [vmem:[%s6641_s1 + $0x2a8] sm:$0xff] }
  0x66   :  { %2533 = vmatpush.bf16.msra.mxu0 %v4339_v49  ;;  %2627 = vmatpush.bf16.msrb.mxu2 %v4359_v18  ;;  %v4366_v49 = vld [vmem:[%s6641_s1 + $0x2e8] sm:$0xff]  ;;  %v76_v18 = vld [vmem:[%s6643_s0 + $0x1c0] sm:$0xff] }
  0x67   :  { %2676 = vmatpush.bf16.msrb.mxu3 %v4367_v19 }
  0x6a   :  { %2534 = vmatpush.bf16.msra.mxu0 %v4338_v55  ;;  %2628 = vmatpush.bf16.msrb.mxu2 %v4358_v48 }
  0x6b   :  { %2677 = vmatpush.bf16.msrb.mxu3 %v4366_v49 }
  0x71   :  { %2208 = vmatmul.bf16.gmra.mxu1 %v477_v57  ;;  %2257 = vmatmul.bf16.gmra.mxu2 %v478_v58 }
  0x74   :  { %2306 = vmatmul.bf16.gmra.mxu3 %v479_v59  ;;  %2355 = vmatmul.bf16.gmra.mxu0 %v480_v62  ;;  %v4337_v62 = vld [vmem:[%s6641_s1 + $0x200] sm:$0xff] }
  0x75   :  { %2535 = vmatpush.bf16.msra.mxu0 %v4337_v62 }
  0x81   :  { %2213 = vmatmul.bf16.gmra.mxu1 %v501_v8  ;;  %2262 = vmatmul.bf16.gmra.mxu2 %v502_v9  ;;  %v573_v9 = vpack.c.bf16 %v381_v1, %v357_v63  ;;  %v73_v63 = vld [vmem:[%s6643_s0 + $0x1a8] sm:$0xff] }
  0x82   :  { %v97_v1 = vld [vmem:[%s6643_s0 + $0x268] sm:$0xff] }
  0x84   :  { %2311 = vmatmul.bf16.gmra.mxu3 %v503_v10  ;;  %2360 = vmatmul.bf16.gmra.mxu0 %v504_v13  ;;  %v574_v10 = vpack.c.bf16 %v382_v3, %v358_v2  ;;  %v575_v13 = vpack.c.bf16 %v383_v5, %v359_v4  ;;  %v74_v2 = vld [vmem:[%s6643_s0 + $0x1b0] sm:$0xff]  ;;  %v75_v5 = vld [vmem:[%s6643_s0 + $0x1b8] sm:$0xff] }
  0x85   :  { %v98_v3 = vld [vmem:[%s6643_s0 + $0x270] sm:$0xff] }
  0x86   :  { %v434_v14 = vpack.c.bf16 %v98_v3, %v74_v2  ;;  %v4356_v3 = vld [vmem:[%s6641_s1 + $0x298] sm:$0xff] }
  0x91   :  { %2218 = vmatmul.bf16.gmra.mxu1 %v525_v24  ;;  %2267 = vmatmul.bf16.gmra.mxu2 %v526_v25  ;;  %v4351_v25 = vld [vmem:[%s6641_s1 + $0x270] sm:$0xff] }
  0x92   :  { %2578 = vmatpush.bf16.msrb.mxu1 %v4351_v25 }
  0x94   :  { %2316 = vmatmul.bf16.gmra.mxu3 %v527_v26  ;;  %2365 = vmatmul.bf16.gmra.mxu0 %v528_v30  ;;  %v25_v26 = vld [vmem:[%s6643_s0 + $0x28] sm:$0xff]  ;;  %v50_v30 = vld [vmem:[%s6643_s0 + $0xf0] sm:$0xff] }
  0x95   :  { %v409_v37 = vpack.c.bf16 %v49_v28, %v25_v26  ;;  %v410_v38 = vpack.c.bf16 %v50_v30, %v26_v29  ;;  %v4357_v28 = vld [vmem:[%s6641_s1 + $0x2a0] sm:$0xff] }
  0x96   :  { %2579 = vmatpush.bf16.msrb.mxu1 %v4350_v61  ;;  %v4365_v29 = vld [vmem:[%s6641_s1 + $0x2e0] sm:$0xff]  ;;  %2629 = vmatpush.bf16.msrb.mxu2 %v4357_v28 }
  0x97   :  { %2678 = vmatpush.bf16.msrb.mxu3 %v4365_v29  ;;  %v148_v61 = vld [vmem:[%s6643_s0 + $0x400] sm:$0xff] }
  0x9a   :  { %2630 = vmatpush.bf16.msrb.mxu2 %v4356_v3 }
  0x9e   :  { %v4946_v45 = vpop.f32.mrf.mxu1 }
  0x9f   :  { %v2156_v49 = vadd.f32 %v4966_v54, %v4946_v45 }
  0xa1   :  { %2223 = vmatmul.bf16.gmra.mxu1 %v549_v43  ;;  %2272 = vmatmul.bf16.gmra.mxu2 %v550_v44  ;;  %v2145_v51 = vpop.f32.mrf.mxu0  ;;  %v52_v43 = vld [vmem:[%s6643_s0 + $0x100] sm:$0xff] }
  0xa2   :  { %v2146_v31 = vadd.f32 %v4966_v54, %v2145_v51 }
  0xa4   :  { %2321 = vmatmul.bf16.gmra.mxu3 %v551_v46  ;;  %v2165_v56 = vpop.f32.mrf.mxu2  ;;  %2370 = vmatmul.bf16.gmra.mxu0 %v552_v50  ;;  %v412_v46 = vpack.c.bf16 %v52_v43, %v28_v42  ;;  %v145_v42 = vld [vmem:[%s6643_s0 + $0x3e8] sm:$0xff]  ;;  %v122_v43 = vld [vmem:[%s6643_s0 + $0x330] sm:$0xff] }
  0xa5   :  { %v4972_v57 = vadd.f32 %v4966_v54, %v2165_v56 }
  0xa6   :  { %v4977_v60 = vpop.f32.mrf.mxu1 }
  0xa7   :  { %v2175_v58 = vpop.f32.mrf.mxu3 }
  0xa8   :  { %v4975_v59 = vadd.f32 %v4966_v54, %v2175_v58 }
  0xa9   :  { %v2147_v0 = vpop.f32.mrf.mxu0 }
  0xaa   :  { %v2148_v50 = vadd.f32 %v4966_v54, %v2147_v0 }
  0xac   :  { %v2167_v6 = vpop.f32.mrf.mxu2 }
  0xad   :  { %v5004_v7 = vadd.f32 %v4966_v54, %v2167_v6  ;;  %v99_v6 = vld [vmem:[%s6643_s0 + $0x278] sm:$0xff] }
  0xae   :  { %v5009_v12 = vpop.f32.mrf.mxu1 }
  0xaf   :  { %v2177_v8 = vpop.f32.mrf.mxu3  ;;  %v2161_v29 = vadd.f32 %v4966_v54, %v5009_v12 }
  0xb0   :  { %v5007_v11 = vadd.f32 %v4966_v54, %v2177_v8 }
  0xb1   :  { %2228 = vmatmul.bf16.gmra.mxu1 %v573_v9  ;;  %2277 = vmatmul.bf16.gmra.mxu2 %v574_v10  ;;  %v2150_v17 = vpop.f32.mrf.mxu0 }
  0xb2   :  { %v2151_v4 = vadd.f32 %v4966_v54, %v2150_v17  ;;  %v100_v17 = vld [vmem:[%s6643_s0 + $0x280] sm:$0xff] }
  0xb3   :  { %v436_v25 = vpack.c.bf16 %v100_v17, %v76_v18  ;;  %v169_v18 = vld [vmem:[%s6643_s0 + $0x4a8] sm:$0xff] }
  0xb4   :  { %2326 = vmatmul.bf16.gmra.mxu3 %v575_v13  ;;  %v2170_v20 = vpop.f32.mrf.mxu2  ;;  %2375 = vmatmul.bf16.gmra.mxu0 %v576_v16  ;;  %v433_v13 = vpack.c.bf16 %v97_v1, %v73_v63  ;;  %v435_v16 = vpack.c.bf16 %v99_v6, %v75_v5  ;;  %v2158_v6 = vadd.f32 %v4966_v54, %v4977_v60  ;;  %v193_v60 = vld [vmem:[%s6643_s0 + $0x568] sm:$0xff] }
  0xb5   :  { %v5024_v21 = vadd.f32 %v4966_v54, %v2170_v20 }
  0xb6   :  { %v5029_v24 = vpop.f32.mrf.mxu1 }
  0xb7   :  { %v2180_v22 = vpop.f32.mrf.mxu3 }
  0xb8   :  { %v5027_v23 = vadd.f32 %v4966_v54, %v2180_v22 }
  0xb9   :  { %v5037_v27 = vpop.f32.mrf.mxu0 }
  0xba   :  { %v2153_v30 = vadd.f32 %v4966_v54, %v5037_v27 }
  0xbc   :  { %v2172_v34 = vpop.f32.mrf.mxu2 }
  0xbd   :  { %v5056_v35 = vadd.f32 %v4966_v54, %v2172_v34 }
  0xbe   :  { %v2194_v40 = vpop.f32.mrf.mxu1 }
  0xbf   :  { %v2182_v36 = vpop.f32.mrf.mxu3  ;;  %v2195_v44 = vadd.f32 %v2194_v40, %v2146_v31 }
  0xc0   :  { %v5059_v39 = vadd.f32 %v4966_v54, %v2182_v36 }
  0xc1   :  { %2389 = vmatmul.bf16.vlgmr.msra.gmra.mxu1 %v409_v37  ;;  %2438 = vmatmul.bf16.vlgmr.msra.gmra.mxu2 %v410_v38  ;;  %v2341_v47 = vpop.f32.mrf.mxu0  ;;  %v4349_v38 = vld [vmem:[%s6641_s1 + $0x260] sm:$0xff] }
  0xc2   :  { %2580 = vmatpush.bf16.msrb.mxu1 %v4349_v38  ;;  %v196_v38 = vld [vmem:[%s6643_s0 + $0x580] sm:$0xff] }
  0xc4   :  { %2487 = vmatmul.bf16.vlgmr.msra.gmra.mxu3 %v411_v41  ;;  %v2243_v51 = vpop.f32.mrf.mxu2  ;;  %2536 = vmatmul.bf16.vlgmr.msra.gmra.mxu0 %v412_v46  ;;  %v121_v41 = vld [vmem:[%s6643_s0 + $0x328] sm:$0xff]  ;;  %v123_v46 = vld [vmem:[%s6643_s0 + $0x338] sm:$0xff] }
  0xc5   :  { %v2244_v52 = vadd.f32 %v2243_v51, %v2195_v44  ;;  %v146_v44 = vld [vmem:[%s6643_s0 + $0x3f0] sm:$0xff] }
  0xc6   :  { %v2196_v55 = vpop.f32.mrf.mxu1 }
  0xc7   :  { %v2292_v53 = vpop.f32.mrf.mxu3  ;;  %v2197_v58 = vadd.f32 %v2196_v55, %v2148_v50 }
  0xc8   :  { %v2293_v56 = vadd.f32 %v2292_v53, %v2244_v52  ;;  %v457_v52 = vpack.c.bf16 %v145_v42, %v121_v41  ;;  %v458_v53 = vpack.c.bf16 %v146_v44, %v122_v43  ;;  %v4355_v44 = vld [vmem:[%s6641_s1 + $0x290] sm:$0xff] }
  0xc9   :  { %v2343_v0 = vpop.f32.mrf.mxu0  ;;  %2631 = vmatpush.bf16.msrb.mxu2 %v4355_v44 }
  0xca   :  { %v5077_v62 = vadd.f32 %v2341_v47, %v2293_v56  ;;  %v147_v47 = vld [vmem:[%s6643_s0 + $0x3f8] sm:$0xff] }
  0xcb   :  { %v459_v56 = vpack.c.bf16 %v147_v47, %v123_v46  ;;  %v4363_v46 = vld [vmem:[%s6641_s1 + $0x2d0] sm:$0xff] }
  0xcc   :  { %v2245_v8 = vpop.f32.mrf.mxu2 }
  0xcd   :  { %v2246_v9 = vadd.f32 %v2245_v8, %v2197_v58  ;;  %v124_v58 = vld [vmem:[%s6643_s0 + $0x340] sm:$0xff] }
  0xce   :  { %v2199_v15 = vpop.f32.mrf.mxu1  ;;  %v460_v45 = vpack.c.bf16 %v148_v61, %v124_v58  ;;  %v217_v58 = vld [vmem:[%s6643_s0 + $0x628] sm:$0xff] }
  0xcf   :  { %v2294_v10 = vpop.f32.mrf.mxu3  ;;  %v2200_v20 = vadd.f32 %v2199_v15, %v2151_v4  ;;  %v4364_v4 = vld [vmem:[%s6641_s1 + $0x2d8] sm:$0xff] }
  0xd0   :  { %v2295_v19 = vadd.f32 %v2294_v10, %v2246_v9  ;;  %2679 = vmatpush.bf16.msrb.mxu3 %v4364_v4  ;;  %v4348_v15 = vld [vmem:[%s6641_s1 + $0x258] sm:$0xff] }
  0xd1   :  { %2394 = vmatmul.bf16.gmra.mxu1 %v433_v13  ;;  %2443 = vmatmul.bf16.gmra.mxu2 %v434_v14  ;;  %v2346_v26 = vpop.f32.mrf.mxu0 }
  0xd2   :  { %v5104_v22 = vadd.f32 %v2343_v0, %v2295_v19  ;;  %2581 = vmatpush.bf16.msrb.mxu1 %v4348_v15  ;;  %v170_v19 = vld [vmem:[%s6643_s0 + $0x4b0] sm:$0xff] }
  0xd4   :  { %2492 = vmatmul.bf16.gmra.mxu3 %v435_v16  ;;  %v2248_v31 = vpop.f32.mrf.mxu2  ;;  %2541 = vmatmul.bf16.gmra.mxu0 %v436_v25  ;;  %v171_v25 = vld [vmem:[%s6643_s0 + $0x4b8] sm:$0xff] }
  0xd5   :  { %v2249_v32 = vadd.f32 %v2248_v31, %v2200_v20  ;;  %v194_v20 = vld [vmem:[%s6643_s0 + $0x570] sm:$0xff]  ;;  %2680 = vmatpush.bf16.msrb.mxu3 %v4363_v46 }
  0xd6   :  { %v2201_v34 = vpop.f32.mrf.mxu1 }
  0xd7   :  { %v2297_v33 = vpop.f32.mrf.mxu3  ;;  %v2202_v37 = vadd.f32 %v2201_v34, %v2153_v30 }
  0xd8   :  { %v2298_v36 = vadd.f32 %v2297_v33, %v2249_v32  ;;  %v481_v32 = vpack.c.bf16 %v193_v60, %v169_v18  ;;  %v482_v33 = vpack.c.bf16 %v194_v20, %v170_v19  ;;  %v4354_v19 = vld [vmem:[%s6641_s1 + $0x288] sm:$0xff] }
  0xd9   :  { %v2348_v27 = vpop.f32.mrf.mxu0  ;;  %v4362_v20 = vld [vmem:[%s6641_s1 + $0x2c8] sm:$0xff]  ;;  %2632 = vmatpush.bf16.msrb.mxu2 %v4354_v19  ;;  %v4372_v19 = vld [vmem:[%s6641_s1 + $0x318] sm:$0xff] }
  0xda   :  { %v5117_v40 = vadd.f32 %v2346_v26, %v2298_v36  ;;  %v195_v26 = vld [vmem:[%s6643_s0 + $0x578] sm:$0xff]  ;;  %2681 = vmatpush.bf16.msrb.mxu3 %v4362_v20 }
  0xdb   :  { %v483_v36 = vpack.c.bf16 %v195_v26, %v171_v25 }
  0xdc   :  { %v2250_v48 = vpop.f32.mrf.mxu2 }
  0xdd   :  { %v2251_v50 = vadd.f32 %v2250_v48, %v2202_v37  ;;  %v172_v37 = vld [vmem:[%s6643_s0 + $0x4c0] sm:$0xff]  ;;  %v2163_v48 = vadd.f32 %v4966_v54, %v5029_v24  ;;  %v241_v54 = vld [vmem:[%s6643_s0 + $0x6e8] sm:$0xff]  ;;  %v218_v24 = vld [vmem:[%s6643_s0 + $0x630] sm:$0xff] }
  0xde   :  { %v2204_v55 = vpop.f32.mrf.mxu1  ;;  %v484_v12 = vpack.c.bf16 %v196_v38, %v172_v37  ;;  %v290_v37 = vld [vmem:[%s6643_s0 + $0x870] sm:$0xff]  ;;  %v267_v38 = vld [vmem:[%s6643_s0 + $0x7b8] sm:$0xff] }
  0xdf   :  { %v2299_v51 = vpop.f32.mrf.mxu3  ;;  %v2205_v0 = vadd.f32 %v2204_v55, %v2156_v49  ;;  %v4347_v55 = vld [vmem:[%s6641_s1 + $0x250] sm:$0xff] }
  0xe0   :  { %v2300_v63 = vadd.f32 %v2299_v51, %v2251_v50  ;;  %2582 = vmatpush.bf16.msrb.mxu1 %v4347_v55  ;;  %v4375_v55 = vld [vmem:[%s6641_s1 + $0x330] sm:$0xff] }
  0xe1   :  { %2399 = vmatmul.bf16.gmra.mxu1 %v457_v52  ;;  %2448 = vmatmul.bf16.gmra.mxu2 %v458_v53  ;;  %v2351_v2 = vpop.f32.mrf.mxu0 }
  0xe2   :  { %v5145_v1 = vadd.f32 %v2348_v27, %v2300_v63  ;;  %v242_v63 = vld [vmem:[%s6643_s0 + $0x6f0] sm:$0xff] }
  0xe4   :  { %2497 = vmatmul.bf16.gmra.mxu3 %v459_v56  ;;  %v2253_v5 = vpop.f32.mrf.mxu2  ;;  %2546 = vmatmul.bf16.gmra.mxu0 %v460_v45  ;;  %v243_v45 = vld [vmem:[%s6643_s0 + $0x6f8] sm:$0xff] }
  0xe5   :  { %v2254_v8 = vadd.f32 %v2253_v5, %v2205_v0  ;;  %v219_v0 = vld [vmem:[%s6643_s0 + $0x638] sm:$0xff]  ;;  %v505_v5 = vpack.c.bf16 %v241_v54, %v217_v58 }
  0xe6   :  { %v2206_v10 = vpop.f32.mrf.mxu1 }
  0xe7   :  { %v2302_v9 = vpop.f32.mrf.mxu3  ;;  %v2207_v14 = vadd.f32 %v2206_v10, %v2158_v6  ;;  %v506_v6 = vpack.c.bf16 %v242_v63, %v218_v24  ;;  %v220_v10 = vld [vmem:[%s6643_s0 + $0x640] sm:$0xff]  ;;  %v4374_v63 = vld [vmem:[%s6641_s1 + $0x328] sm:$0xff] }
  0xe8   :  { %v2303_v13 = vadd.f32 %v2302_v9, %v2254_v8  ;;  %v507_v9 = vpack.c.bf16 %v243_v45, %v219_v0  ;;  %v4353_v24 = vld [vmem:[%s6641_s1 + $0x280] sm:$0xff] }
  0xe9   :  { %v2353_v17 = vpop.f32.mrf.mxu0  ;;  %2633 = vmatpush.bf16.msrb.mxu2 %v4353_v24  ;;  %v363_v24 = vld [vmem:[%s6643_s0 + $0xab8] sm:$0xff] }
  0xea   :  { %v5158_v16 = vadd.f32 %v2351_v2, %v2303_v13  ;;  %v244_v13 = vld [vmem:[%s6643_s0 + $0x700] sm:$0xff] }
  0xec   :  { %v2255_v28 = vpop.f32.mrf.mxu2 }
  0xed   :  { %v2256_v30 = vadd.f32 %v2255_v28, %v2207_v14 }
  0xee   :  { %v2209_v34 = vpop.f32.mrf.mxu1 }
  0xef   :  { %v2304_v31 = vpop.f32.mrf.mxu3  ;;  %v2210_v27 = vadd.f32 %v2209_v34, %v2161_v29 }
  0xf0   :  { %v2305_v41 = vadd.f32 %v2304_v31, %v2256_v30  ;;  %v4346_v31 = vld [vmem:[%s6641_s1 + $0x248] sm:$0xff] }
  0xf1   :  { %2404 = vmatmul.bf16.gmra.mxu1 %v481_v32  ;;  %2453 = vmatmul.bf16.gmra.mxu2 %v482_v33  ;;  %v2356_v43 = vpop.f32.mrf.mxu0  ;;  %v265_v33 = vld [vmem:[%s6643_s0 + $0x7a8] sm:$0xff] }
  0xf2   :  { %v5186_v42 = vadd.f32 %v2353_v17, %v2305_v41  ;;  %v508_v17 = vpack.c.bf16 %v244_v13, %v220_v10  ;;  %2583 = vmatpush.bf16.msrb.mxu1 %v4346_v31  ;;  %v291_v41 = vld [vmem:[%s6643_s0 + $0x878] sm:$0xff]  ;;  %v313_v10 = vld [vmem:[%s6643_s0 + $0x928] sm:$0xff]  ;;  %v316_v31 = vld [vmem:[%s6643_s0 + $0x940] sm:$0xff] }
  0xf4   :  { %2502 = vmatmul.bf16.gmra.mxu3 %v483_v36  ;;  %v2258_v47 = vpop.f32.mrf.mxu2  ;;  %2551 = vmatmul.bf16.gmra.mxu0 %v484_v12  ;;  %v289_v36 = vld [vmem:[%s6643_s0 + $0x868] sm:$0xff] }
  0xf5   :  { %v2259_v49 = vadd.f32 %v2258_v47, %v2210_v27  ;;  %v4376_v27 = vld [vmem:[%s6641_s1 + $0x338] sm:$0xff]  ;;  %v529_v46 = vpack.c.bf16 %v289_v36, %v265_v33  ;;  %v340_v33 = vld [vmem:[%s6643_s0 + $0xa00] sm:$0xff] }
  0xf6   :  { %v2211_v51 = vpop.f32.mrf.mxu1  ;;  %2724 = vmatpush.bf16.msrb.mxu0 %v4376_v27  ;;  %v4392_v27 = vld [vmem:[%s6641_s1 + $0x3b8] sm:$0xff] }
  0xf7   :  { %v2307_v50 = vpop.f32.mrf.mxu3  ;;  %v2212_v53 = vadd.f32 %v2211_v51, %v2163_v48  ;;  %v292_v51 = vld [vmem:[%s6643_s0 + $0x880] sm:$0xff]  ;;  %2822 = vmatpush.bf16.msra.mxu2 %v4392_v27 }
  0xf8   :  { %v2308_v52 = vadd.f32 %v2307_v50, %v2259_v49  ;;  %v531_v49 = vpack.c.bf16 %v291_v41, %v267_v38  ;;  %v268_v50 = vld [vmem:[%s6643_s0 + $0x7c0] sm:$0xff]  ;;  %v556_v38 = vpack.c.bf16 %v340_v33, %v316_v31  ;;  %v53_v33 = vld [vmem:[%s6643_s0 + $0x108] sm:$0xff] }
  0xf9   :  { %v2358_v61 = vpop.f32.mrf.mxu0 }
  0xfa   :  { %v5199_v56 = vadd.f32 %v2356_v43, %v2308_v52  ;;  %2725 = vmatpush.bf16.msrb.mxu0 %v4375_v55 }
  0xfc   :  { %v2260_v2 = vpop.f32.mrf.mxu2 }
  0xfd   :  { %v2261_v3 = vadd.f32 %v2260_v2, %v2212_v53 }
  0xfe   :  { %v2214_v8 = vpop.f32.mrf.mxu1  ;;  %2726 = vmatpush.bf16.msrb.mxu0 %v4374_v63 }
  0xff   :  { %v2309_v4 = vpop.f32.mrf.mxu3  ;;  %v2215_v15 = vadd.f32 %v2214_v8, %v4972_v57  ;;  %v4373_v8 = vld [vmem:[%s6641_s1 + $0x320] sm:$0xff] }
 0x100   :  { %v2310_v14 = vadd.f32 %v2309_v4, %v2261_v3 }
 0x101   :  { %2409 = vmatmul.bf16.gmra.mxu1 %v505_v5  ;;  %2458 = vmatmul.bf16.gmra.mxu2 %v506_v6  ;;  %v2361_v60 = vpop.f32.mrf.mxu0  ;;  %v4345_v6 = vld [vmem:[%s6641_s1 + $0x240] sm:$0xff] }
 0x102   :  { %v5226_v18 = vadd.f32 %v2358_v61, %v2310_v14  ;;  %v532_v61 = vpack.c.bf16 %v292_v51, %v268_v50  ;;  %2584 = vmatpush.bf16.msrb.mxu1 %v4345_v6  ;;  %v314_v14 = vld [vmem:[%s6643_s0 + $0x930] sm:$0xff]  ;;  %2727 = vmatpush.bf16.msrb.mxu0 %v4373_v8  ;;  %v4384_v50 = vld [vmem:[%s6641_s1 + $0x378] sm:$0xff]  ;;  %v4369_v51 = vld [vmem:[%s6641_s1 + $0x300] sm:$0xff] }
 0x103   :  { %v364_v6 = vld [vmem:[%s6643_s0 + $0xac0] sm:$0xff] }
 0x104   :  { %2507 = vmatmul.bf16.gmra.mxu3 %v507_v9  ;;  %v2263_v25 = vpop.f32.mrf.mxu2  ;;  %2556 = vmatmul.bf16.gmra.mxu0 %v508_v17  ;;  %v315_v17 = vld [vmem:[%s6643_s0 + $0x938] sm:$0xff]  ;;  %v388_v8 = vld [vmem:[%s6643_s0 + $0xb80] sm:$0xff] }
 0x105   :  { %v2264_v26 = vadd.f32 %v2263_v25, %v2215_v15  ;;  %v338_v15 = vld [vmem:[%s6643_s0 + $0x9f0] sm:$0xff] }
 0x106   :  { %v2216_v28 = vpop.f32.mrf.mxu1  ;;  %2728 = vmatpush.bf16.msrb.mxu0 %v4372_v19  ;;  %2773 = vmatpush.bf16.msra.mxu1 %v4384_v50 }
 0x107   :  { %v2312_v57 = vpop.f32.mrf.mxu3  ;;  %v2217_v30 = vadd.f32 %v2216_v28, %v5004_v7  ;;  %v266_v7 = vld [vmem:[%s6643_s0 + $0x7b0] sm:$0xff]  ;;  %v554_v28 = vpack.c.bf16 %v338_v15, %v314_v14  ;;  %v580_v14 = vpack.c.bf16 %v388_v8, %v364_v6  ;;  %v79_v6 = vld [vmem:[%s6643_s0 + $0x1d8] sm:$0xff] }
 0x108   :  { %v2313_v29 = vadd.f32 %v2312_v57, %v2264_v26  ;;  %v530_v47 = vpack.c.bf16 %v290_v37, %v266_v7  ;;  %v4371_v7 = vld [vmem:[%s6641_s1 + $0x310] sm:$0xff]  ;;  %v103_v8 = vld [vmem:[%s6643_s0 + $0x298] sm:$0xff] }
 0x109   :  { %v2363_v34 = vpop.f32.mrf.mxu0 }
 0x10a   :  { %v5238_v32 = vadd.f32 %v2361_v60, %v2313_v29  ;;  %v339_v60 = vld [vmem:[%s6643_s0 + $0x9f8] sm:$0xff]  ;;  %2729 = vmatpush.bf16.msrb.mxu0 %v4371_v7 }
 0x10b   :  { %v55_v7 = vld [vmem:[%s6643_s0 + $0x118] sm:$0xff] }
 0x10c   :  { %v2265_v12 = vpop.f32.mrf.mxu2 }
 0x10d   :  { %v2266_v43 = vadd.f32 %v2265_v12, %v2217_v30  ;;  %v555_v30 = vpack.c.bf16 %v339_v60, %v315_v17  ;;  %v4370_v12 = vld [vmem:[%s6641_s1 + $0x308] sm:$0xff]  ;;  %v4391_v17 = vld [vmem:[%s6641_s1 + $0x3b0] sm:$0xff] }
 0x10e   :  { %v2219_v48 = vpop.f32.mrf.mxu1  ;;  %2730 = vmatpush.bf16.msrb.mxu0 %v4370_v12  ;;  %v4399_v60 = vld [vmem:[%s6641_s1 + $0x3f0] sm:$0xff]  ;;  %2823 = vmatpush.bf16.msra.mxu2 %v4391_v17 }
 0x10f   :  { %v2314_v44 = vpop.f32.mrf.mxu3  ;;  %v2220_v53 = vadd.f32 %v2219_v48, %v5024_v21  ;;  %v4361_v21 = vld [vmem:[%s6641_s1 + $0x2c0] sm:$0xff] }
 0x110   :  { %v2315_v52 = vadd.f32 %v2314_v44, %v2266_v43  ;;  %2682 = vmatpush.bf16.msrb.mxu3 %v4361_v21  ;;  %v387_v21 = vld [vmem:[%s6643_s0 + $0xb78] sm:$0xff] }
 0x111   :  { %2414 = vmatmul.bf16.gmra.mxu1 %v529_v46  ;;  %2463 = vmatmul.bf16.gmra.mxu2 %v530_v47  ;;  %v2366_v54 = vpop.f32.mrf.mxu0 }
 0x112   :  { %v5271_v58 = vadd.f32 %v2363_v34, %v2315_v52  ;;  %2731 = vmatpush.bf16.msrb.mxu0 %v4369_v51 }
 0x114   :  { %2512 = vmatmul.bf16.gmra.mxu3 %v531_v49  ;;  %v2268_v0 = vpop.f32.mrf.mxu2  ;;  %2561 = vmatmul.bf16.gmra.mxu0 %v532_v61  ;;  %v362_v61 = vld [vmem:[%s6643_s0 + $0xab0] sm:$0xff] }
 0x115   :  { %v2269_v45 = vadd.f32 %v2268_v0, %v2220_v53  ;;  %v361_v53 = vld [vmem:[%s6643_s0 + $0xaa8] sm:$0xff] }
 0x116   :  { %v2221_v3 = vpop.f32.mrf.mxu1 }
 0x117   :  { %v2317_v2 = vpop.f32.mrf.mxu3  ;;  %v2222_v5 = vadd.f32 %v2221_v3, %v5056_v35  ;;  %v337_v35 = vld [vmem:[%s6643_s0 + $0x9e8] sm:$0xff] }
 0x118   :  { %v2318_v4 = vadd.f32 %v2317_v2, %v2269_v45  ;;  %v553_v57 = vpack.c.bf16 %v337_v35, %v313_v10 }
 0x119   :  { %v2368_v13 = vpop.f32.mrf.mxu0 }
 0x11a   :  { %v5289_v9 = vadd.f32 %v2366_v54, %v2318_v4  ;;  %v386_v54 = vld [vmem:[%s6643_s0 + $0xb70] sm:$0xff] }
 0x11b   :  { %v578_v3 = vpack.c.bf16 %v386_v54, %v362_v61 }
 0x11c   :  { %v2270_v20 = vpop.f32.mrf.mxu2 }
 0x11d   :  { %v2271_v25 = vadd.f32 %v2270_v20, %v2222_v5  ;;  %v579_v5 = vpack.c.bf16 %v387_v21, %v363_v24 }
 0x11e   :  { %v2224_v29 = vpop.f32.mrf.mxu1 }
 0x11f   :  { %v2319_v26 = vpop.f32.mrf.mxu3  ;;  %v2225_v36 = vadd.f32 %v2224_v29, %v4975_v59  ;;  %v4400_v59 = vld [vmem:[%s6641_s1 + $0x3f8] sm:$0xff] }
 0x120   :  { %v2320_v34 = vadd.f32 %v2319_v26, %v2271_v25  ;;  %2871 = vmatpush.bf16.msra.mxu3 %v4400_v59 }
 0x121   :  { %2419 = vmatmul.bf16.gmra.mxu1 %v553_v57  ;;  %2468 = vmatmul.bf16.gmra.mxu2 %v554_v28  ;;  %v2371_v41 = vpop.f32.mrf.mxu0  ;;  %v4383_v28 = vld [vmem:[%s6641_s1 + $0x370] sm:$0xff] }
 0x122   :  { %v5322_v37 = vadd.f32 %v2368_v13, %v2320_v34  ;;  %2774 = vmatpush.bf16.msra.mxu1 %v4383_v28  ;;  %v54_v34 = vld [vmem:[%s6643_s0 + $0x110] sm:$0xff] }
 0x124   :  { %2517 = vmatmul.bf16.gmra.mxu3 %v555_v30  ;;  %v2273_v43 = vpop.f32.mrf.mxu2  ;;  %2566 = vmatmul.bf16.gmra.mxu0 %v556_v38  ;;  %v29_v30 = vld [vmem:[%s6643_s0 + $0x48] sm:$0xff] }
 0x125   :  { %v2274_v44 = vadd.f32 %v2273_v43, %v2225_v36  ;;  %2872 = vmatpush.bf16.msra.mxu3 %v4399_v60  ;;  %v31_v36 = vld [vmem:[%s6643_s0 + $0x58] sm:$0xff]  ;;  %v413_v59 = vpack.c.bf16 %v53_v33, %v29_v30  ;;  %v4397_v33 = vld [vmem:[%s6641_s1 + $0x3e0] sm:$0xff] }
 0x126   :  { %v2226_v47 = vpop.f32.mrf.mxu1 }
 0x127   :  { %v2322_v46 = vpop.f32.mrf.mxu3  ;;  %v2227_v49 = vadd.f32 %v2226_v47, %v5007_v11  ;;  %v385_v11 = vld [vmem:[%s6643_s0 + $0xb68] sm:$0xff]  ;;  %v56_v47 = vld [vmem:[%s6643_s0 + $0x120] sm:$0xff] }
 0x128   :  { %v2323_v48 = vadd.f32 %v2322_v46, %v2274_v44  ;;  %v577_v2 = vpack.c.bf16 %v385_v11, %v361_v53  ;;  %v415_v44 = vpack.c.bf16 %v55_v7, %v31_v36  ;;  %v32_v46 = vld [vmem:[%s6643_s0 + $0x60] sm:$0xff]  ;;  %v4398_v11 = vld [vmem:[%s6641_s1 + $0x3e8] sm:$0xff] }
 0x129   :  { %v2373_v55 = vpop.f32.mrf.mxu0  ;;  %v416_v51 = vpack.c.bf16 %v56_v47, %v32_v46  ;;  %2873 = vmatpush.bf16.msra.mxu3 %v4398_v11  ;;  %v127_v46 = vld [vmem:[%s6643_s0 + $0x358] sm:$0xff] }
 0x12a   :  { %v5340_v52 = vadd.f32 %v2371_v41, %v2323_v48  ;;  %v151_v47 = vld [vmem:[%s6643_s0 + $0x418] sm:$0xff] }
 0x12c   :  { %v2275_v63 = vpop.f32.mrf.mxu2 }
 0x12d   :  { %v2276_v0 = vadd.f32 %v2275_v63, %v2227_v49  ;;  %2874 = vmatpush.bf16.msra.mxu3 %v4397_v33 }
 0x12e   :  { %v2229_v4 = vpop.f32.mrf.mxu1 }
 0x12f   :  { %v2324_v45 = vpop.f32.mrf.mxu3  ;;  %v2230_v13 = vadd.f32 %v2229_v4, %v5027_v23  ;;  %v101_v4 = vld [vmem:[%s6643_s0 + $0x288] sm:$0xff] }
 0x130   :  { %v2325_v10 = vadd.f32 %v2324_v45, %v2276_v0  ;;  %v4382_v0 = vld [vmem:[%s6641_s1 + $0x368] sm:$0xff] }
 0x131   :  { %2424 = vmatmul.bf16.gmra.mxu1 %v577_v2  ;;  %2473 = vmatmul.bf16.gmra.mxu2 %v578_v3  ;;  %v2376_v15 = vpop.f32.mrf.mxu0  ;;  %v77_v2 = vld [vmem:[%s6643_s0 + $0x1c8] sm:$0xff] }
 0x132   :  { %v5367_v35 = vadd.f32 %v2373_v55, %v2325_v10  ;;  %v4390_v55 = vld [vmem:[%s6641_s1 + $0x3a8] sm:$0xff]  ;;  %2775 = vmatpush.bf16.msra.mxu1 %v4382_v0 }
 0x133   :  { %2824 = vmatpush.bf16.msra.mxu2 %v4390_v55 }
 0x134   :  { %2522 = vmatmul.bf16.gmra.mxu3 %v579_v5  ;;  %v2278_v19 = vpop.f32.mrf.mxu2  ;;  %2571 = vmatmul.bf16.gmra.mxu0 %v580_v14  ;;  %v102_v5 = vld [vmem:[%s6643_s0 + $0x290] sm:$0xff] }
 0x135   :  { %v2279_v20 = vadd.f32 %v2278_v19, %v2230_v13  ;;  %v439_v19 = vpack.c.bf16 %v103_v8, %v79_v6 }
 0x136   :  { %v2231_v25 = vpop.f32.mrf.mxu1 }
 0x137   :  { %v2327_v23 = vpop.f32.mrf.mxu3  ;;  %v2232_v57 = vadd.f32 %v2231_v25, %v5059_v39  ;;  %v30_v39 = vld [vmem:[%s6643_s0 + $0x50] sm:$0xff] }
 0x138   :  { %v2328_v26 = vadd.f32 %v2327_v23, %v2279_v20  ;;  %v414_v12 = vpack.c.bf16 %v54_v34, %v30_v39  ;;  %v80_v20 = vld [vmem:[%s6643_s0 + $0x1e0] sm:$0xff] }
 0x139   :  { %v2378_v31 = vpop.f32.mrf.mxu0  ;;  %v104_v23 = vld [vmem:[%s6643_s0 + $0x2a0] sm:$0xff] }
 0x13a   :  { %v5379_v29 = vadd.f32 %v2376_v15, %v2328_v26  ;;  %v437_v15 = vpack.c.bf16 %v101_v4, %v77_v2  ;;  %v440_v28 = vpack.c.bf16 %v104_v23, %v80_v20  ;;  %v4396_v4 = vld [vmem:[%s6641_s1 + $0x3d8] sm:$0xff] }
 0x13b   :  { %2875 = vmatpush.bf16.msra.mxu3 %v4396_v4  ;;  %v175_v20 = vld [vmem:[%s6643_s0 + $0x4d8] sm:$0xff] }
 0x13c   :  { %v2280_v38 = vpop.f32.mrf.mxu2  ;;  %v199_v23 = vld [vmem:[%s6643_s0 + $0x598] sm:$0xff] }
 0x13d   :  { %v2281_v41 = vadd.f32 %v2280_v38, %v2232_v57 }
 0x13e   :  { %v2390_v43 = vpop.f32.mrf.mxu1 }
 0x13f   :  { %v2329_v27 = vpop.f32.mrf.mxu3  ;;  %v2391_v49 = vadd.f32 %v2390_v43, %v5077_v62  ;;  %v149_v43 = vld [vmem:[%s6643_s0 + $0x408] sm:$0xff] }
 0x140   :  { %v2330_v48 = vadd.f32 %v2329_v27, %v2281_v41  ;;  %v4381_v41 = vld [vmem:[%s6641_s1 + $0x360] sm:$0xff] }
 0x141   :  { %2585 = vmatmul.bf16.vlgmr.msrb.gmra.mxu1 %v413_v59  ;;  %2634 = vmatmul.bf16.vlgmr.msrb.gmra.mxu2 %v414_v12  ;;  %v2537_v53 = vpop.f32.mrf.mxu0  ;;  %v125_v59 = vld [vmem:[%s6643_s0 + $0x348] sm:$0xff] }
 0x142   :  { %v5406_v50 = vadd.f32 %v2378_v31, %v2330_v48  ;;  %v4389_v31 = vld [vmem:[%s6641_s1 + $0x3a0] sm:$0xff]  ;;  %2776 = vmatpush.bf16.msra.mxu1 %v4381_v41 }
 0x143   :  { %2825 = vmatpush.bf16.msra.mxu2 %v4389_v31 }
 0x144   :  { %2683 = vmatmul.bf16.vlgmr.msrb.gmra.mxu3 %v415_v44  ;;  %v2439_v61 = vpop.f32.mrf.mxu2  ;;  %2732 = vmatmul.bf16.vlgmr.msrb.gmra.mxu0 %v416_v51  ;;  %v150_v44 = vld [vmem:[%s6643_s0 + $0x410] sm:$0xff] }
 0x145   :  { %v2440_v54 = vadd.f32 %v2439_v61, %v2391_v49  ;;  %v463_v61 = vpack.c.bf16 %v151_v47, %v127_v46 }
 0x146   :  { %v2392_v24 = vpop.f32.mrf.mxu1 }
 0x147   :  { %v2488_v62 = vpop.f32.mrf.mxu3  ;;  %v2393_v63 = vadd.f32 %v2392_v24, %v5104_v22  ;;  %v78_v22 = vld [vmem:[%s6643_s0 + $0x1d0] sm:$0xff] }
 0x148   :  { %v2489_v21 = vadd.f32 %v2488_v62, %v2440_v54  ;;  %v438_v17 = vpack.c.bf16 %v102_v5, %v78_v22  ;;  %v128_v54 = vld [vmem:[%s6643_s0 + $0x360] sm:$0xff] }
 0x149   :  { %v2539_v3 = vpop.f32.mrf.mxu0  ;;  %v152_v62 = vld [vmem:[%s6643_s0 + $0x420] sm:$0xff] }
 0x14a   :  { %v5418_v45 = vadd.f32 %v2537_v53, %v2489_v21  ;;  %v461_v53 = vpack.c.bf16 %v149_v43, %v125_v59  ;;  %v464_v0 = vpack.c.bf16 %v152_v62, %v128_v54  ;;  %v4395_v43 = vld [vmem:[%s6641_s1 + $0x3d0] sm:$0xff]  ;;  %v223_v54 = vld [vmem:[%s6643_s0 + $0x658] sm:$0xff] }
 0x14b   :  { %2876 = vmatpush.bf16.msra.mxu3 %v4395_v43  ;;  %v247_v62 = vld [vmem:[%s6643_s0 + $0x718] sm:$0xff] }
 0x14c   :  { %v2441_v10 = vpop.f32.mrf.mxu2 }
 0x14d   :  { %v2442_v13 = vadd.f32 %v2441_v10, %v2393_v63 }
 0x14e   :  { %v2395_v60 = vpop.f32.mrf.mxu1 }
 0x14f   :  { %v2490_v14 = vpop.f32.mrf.mxu3  ;;  %v2396_v26 = vadd.f32 %v2395_v60, %v5117_v40  ;;  %v197_v60 = vld [vmem:[%s6643_s0 + $0x588] sm:$0xff] }
 0x150   :  { %v2491_v25 = vadd.f32 %v2490_v14, %v2442_v13  ;;  %v4380_v13 = vld [vmem:[%s6641_s1 + $0x358] sm:$0xff] }
 0x151   :  { %2590 = vmatmul.bf16.gmra.mxu1 %v437_v15  ;;  %2639 = vmatmul.bf16.gmra.mxu2 %v438_v17  ;;  %v2542_v30 = vpop.f32.mrf.mxu0  ;;  %v173_v15 = vld [vmem:[%s6643_s0 + $0x4c8] sm:$0xff] }
 0x152   :  { %v5445_v57 = vadd.f32 %v2539_v3, %v2491_v25  ;;  %v4388_v3 = vld [vmem:[%s6641_s1 + $0x398] sm:$0xff]  ;;  %2777 = vmatpush.bf16.msra.mxu1 %v4380_v13 }
 0x153   :  { %2826 = vmatpush.bf16.msra.mxu2 %v4388_v3 }
 0x154   :  { %2688 = vmatmul.bf16.gmra.mxu3 %v439_v19  ;;  %v2444_v39 = vpop.f32.mrf.mxu2  ;;  %2737 = vmatmul.bf16.gmra.mxu0 %v440_v28  ;;  %v198_v19 = vld [vmem:[%s6643_s0 + $0x590] sm:$0xff] }
 0x155   :  { %v2445_v34 = vadd.f32 %v2444_v39, %v2396_v26  ;;  %v487_v39 = vpack.c.bf16 %v199_v23, %v175_v20 }
 0x156   :  { %v2397_v36 = vpop.f32.mrf.mxu1 }
 0x157   :  { %v2493_v40 = vpop.f32.mrf.mxu3  ;;  %v2398_v38 = vadd.f32 %v2397_v36, %v5145_v1  ;;  %v126_v1 = vld [vmem:[%s6643_s0 + $0x350] sm:$0xff] }
 0x158   :  { %v2494_v7 = vadd.f32 %v2493_v40, %v2445_v34  ;;  %v462_v55 = vpack.c.bf16 %v150_v44, %v126_v1  ;;  %v176_v34 = vld [vmem:[%s6643_s0 + $0x4e0] sm:$0xff] }
 0x159   :  { %v2544_v12 = vpop.f32.mrf.mxu0  ;;  %v200_v40 = vld [vmem:[%s6643_s0 + $0x5a0] sm:$0xff] }
 0x15a   :  { %v5457_v27 = vadd.f32 %v2542_v30, %v2494_v7  ;;  %v485_v30 = vpack.c.bf16 %v197_v60, %v173_v15  ;;  %v488_v41 = vpack.c.bf16 %v200_v40, %v176_v34  ;;  %v4394_v60 = vld [vmem:[%s6641_s1 + $0x3c8] sm:$0xff]  ;;  %v271_v34 = vld [vmem:[%s6643_s0 + $0x7d8] sm:$0xff] }
 0x15b   :  { %2877 = vmatpush.bf16.msra.mxu3 %v4394_v60  ;;  %v295_v40 = vld [vmem:[%s6643_s0 + $0x898] sm:$0xff] }
 0x15c   :  { %v2446_v48 = vpop.f32.mrf.mxu2 }
 0x15d   :  { %v2447_v49 = vadd.f32 %v2446_v48, %v2398_v38 }
 0x15e   :  { %v2400_v11 = vpop.f32.mrf.mxu1 }
 0x15f   :  { %v2495_v51 = vpop.f32.mrf.mxu3  ;;  %v2401_v21 = vadd.f32 %v2400_v11, %v5158_v16  ;;  %v245_v11 = vld [vmem:[%s6643_s0 + $0x708] sm:$0xff] }
 0x160   :  { %v2496_v24 = vadd.f32 %v2495_v51, %v2447_v49  ;;  %v4379_v49 = vld [vmem:[%s6641_s1 + $0x350] sm:$0xff] }
 0x161   :  { %2595 = vmatmul.bf16.gmra.mxu1 %v461_v53  ;;  %2644 = vmatmul.bf16.gmra.mxu2 %v462_v55  ;;  %v2547_v2 = vpop.f32.mrf.mxu0  ;;  %v221_v53 = vld [vmem:[%s6643_s0 + $0x648] sm:$0xff] }
 0x162   :  { %v5484_v63 = vadd.f32 %v2544_v12, %v2496_v24  ;;  %v4387_v12 = vld [vmem:[%s6641_s1 + $0x390] sm:$0xff]  ;;  %2778 = vmatpush.bf16.msra.mxu1 %v4379_v49 }
 0x163   :  { %2827 = vmatpush.bf16.msra.mxu2 %v4387_v12  ;;  %v4407_v49 = vld [vmem:[%s6641_s1 + $0x430] sm:$0xff] }
 0x164   :  { %2693 = vmatmul.bf16.gmra.mxu3 %v463_v61  ;;  %v2449_v22 = vpop.f32.mrf.mxu2  ;;  %2742 = vmatmul.bf16.gmra.mxu0 %v464_v0  ;;  %v246_v61 = vld [vmem:[%s6643_s0 + $0x710] sm:$0xff] }
 0x165   :  { %v2450_v5 = vadd.f32 %v2449_v22, %v2401_v21  ;;  %v511_v22 = vpack.c.bf16 %v247_v62, %v223_v54 }
 0x166   :  { %v2402_v6 = vpop.f32.mrf.mxu1 }
 0x167   :  { %v2498_v16 = vpop.f32.mrf.mxu3  ;;  %v2403_v10 = vadd.f32 %v2402_v6, %v5186_v42  ;;  %v174_v42 = vld [vmem:[%s6643_s0 + $0x4d0] sm:$0xff] }
 0x168   :  { %v2499_v8 = vadd.f32 %v2498_v16, %v2450_v5  ;;  %v486_v31 = vpack.c.bf16 %v198_v19, %v174_v42  ;;  %v224_v5 = vld [vmem:[%s6643_s0 + $0x660] sm:$0xff] }
 0x169   :  { %v2549_v17 = vpop.f32.mrf.mxu0  ;;  %v248_v16 = vld [vmem:[%s6643_s0 + $0x720] sm:$0xff] }
 0x16a   :  { %v5496_v14 = vadd.f32 %v2547_v2, %v2499_v8  ;;  %v509_v2 = vpack.c.bf16 %v245_v11, %v221_v53  ;;  %v512_v13 = vpack.c.bf16 %v248_v16, %v224_v5  ;;  %v317_v5 = vld [vmem:[%s6643_s0 + $0x948] sm:$0xff] }
 0x16c   :  { %v2451_v25 = vpop.f32.mrf.mxu2 }
 0x16d   :  { %v2452_v26 = vadd.f32 %v2451_v25, %v2403_v10 }
 0x16e   :  { %v2405_v33 = vpop.f32.mrf.mxu1 }
 0x16f   :  { %v2500_v28 = vpop.f32.mrf.mxu3  ;;  %v2406_v7 = vadd.f32 %v2405_v33, %v5199_v56  ;;  %v293_v33 = vld [vmem:[%s6643_s0 + $0x888] sm:$0xff] }
 0x170   :  { %v2501_v36 = vadd.f32 %v2500_v28, %v2452_v26  ;;  %v4378_v26 = vld [vmem:[%s6641_s1 + $0x348] sm:$0xff] }
 0x171   :  { %2600 = vmatmul.bf16.gmra.mxu1 %v485_v30  ;;  %2649 = vmatmul.bf16.gmra.mxu2 %v486_v31  ;;  %v2552_v59 = vpop.f32.mrf.mxu0  ;;  %v269_v30 = vld [vmem:[%s6643_s0 + $0x7c8] sm:$0xff] }
 0x172   :  { %v5523_v38 = vadd.f32 %v2549_v17, %v2501_v36  ;;  %v4386_v17 = vld [vmem:[%s6641_s1 + $0x388] sm:$0xff]  ;;  %2779 = vmatpush.bf16.msra.mxu1 %v4378_v26  ;;  %v4408_v36 = vld [vmem:[%s6641_s1 + $0x438] sm:$0xff]  ;;  %v533_v12 = vpack.c.bf16 %v293_v33, %v269_v30  ;;  %v320_v26 = vld [vmem:[%s6643_s0 + $0x960] sm:$0xff] }
 0x173   :  { %2828 = vmatpush.bf16.msra.mxu2 %v4386_v17  ;;  %2920 = vmatpush.bf16.msra.mxu0 %v4408_v36  ;;  %v4404_v17 = vld [vmem:[%s6641_s1 + $0x418] sm:$0xff]  ;;  %v344_v30 = vld [vmem:[%s6643_s0 + $0xa20] sm:$0xff] }
 0x174   :  { %2698 = vmatmul.bf16.gmra.mxu3 %v487_v39  ;;  %v2454_v1 = vpop.f32.mrf.mxu2  ;;  %2747 = vmatmul.bf16.gmra.mxu0 %v488_v41  ;;  %v294_v39 = vld [vmem:[%s6643_s0 + $0x890] sm:$0xff]  ;;  %v4424_v36 = vld [vmem:[%s6641_s1 + $0x4b8] sm:$0xff] }
 0x175   :  { %v2455_v44 = vadd.f32 %v2454_v1, %v2406_v7 }
 0x176   :  { %v2407_v46 = vpop.f32.mrf.mxu1 }
 0x177   :  { %v2503_v56 = vpop.f32.mrf.mxu3  ;;  %v2408_v48 = vadd.f32 %v2407_v46, %v5226_v18  ;;  %v222_v18 = vld [vmem:[%s6643_s0 + $0x650] sm:$0xff]  ;;  %v296_v46 = vld [vmem:[%s6643_s0 + $0x8a0] sm:$0xff]  ;;  %2921 = vmatpush.bf16.msra.mxu0 %v4407_v49 }
 0x178   :  { %v2504_v47 = vadd.f32 %v2503_v56, %v2455_v44  ;;  %v510_v3 = vpack.c.bf16 %v246_v61, %v222_v18  ;;  %v535_v44 = vpack.c.bf16 %v295_v40, %v271_v34  ;;  %v272_v56 = vld [vmem:[%s6643_s0 + $0x7e0] sm:$0xff]  ;;  %v4406_v61 = vld [vmem:[%s6641_s1 + $0x428] sm:$0xff]  ;;  %v560_v34 = vpack.c.bf16 %v344_v30, %v320_v26 }
 0x179   :  { %v2554_v55 = vpop.f32.mrf.mxu0  ;;  %v4385_v18 = vld [vmem:[%s6641_s1 + $0x380] sm:$0xff]  ;;  %v57_v30 = vld [vmem:[%s6643_s0 + $0x128] sm:$0xff] }
 0x17a   :  { %v5535_v51 = vadd.f32 %v2552_v59, %v2504_v47  ;;  %2829 = vmatpush.bf16.msra.mxu2 %v4385_v18  ;;  %v367_v18 = vld [vmem:[%s6643_s0 + $0xad8] sm:$0xff] }
 0x17b   :  { %2922 = vmatpush.bf16.msra.mxu0 %v4406_v61 }
 0x17c   :  { %v2456_v24 = vpop.f32.mrf.mxu2 }
 0x17d   :  { %v2457_v21 = vadd.f32 %v2456_v24, %v2408_v48 }
 0x17e   :  { %v2410_v4 = vpop.f32.mrf.mxu1  ;;  %3018 = vmatpush.bf16.msrb.mxu2 %v4424_v36 }
 0x17f   :  { %v2505_v0 = vpop.f32.mrf.mxu3  ;;  %v2411_v8 = vadd.f32 %v2410_v4, %v5238_v32  ;;  %v4405_v4 = vld [vmem:[%s6641_s1 + $0x420] sm:$0xff] }
 0x180   :  { %v2506_v6 = vadd.f32 %v2505_v0, %v2457_v21  ;;  %2923 = vmatpush.bf16.msra.mxu0 %v4405_v4  ;;  %v392_v4 = vld [vmem:[%s6643_s0 + $0xba0] sm:$0xff] }
 0x181   :  { %2605 = vmatmul.bf16.gmra.mxu1 %v509_v2  ;;  %2654 = vmatmul.bf16.gmra.mxu2 %v510_v3  ;;  %v2557_v15 = vpop.f32.mrf.mxu0  ;;  %v4377_v3 = vld [vmem:[%s6641_s1 + $0x340] sm:$0xff] }
 0x182   :  { %v5562_v10 = vadd.f32 %v2554_v55, %v2506_v6  ;;  %v536_v55 = vpack.c.bf16 %v296_v46, %v272_v56  ;;  %2780 = vmatpush.bf16.msra.mxu1 %v4377_v3  ;;  %v318_v6 = vld [vmem:[%s6643_s0 + $0x950] sm:$0xff]  ;;  %v4416_v56 = vld [vmem:[%s6641_s1 + $0x478] sm:$0xff]  ;;  %v4401_v46 = vld [vmem:[%s6641_s1 + $0x400] sm:$0xff] }
 0x183   :  { %v368_v3 = vld [vmem:[%s6643_s0 + $0xae0] sm:$0xff] }
 0x184   :  { %2703 = vmatmul.bf16.gmra.mxu3 %v511_v22  ;;  %v2459_v42 = vpop.f32.mrf.mxu2  ;;  %2752 = vmatmul.bf16.gmra.mxu0 %v512_v13  ;;  %v319_v13 = vld [vmem:[%s6643_s0 + $0x958] sm:$0xff] }
 0x185   :  { %v2460_v19 = vadd.f32 %v2459_v42, %v2411_v8  ;;  %v342_v8 = vld [vmem:[%s6643_s0 + $0xa10] sm:$0xff]  ;;  %2924 = vmatpush.bf16.msra.mxu0 %v4404_v17 }
 0x186   :  { %v2412_v20 = vpop.f32.mrf.mxu1  ;;  %2969 = vmatpush.bf16.msrb.mxu1 %v4416_v56 }
 0x187   :  { %v2508_v32 = vpop.f32.mrf.mxu3  ;;  %v2413_v25 = vadd.f32 %v2412_v20, %v5271_v58  ;;  %v270_v58 = vld [vmem:[%s6643_s0 + $0x7d0] sm:$0xff]  ;;  %v558_v20 = vpack.c.bf16 %v342_v8, %v318_v6  ;;  %v584_v6 = vpack.c.bf16 %v392_v4, %v368_v3  ;;  %v83_v3 = vld [vmem:[%s6643_s0 + $0x1f8] sm:$0xff] }
 0x188   :  { %v2509_v23 = vadd.f32 %v2508_v32, %v2460_v19  ;;  %v534_v43 = vpack.c.bf16 %v294_v39, %v270_v58  ;;  %v4403_v58 = vld [vmem:[%s6641_s1 + $0x410] sm:$0xff]  ;;  %v107_v4 = vld [vmem:[%s6643_s0 + $0x2b8] sm:$0xff] }
 0x189   :  { %v2559_v31 = vpop.f32.mrf.mxu0  ;;  %2925 = vmatpush.bf16.msra.mxu0 %v4403_v58  ;;  %v59_v58 = vld [vmem:[%s6643_s0 + $0x138] sm:$0xff] }
 0x18a   :  { %v5574_v28 = vadd.f32 %v2557_v15, %v2509_v23  ;;  %v343_v15 = vld [vmem:[%s6643_s0 + $0xa18] sm:$0xff] }
 0x18c   :  { %v2461_v7 = vpop.f32.mrf.mxu2 }
 0x18d   :  { %v2462_v41 = vadd.f32 %v2461_v7, %v2413_v25  ;;  %v559_v25 = vpack.c.bf16 %v343_v15, %v319_v13  ;;  %v4402_v7 = vld [vmem:[%s6641_s1 + $0x408] sm:$0xff]  ;;  %v4423_v13 = vld [vmem:[%s6641_s1 + $0x4b0] sm:$0xff] }
 0x18e   :  { %v2415_v1 = vpop.f32.mrf.mxu1  ;;  %2926 = vmatpush.bf16.msra.mxu0 %v4402_v7  ;;  %v4431_v15 = vld [vmem:[%s6641_s1 + $0x4f0] sm:$0xff]  ;;  %3019 = vmatpush.bf16.msrb.mxu2 %v4423_v13 }
 0x18f   :  { %v2510_v59 = vpop.f32.mrf.mxu3  ;;  %v2416_v48 = vadd.f32 %v2415_v1, %v5289_v9  ;;  %v4393_v9 = vld [vmem:[%s6641_s1 + $0x3c0] sm:$0xff] }
 0x190   :  { %v2511_v47 = vadd.f32 %v2510_v59, %v2462_v41  ;;  %2878 = vmatpush.bf16.msra.mxu3 %v4393_v9  ;;  %v391_v9 = vld [vmem:[%s6643_s0 + $0xb98] sm:$0xff] }
 0x191   :  { %2610 = vmatmul.bf16.gmra.mxu1 %v533_v12  ;;  %2659 = vmatmul.bf16.gmra.mxu2 %v534_v43  ;;  %v2562_v11 = vpop.f32.mrf.mxu0 }
 0x192   :  { %v5607_v53 = vadd.f32 %v2559_v31, %v2511_v47  ;;  %2927 = vmatpush.bf16.msra.mxu0 %v4401_v46 }
 0x194   :  { %2708 = vmatmul.bf16.gmra.mxu3 %v535_v44  ;;  %v2464_v54 = vpop.f32.mrf.mxu2  ;;  %2757 = vmatmul.bf16.gmra.mxu0 %v536_v55  ;;  %v366_v55 = vld [vmem:[%s6643_s0 + $0xad0] sm:$0xff] }
 0x195   :  { %v2465_v62 = vadd.f32 %v2464_v54, %v2416_v48  ;;  %v365_v48 = vld [vmem:[%s6643_s0 + $0xac8] sm:$0xff] }
 0x196   :  { %v2417_v21 = vpop.f32.mrf.mxu1 }
 0x197   :  { %v2513_v24 = vpop.f32.mrf.mxu3  ;;  %v2418_v2 = vadd.f32 %v2417_v21, %v5322_v37  ;;  %v341_v37 = vld [vmem:[%s6643_s0 + $0xa08] sm:$0xff] }
 0x198   :  { %v2514_v0 = vadd.f32 %v2513_v24, %v2465_v62  ;;  %v557_v32 = vpack.c.bf16 %v341_v37, %v317_v5 }
 0x199   :  { %v2564_v16 = vpop.f32.mrf.mxu0 }
 0x19a   :  { %v5625_v22 = vadd.f32 %v2562_v11, %v2514_v0  ;;  %v390_v11 = vld [vmem:[%s6643_s0 + $0xb90] sm:$0xff] }
 0x19b   :  { %v582_v21 = vpack.c.bf16 %v390_v11, %v366_v55 }
 0x19c   :  { %v2466_v60 = vpop.f32.mrf.mxu2 }
 0x19d   :  { %v2467_v42 = vadd.f32 %v2466_v60, %v2418_v2  ;;  %v583_v2 = vpack.c.bf16 %v391_v9, %v367_v18 }
 0x19e   :  { %v2420_v23 = vpop.f32.mrf.mxu1 }
 0x19f   :  { %v2515_v19 = vpop.f32.mrf.mxu3  ;;  %v2421_v33 = vadd.f32 %v2420_v23, %v5340_v52  ;;  %v4432_v52 = vld [vmem:[%s6641_s1 + $0x4f8] sm:$0xff] }
 0x1a0   :  { %v2516_v31 = vadd.f32 %v2515_v19, %v2467_v42  ;;  %3067 = vmatpush.bf16.msrb.mxu3 %v4432_v52 }
 0x1a1   :  { %2615 = vmatmul.bf16.gmra.mxu1 %v557_v32  ;;  %2664 = vmatmul.bf16.gmra.mxu2 %v558_v20  ;;  %v2567_v40 = vpop.f32.mrf.mxu0  ;;  %v4415_v20 = vld [vmem:[%s6641_s1 + $0x470] sm:$0xff] }
 0x1a2   :  { %v5658_v39 = vadd.f32 %v2564_v16, %v2516_v31  ;;  %2970 = vmatpush.bf16.msrb.mxu1 %v4415_v20  ;;  %v58_v31 = vld [vmem:[%s6643_s0 + $0x130] sm:$0xff] }
 0x1a4   :  { %2713 = vmatmul.bf16.gmra.mxu3 %v559_v25  ;;  %v2469_v41 = vpop.f32.mrf.mxu2  ;;  %2762 = vmatmul.bf16.gmra.mxu0 %v560_v34  ;;  %v33_v25 = vld [vmem:[%s6643_s0 + $0x68] sm:$0xff] }
 0x1a5   :  { %v2470_v59 = vadd.f32 %v2469_v41, %v2421_v33  ;;  %3068 = vmatpush.bf16.msrb.mxu3 %v4431_v15  ;;  %v35_v33 = vld [vmem:[%s6643_s0 + $0x78] sm:$0xff]  ;;  %v417_v52 = vpack.c.bf16 %v57_v30, %v33_v25  ;;  %v4429_v30 = vld [vmem:[%s6641_s1 + $0x4e0] sm:$0xff] }
 0x1a6   :  { %v2422_v43 = vpop.f32.mrf.mxu1 }
 0x1a7   :  { %v2518_v12 = vpop.f32.mrf.mxu3  ;;  %v2423_v44 = vadd.f32 %v2422_v43, %v5367_v35  ;;  %v389_v35 = vld [vmem:[%s6643_s0 + $0xb88] sm:$0xff]  ;;  %v60_v43 = vld [vmem:[%s6643_s0 + $0x140] sm:$0xff] }
 0x1a8   :  { %v2519_v1 = vadd.f32 %v2518_v12, %v2470_v59  ;;  %v581_v24 = vpack.c.bf16 %v389_v35, %v365_v48  ;;  %v419_v59 = vpack.c.bf16 %v59_v58, %v35_v33  ;;  %v36_v12 = vld [vmem:[%s6643_s0 + $0x80] sm:$0xff]  ;;  %v4430_v35 = vld [vmem:[%s6641_s1 + $0x4e8] sm:$0xff] }
 0x1a9   :  { %v2569_v49 = vpop.f32.mrf.mxu0  ;;  %v420_v46 = vpack.c.bf16 %v60_v43, %v36_v12  ;;  %3069 = vmatpush.bf16.msrb.mxu3 %v4430_v35  ;;  %v131_v12 = vld [vmem:[%s6643_s0 + $0x378] sm:$0xff] }
 0x1aa   :  { %v5676_v47 = vadd.f32 %v2567_v40, %v2519_v1  ;;  %v155_v43 = vld [vmem:[%s6643_s0 + $0x438] sm:$0xff] }
 0x1ac   :  { %v2471_v61 = vpop.f32.mrf.mxu2 }
 0x1ad   :  { %v2472_v54 = vadd.f32 %v2471_v61, %v2423_v44  ;;  %3070 = vmatpush.bf16.msrb.mxu3 %v4429_v30 }
 0x1ae   :  { %v2425_v0 = vpop.f32.mrf.mxu1 }
 0x1af   :  { %v2520_v62 = vpop.f32.mrf.mxu3  ;;  %v2426_v16 = vadd.f32 %v2425_v0, %v5379_v29  ;;  %v105_v0 = vld [vmem:[%s6643_s0 + $0x2a8] sm:$0xff] }
 0x1b0   :  { %v2521_v5 = vadd.f32 %v2520_v62, %v2472_v54  ;;  %v4414_v54 = vld [vmem:[%s6641_s1 + $0x468] sm:$0xff] }
 0x1b1   :  { %2620 = vmatmul.bf16.gmra.mxu1 %v581_v24  ;;  %2669 = vmatmul.bf16.gmra.mxu2 %v582_v21  ;;  %v2572_v8 = vpop.f32.mrf.mxu0  ;;  %v81_v24 = vld [vmem:[%s6643_s0 + $0x1e8] sm:$0xff] }
 0x1b2   :  { %v5703_v37 = vadd.f32 %v2569_v49, %v2521_v5  ;;  %v4422_v49 = vld [vmem:[%s6641_s1 + $0x4a8] sm:$0xff]  ;;  %2971 = vmatpush.bf16.msrb.mxu1 %v4414_v54 }
 0x1b3   :  { %3020 = vmatpush.bf16.msrb.mxu2 %v4422_v49 }
 0x1b4   :  { %2718 = vmatmul.bf16.gmra.mxu3 %v583_v2  ;;  %v2474_v17 = vpop.f32.mrf.mxu2  ;;  %2767 = vmatmul.bf16.gmra.mxu0 %v584_v6  ;;  %v106_v2 = vld [vmem:[%s6643_s0 + $0x2b0] sm:$0xff] }
 0x1b5   :  { %v2475_v60 = vadd.f32 %v2474_v17, %v2426_v16  ;;  %v443_v17 = vpack.c.bf16 %v107_v4, %v83_v3 }
 0x1b6   :  { %v2427_v42 = vpop.f32.mrf.mxu1 }
 0x1b7   :  { %v2523_v29 = vpop.f32.mrf.mxu3  ;;  %v2428_v32 = vadd.f32 %v2427_v42, %v5406_v50  ;;  %v34_v50 = vld [vmem:[%s6643_s0 + $0x70] sm:$0xff] }
 0x1b8   :  { %v2524_v19 = vadd.f32 %v2523_v29, %v2475_v60  ;;  %v418_v7 = vpack.c.bf16 %v58_v31, %v34_v50  ;;  %v84_v60 = vld [vmem:[%s6643_s0 + $0x200] sm:$0xff] }
 0x1b9   :  { %v2574_v26 = vpop.f32.mrf.mxu0  ;;  %v108_v29 = vld [vmem:[%s6643_s0 + $0x2c0] sm:$0xff] }
 0x1ba   :  { %v5715_v23 = vadd.f32 %v2572_v8, %v2524_v19  ;;  %v441_v8 = vpack.c.bf16 %v105_v0, %v81_v24  ;;  %v444_v20 = vpack.c.bf16 %v108_v29, %v84_v60  ;;  %v4428_v0 = vld [vmem:[%s6641_s1 + $0x4d8] sm:$0xff] }
 0x1bb   :  { %3071 = vmatpush.bf16.msrb.mxu3 %v4428_v0  ;;  %v179_v60 = vld [vmem:[%s6643_s0 + $0x4f8] sm:$0xff] }
 0x1bc   :  { %v2476_v34 = vpop.f32.mrf.mxu2  ;;  %v203_v29 = vld [vmem:[%s6643_s0 + $0x5b8] sm:$0xff] }
 0x1bd   :  { %v2477_v40 = vadd.f32 %v2476_v34, %v2428_v32 }
 0x1be   :  { %v2586_v41 = vpop.f32.mrf.mxu1 }
 0x1bf   :  { %v2525_v36 = vpop.f32.mrf.mxu3  ;;  %v2587_v44 = vadd.f32 %v2586_v41, %v5418_v45  ;;  %v153_v41 = vld [vmem:[%s6643_s0 + $0x428] sm:$0xff] }
 0x1c0   :  { %v2526_v1 = vadd.f32 %v2525_v36, %v2477_v40  ;;  %v4413_v40 = vld [vmem:[%s6641_s1 + $0x460] sm:$0xff] }
 0x1c1   :  { %2781 = vmatmul.bf16.vlgmr.msra.gmra.mxu1 %v417_v52  ;;  %2830 = vmatmul.bf16.vlgmr.msra.gmra.mxu2 %v418_v7  ;;  %v2733_v48 = vpop.f32.mrf.mxu0  ;;  %v129_v52 = vld [vmem:[%s6643_s0 + $0x368] sm:$0xff] }
 0x1c2   :  { %v5742_v56 = vadd.f32 %v2574_v26, %v2526_v1  ;;  %v4421_v26 = vld [vmem:[%s6641_s1 + $0x4a0] sm:$0xff]  ;;  %2972 = vmatpush.bf16.msrb.mxu1 %v4413_v40 }
 0x1c3   :  { %3021 = vmatpush.bf16.msrb.mxu2 %v4421_v26 }
 0x1c4   :  { %2879 = vmatmul.bf16.vlgmr.msra.gmra.mxu3 %v419_v59  ;;  %v2635_v55 = vpop.f32.mrf.mxu2  ;;  %2928 = vmatmul.bf16.vlgmr.msra.gmra.mxu0 %v420_v46  ;;  %v154_v59 = vld [vmem:[%s6643_s0 + $0x430] sm:$0xff] }
 0x1c5   :  { %v2636_v11 = vadd.f32 %v2635_v55, %v2587_v44  ;;  %v467_v55 = vpack.c.bf16 %v155_v43, %v131_v12 }
 0x1c6   :  { %v2588_v18 = vpop.f32.mrf.mxu1 }
 0x1c7   :  { %v2684_v45 = vpop.f32.mrf.mxu3  ;;  %v2589_v61 = vadd.f32 %v2588_v18, %v5445_v57  ;;  %v82_v57 = vld [vmem:[%s6643_s0 + $0x1f0] sm:$0xff] }
 0x1c8   :  { %v2685_v9 = vadd.f32 %v2684_v45, %v2636_v11  ;;  %v442_v13 = vpack.c.bf16 %v106_v2, %v82_v57  ;;  %v132_v11 = vld [vmem:[%s6643_s0 + $0x380] sm:$0xff] }
 0x1c9   :  { %v2735_v21 = vpop.f32.mrf.mxu0  ;;  %v156_v45 = vld [vmem:[%s6643_s0 + $0x440] sm:$0xff] }
 0x1ca   :  { %v5754_v62 = vadd.f32 %v2733_v48, %v2685_v9  ;;  %v465_v48 = vpack.c.bf16 %v153_v41, %v129_v52  ;;  %v468_v54 = vpack.c.bf16 %v156_v45, %v132_v11  ;;  %v4427_v41 = vld [vmem:[%s6641_s1 + $0x4d0] sm:$0xff]  ;;  %v227_v11 = vld [vmem:[%s6643_s0 + $0x678] sm:$0xff] }
 0x1cb   :  { %3072 = vmatpush.bf16.msrb.mxu3 %v4427_v41  ;;  %v251_v45 = vld [vmem:[%s6643_s0 + $0x738] sm:$0xff] }
 0x1cc   :  { %v2637_v5 = vpop.f32.mrf.mxu2 }
 0x1cd   :  { %v2638_v16 = vadd.f32 %v2637_v5, %v2589_v61 }
 0x1ce   :  { %v2591_v15 = vpop.f32.mrf.mxu1 }
 0x1cf   :  { %v2686_v6 = vpop.f32.mrf.mxu3  ;;  %v2592_v19 = vadd.f32 %v2591_v15, %v5457_v27  ;;  %v201_v15 = vld [vmem:[%s6643_s0 + $0x5a8] sm:$0xff] }
 0x1d0   :  { %v2687_v42 = vadd.f32 %v2686_v6, %v2638_v16  ;;  %v4412_v16 = vld [vmem:[%s6641_s1 + $0x458] sm:$0xff] }
 0x1d1   :  { %2786 = vmatmul.bf16.gmra.mxu1 %v441_v8  ;;  %2835 = vmatmul.bf16.gmra.mxu2 %v442_v13  ;;  %v2738_v25 = vpop.f32.mrf.mxu0  ;;  %v177_v8 = vld [vmem:[%s6643_s0 + $0x4e8] sm:$0xff] }
 0x1d2   :  { %v5781_v32 = vadd.f32 %v2735_v21, %v2687_v42  ;;  %v4420_v21 = vld [vmem:[%s6641_s1 + $0x498] sm:$0xff]  ;;  %2973 = vmatpush.bf16.msrb.mxu1 %v4412_v16 }
 0x1d3   :  { %3022 = vmatpush.bf16.msrb.mxu2 %v4420_v21 }
 0x1d4   :  { %2884 = vmatmul.bf16.gmra.mxu3 %v443_v17  ;;  %v2640_v50 = vpop.f32.mrf.mxu2  ;;  %2933 = vmatmul.bf16.gmra.mxu0 %v444_v20  ;;  %v202_v17 = vld [vmem:[%s6643_s0 + $0x5b0] sm:$0xff] }
 0x1d5   :  { %v2641_v31 = vadd.f32 %v2640_v50, %v2592_v19  ;;  %v491_v50 = vpack.c.bf16 %v203_v29, %v179_v60 }
 0x1d6   :  { %v2593_v33 = vpop.f32.mrf.mxu1 }
 0x1d7   :  { %v2689_v27 = vpop.f32.mrf.mxu3  ;;  %v2594_v34 = vadd.f32 %v2593_v33, %v5484_v63  ;;  %v130_v63 = vld [vmem:[%s6643_s0 + $0x370] sm:$0xff] }
 0x1d8   :  { %v2690_v58 = vadd.f32 %v2689_v27, %v2641_v31  ;;  %v466_v49 = vpack.c.bf16 %v154_v59, %v130_v63  ;;  %v180_v31 = vld [vmem:[%s6643_s0 + $0x500] sm:$0xff] }
 0x1d9   :  { %v2740_v7 = vpop.f32.mrf.mxu0  ;;  %v204_v27 = vld [vmem:[%s6643_s0 + $0x5c0] sm:$0xff] }
 0x1da   :  { %v5793_v36 = vadd.f32 %v2738_v25, %v2690_v58  ;;  %v489_v25 = vpack.c.bf16 %v201_v15, %v177_v8  ;;  %v492_v40 = vpack.c.bf16 %v204_v27, %v180_v31  ;;  %v4426_v15 = vld [vmem:[%s6641_s1 + $0x4c8] sm:$0xff]  ;;  %v275_v31 = vld [vmem:[%s6643_s0 + $0x7f8] sm:$0xff] }
 0x1db   :  { %3073 = vmatpush.bf16.msrb.mxu3 %v4426_v15  ;;  %v299_v27 = vld [vmem:[%s6643_s0 + $0x8b8] sm:$0xff] }
 0x1dc   :  { %v2642_v1 = vpop.f32.mrf.mxu2 }
 0x1dd   :  { %v2643_v44 = vadd.f32 %v2642_v1, %v2594_v34 }
 0x1de   :  { %v2596_v35 = vpop.f32.mrf.mxu1 }
 0x1df   :  { %v2691_v46 = vpop.f32.mrf.mxu3  ;;  %v2597_v9 = vadd.f32 %v2596_v35, %v5496_v14  ;;  %v249_v35 = vld [vmem:[%s6643_s0 + $0x728] sm:$0xff] }
 0x1e0   :  { %v2692_v18 = vadd.f32 %v2691_v46, %v2643_v44  ;;  %v4411_v44 = vld [vmem:[%s6641_s1 + $0x450] sm:$0xff] }
 0x1e1   :  { %2791 = vmatmul.bf16.gmra.mxu1 %v465_v48  ;;  %2840 = vmatmul.bf16.gmra.mxu2 %v466_v49  ;;  %v2743_v24 = vpop.f32.mrf.mxu0  ;;  %v225_v48 = vld [vmem:[%s6643_s0 + $0x668] sm:$0xff] }
 0x1e2   :  { %v5820_v61 = vadd.f32 %v2740_v7, %v2692_v18  ;;  %v4419_v7 = vld [vmem:[%s6641_s1 + $0x490] sm:$0xff]  ;;  %2974 = vmatpush.bf16.msrb.mxu1 %v4411_v44 }
 0x1e3   :  { %3023 = vmatpush.bf16.msrb.mxu2 %v4419_v7  ;;  %v4439_v44 = vld [vmem:[%s6641_s1 + $0x530] sm:$0xff] }
 0x1e4   :  { %2889 = vmatmul.bf16.gmra.mxu3 %v467_v55  ;;  %v2645_v57 = vpop.f32.mrf.mxu2  ;;  %2938 = vmatmul.bf16.gmra.mxu0 %v468_v54  ;;  %v250_v55 = vld [vmem:[%s6643_s0 + $0x730] sm:$0xff] }
 0x1e5   :  { %v2646_v2 = vadd.f32 %v2645_v57, %v2597_v9  ;;  %v515_v57 = vpack.c.bf16 %v251_v45, %v227_v11 }
 0x1e6   :  { %v2598_v3 = vpop.f32.mrf.mxu1 }
 0x1e7   :  { %v2694_v14 = vpop.f32.mrf.mxu3  ;;  %v2599_v5 = vadd.f32 %v2598_v3, %v5523_v38  ;;  %v178_v38 = vld [vmem:[%s6643_s0 + $0x4f0] sm:$0xff] }
 0x1e8   :  { %v2695_v4 = vadd.f32 %v2694_v14, %v2646_v2  ;;  %v490_v26 = vpack.c.bf16 %v202_v17, %v178_v38  ;;  %v228_v2 = vld [vmem:[%s6643_s0 + $0x680] sm:$0xff] }
 0x1e9   :  { %v2745_v13 = vpop.f32.mrf.mxu0  ;;  %v252_v14 = vld [vmem:[%s6643_s0 + $0x740] sm:$0xff] }
 0x1ea   :  { %v5832_v6 = vadd.f32 %v2743_v24, %v2695_v4  ;;  %v513_v24 = vpack.c.bf16 %v249_v35, %v225_v48  ;;  %v516_v16 = vpack.c.bf16 %v252_v14, %v228_v2  ;;  %v321_v2 = vld [vmem:[%s6643_s0 + $0x968] sm:$0xff] }
 0x1ec   :  { %v2647_v42 = vpop.f32.mrf.mxu2 }
 0x1ed   :  { %v2648_v19 = vadd.f32 %v2647_v42, %v2599_v5 }
 0x1ee   :  { %v2601_v30 = vpop.f32.mrf.mxu1 }
 0x1ef   :  { %v2696_v20 = vpop.f32.mrf.mxu3  ;;  %v2602_v58 = vadd.f32 %v2601_v30, %v5535_v51  ;;  %v297_v30 = vld [vmem:[%s6643_s0 + $0x8a8] sm:$0xff] }
 0x1f0   :  { %v2697_v33 = vadd.f32 %v2696_v20, %v2648_v19  ;;  %v4410_v19 = vld [vmem:[%s6641_s1 + $0x448] sm:$0xff] }
 0x1f1   :  { %2796 = vmatmul.bf16.gmra.mxu1 %v489_v25  ;;  %2845 = vmatmul.bf16.gmra.mxu2 %v490_v26  ;;  %v2748_v52 = vpop.f32.mrf.mxu0  ;;  %v273_v25 = vld [vmem:[%s6643_s0 + $0x7e8] sm:$0xff] }
 0x1f2   :  { %v5859_v34 = vadd.f32 %v2745_v13, %v2697_v33  ;;  %v4418_v13 = vld [vmem:[%s6641_s1 + $0x488] sm:$0xff]  ;;  %2975 = vmatpush.bf16.msrb.mxu1 %v4410_v19  ;;  %v4440_v33 = vld [vmem:[%s6641_s1 + $0x538] sm:$0xff]  ;;  %v537_v7 = vpack.c.bf16 %v297_v30, %v273_v25  ;;  %v324_v19 = vld [vmem:[%s6643_s0 + $0x980] sm:$0xff] }
 0x1f3   :  { %3024 = vmatpush.bf16.msrb.mxu2 %v4418_v13  ;;  %3116 = vmatpush.bf16.msrb.mxu0 %v4440_v33  ;;  %v4436_v13 = vld [vmem:[%s6641_s1 + $0x518] sm:$0xff]  ;;  %v348_v25 = vld [vmem:[%s6643_s0 + $0xa40] sm:$0xff] }
 0x1f4   :  { %2894 = vmatmul.bf16.gmra.mxu3 %v491_v50  ;;  %v2650_v63 = vpop.f32.mrf.mxu2  ;;  %2943 = vmatmul.bf16.gmra.mxu0 %v492_v40  ;;  %v298_v50 = vld [vmem:[%s6643_s0 + $0x8b0] sm:$0xff]  ;;  %v4456_v33 = vld [vmem:[%s6641_s1 + $0x5b8] sm:$0xff] }
 0x1f5   :  { %v2651_v59 = vadd.f32 %v2650_v63, %v2602_v58 }
 0x1f6   :  { %v2603_v12 = vpop.f32.mrf.mxu1 }
 0x1f7   :  { %v2699_v51 = vpop.f32.mrf.mxu3  ;;  %v2604_v1 = vadd.f32 %v2603_v12, %v5562_v10  ;;  %v226_v10 = vld [vmem:[%s6643_s0 + $0x670] sm:$0xff]  ;;  %v300_v12 = vld [vmem:[%s6643_s0 + $0x8c0] sm:$0xff]  ;;  %3117 = vmatpush.bf16.msrb.mxu0 %v4439_v44 }
 0x1f8   :  { %v2700_v43 = vadd.f32 %v2699_v51, %v2651_v59  ;;  %v514_v21 = vpack.c.bf16 %v250_v55, %v226_v10  ;;  %v539_v59 = vpack.c.bf16 %v299_v27, %v275_v31  ;;  %v276_v51 = vld [vmem:[%s6643_s0 + $0x800] sm:$0xff]  ;;  %v4438_v55 = vld [vmem:[%s6641_s1 + $0x528] sm:$0xff]  ;;  %v564_v31 = vpack.c.bf16 %v348_v25, %v324_v19 }
 0x1f9   :  { %v2750_v49 = vpop.f32.mrf.mxu0  ;;  %v4417_v10 = vld [vmem:[%s6641_s1 + $0x480] sm:$0xff]  ;;  %v61_v25 = vld [vmem:[%s6643_s0 + $0x148] sm:$0xff] }
 0x1fa   :  { %v5871_v46 = vadd.f32 %v2748_v52, %v2700_v43  ;;  %3025 = vmatpush.bf16.msrb.mxu2 %v4417_v10  ;;  %v371_v10 = vld [vmem:[%s6643_s0 + $0xaf8] sm:$0xff] }
 0x1fb   :  { %3118 = vmatpush.bf16.msrb.mxu0 %v4438_v55 }
 0x1fc   :  { %v2652_v18 = vpop.f32.mrf.mxu2 }
 0x1fd   :  { %v2653_v9 = vadd.f32 %v2652_v18, %v2604_v1 }
 0x1fe   :  { %v2606_v0 = vpop.f32.mrf.mxu1  ;;  %3214 = vmatpush.bf16.msra.mxu2 %v4456_v33 }
 0x1ff   :  { %v2701_v54 = vpop.f32.mrf.mxu3  ;;  %v2607_v4 = vadd.f32 %v2606_v0, %v5574_v28  ;;  %v4437_v0 = vld [vmem:[%s6641_s1 + $0x520] sm:$0xff] }
 0x200   :  { %v2702_v3 = vadd.f32 %v2701_v54, %v2653_v9  ;;  %3119 = vmatpush.bf16.msrb.mxu0 %v4437_v0  ;;  %v396_v0 = vld [vmem:[%s6643_s0 + $0xbc0] sm:$0xff] }
 0x201   :  { %2801 = vmatmul.bf16.gmra.mxu1 %v513_v24  ;;  %2850 = vmatmul.bf16.gmra.mxu2 %v514_v21  ;;  %v2753_v8 = vpop.f32.mrf.mxu0  ;;  %v4409_v21 = vld [vmem:[%s6641_s1 + $0x440] sm:$0xff] }
 0x202   :  { %v5898_v5 = vadd.f32 %v2750_v49, %v2702_v3  ;;  %v540_v49 = vpack.c.bf16 %v300_v12, %v276_v51  ;;  %2976 = vmatpush.bf16.msrb.mxu1 %v4409_v21  ;;  %v322_v3 = vld [vmem:[%s6643_s0 + $0x970] sm:$0xff]  ;;  %v4448_v51 = vld [vmem:[%s6641_s1 + $0x578] sm:$0xff]  ;;  %v4433_v12 = vld [vmem:[%s6641_s1 + $0x500] sm:$0xff] }
 0x203   :  { %v372_v21 = vld [vmem:[%s6643_s0 + $0xb00] sm:$0xff] }
 0x204   :  { %2899 = vmatmul.bf16.gmra.mxu3 %v515_v57  ;;  %v2655_v38 = vpop.f32.mrf.mxu2  ;;  %2948 = vmatmul.bf16.gmra.mxu0 %v516_v16  ;;  %v323_v16 = vld [vmem:[%s6643_s0 + $0x978] sm:$0xff] }
 0x205   :  { %v2656_v17 = vadd.f32 %v2655_v38, %v2607_v4  ;;  %v346_v4 = vld [vmem:[%s6643_s0 + $0xa30] sm:$0xff]  ;;  %3120 = vmatpush.bf16.msrb.mxu0 %v4436_v13 }
 0x206   :  { %v2608_v60 = vpop.f32.mrf.mxu1  ;;  %3165 = vmatpush.bf16.msra.mxu1 %v4448_v51 }
 0x207   :  { %v2704_v28 = vpop.f32.mrf.mxu3  ;;  %v2609_v42 = vadd.f32 %v2608_v60, %v5607_v53  ;;  %v274_v53 = vld [vmem:[%s6643_s0 + $0x7f0] sm:$0xff]  ;;  %v562_v60 = vpack.c.bf16 %v346_v4, %v322_v3  ;;  %v588_v3 = vpack.c.bf16 %v396_v0, %v372_v21  ;;  %v87_v21 = vld [vmem:[%s6643_s0 + $0x218] sm:$0xff] }
 0x208   :  { %v2705_v29 = vadd.f32 %v2704_v28, %v2656_v17  ;;  %v538_v41 = vpack.c.bf16 %v298_v50, %v274_v53  ;;  %v4435_v53 = vld [vmem:[%s6641_s1 + $0x510] sm:$0xff]  ;;  %v111_v0 = vld [vmem:[%s6643_s0 + $0x2d8] sm:$0xff] }
 0x209   :  { %v2755_v26 = vpop.f32.mrf.mxu0  ;;  %3121 = vmatpush.bf16.msrb.mxu0 %v4435_v53  ;;  %v63_v53 = vld [vmem:[%s6643_s0 + $0x158] sm:$0xff] }
 0x20a   :  { %v5910_v20 = vadd.f32 %v2753_v8, %v2705_v29  ;;  %v347_v8 = vld [vmem:[%s6643_s0 + $0xa38] sm:$0xff] }
 0x20c   :  { %v2657_v58 = vpop.f32.mrf.mxu2 }
 0x20d   :  { %v2658_v40 = vadd.f32 %v2657_v58, %v2609_v42  ;;  %v563_v42 = vpack.c.bf16 %v347_v8, %v323_v16  ;;  %v4434_v58 = vld [vmem:[%s6641_s1 + $0x508] sm:$0xff]  ;;  %v4455_v16 = vld [vmem:[%s6641_s1 + $0x5b0] sm:$0xff] }
 0x20e   :  { %v2611_v63 = vpop.f32.mrf.mxu1  ;;  %3122 = vmatpush.bf16.msrb.mxu0 %v4434_v58  ;;  %v4463_v8 = vld [vmem:[%s6641_s1 + $0x5f0] sm:$0xff]  ;;  %3215 = vmatpush.bf16.msra.mxu2 %v4455_v16 }
 0x20f   :  { %v2706_v52 = vpop.f32.mrf.mxu3  ;;  %v2612_v1 = vadd.f32 %v2611_v63, %v5625_v22  ;;  %v4425_v22 = vld [vmem:[%s6641_s1 + $0x4c0] sm:$0xff] }
 0x210   :  { %v2707_v43 = vadd.f32 %v2706_v52, %v2658_v40  ;;  %3074 = vmatpush.bf16.msrb.mxu3 %v4425_v22  ;;  %v395_v22 = vld [vmem:[%s6643_s0 + $0xbb8] sm:$0xff] }
 0x211   :  { %2806 = vmatmul.bf16.gmra.mxu1 %v537_v7  ;;  %2855 = vmatmul.bf16.gmra.mxu2 %v538_v41  ;;  %v2758_v35 = vpop.f32.mrf.mxu0 }
 0x212   :  { %v5943_v48 = vadd.f32 %v2755_v26, %v2707_v43  ;;  %3123 = vmatpush.bf16.msrb.mxu0 %v4433_v12 }
 0x214   :  { %2904 = vmatmul.bf16.gmra.mxu3 %v539_v59  ;;  %v2660_v11 = vpop.f32.mrf.mxu2  ;;  %2953 = vmatmul.bf16.gmra.mxu0 %v540_v49  ;;  %v370_v49 = vld [vmem:[%s6643_s0 + $0xaf0] sm:$0xff] }
 0x215   :  { %v2661_v45 = vadd.f32 %v2660_v11, %v2612_v1  ;;  %v369_v1 = vld [vmem:[%s6643_s0 + $0xae8] sm:$0xff] }
 0x216   :  { %v2613_v9 = vpop.f32.mrf.mxu1 }
 0x217   :  { %v2709_v18 = vpop.f32.mrf.mxu3  ;;  %v2614_v24 = vadd.f32 %v2613_v9, %v5658_v39  ;;  %v345_v39 = vld [vmem:[%s6643_s0 + $0xa28] sm:$0xff] }
 0x218   :  { %v2710_v54 = vadd.f32 %v2709_v18, %v2661_v45  ;;  %v561_v28 = vpack.c.bf16 %v345_v39, %v321_v2 }
 0x219   :  { %v2760_v14 = vpop.f32.mrf.mxu0 }
 0x21a   :  { %v5961_v57 = vadd.f32 %v2758_v35, %v2710_v54  ;;  %v394_v35 = vld [vmem:[%s6643_s0 + $0xbb0] sm:$0xff] }
 0x21b   :  { %v586_v9 = vpack.c.bf16 %v394_v35, %v370_v49 }
 0x21c   :  { %v2662_v15 = vpop.f32.mrf.mxu2 }
 0x21d   :  { %v2663_v38 = vadd.f32 %v2662_v15, %v2614_v24  ;;  %v587_v24 = vpack.c.bf16 %v395_v22, %v371_v10 }
 0x21e   :  { %v2616_v29 = vpop.f32.mrf.mxu1 }
 0x21f   :  { %v2711_v17 = vpop.f32.mrf.mxu3  ;;  %v2617_v30 = vadd.f32 %v2616_v29, %v5676_v47  ;;  %v4464_v47 = vld [vmem:[%s6641_s1 + $0x5f8] sm:$0xff] }
 0x220   :  { %v2712_v26 = vadd.f32 %v2711_v17, %v2663_v38  ;;  %3263 = vmatpush.bf16.msra.mxu3 %v4464_v47 }
 0x221   :  { %2811 = vmatmul.bf16.gmra.mxu1 %v561_v28  ;;  %2860 = vmatmul.bf16.gmra.mxu2 %v562_v60  ;;  %v2763_v27 = vpop.f32.mrf.mxu0  ;;  %v4447_v60 = vld [vmem:[%s6641_s1 + $0x570] sm:$0xff] }
 0x222   :  { %v5994_v50 = vadd.f32 %v2760_v14, %v2712_v26  ;;  %3166 = vmatpush.bf16.msra.mxu1 %v4447_v60  ;;  %v62_v26 = vld [vmem:[%s6643_s0 + $0x150] sm:$0xff] }
 0x224   :  { %2909 = vmatmul.bf16.gmra.mxu3 %v563_v42  ;;  %v2665_v40 = vpop.f32.mrf.mxu2  ;;  %2958 = vmatmul.bf16.gmra.mxu0 %v564_v31  ;;  %v37_v42 = vld [vmem:[%s6643_s0 + $0x88] sm:$0xff] }
 0x225   :  { %v2666_v52 = vadd.f32 %v2665_v40, %v2617_v30  ;;  %3264 = vmatpush.bf16.msra.mxu3 %v4463_v8  ;;  %v39_v30 = vld [vmem:[%s6643_s0 + $0x98] sm:$0xff]  ;;  %v421_v47 = vpack.c.bf16 %v61_v25, %v37_v42  ;;  %v4461_v25 = vld [vmem:[%s6641_s1 + $0x5e0] sm:$0xff] }
 0x226   :  { %v2618_v41 = vpop.f32.mrf.mxu1 }
 0x227   :  { %v2714_v7 = vpop.f32.mrf.mxu3  ;;  %v2619_v59 = vadd.f32 %v2618_v41, %v5703_v37  ;;  %v393_v37 = vld [vmem:[%s6643_s0 + $0xba8] sm:$0xff]  ;;  %v64_v41 = vld [vmem:[%s6643_s0 + $0x160] sm:$0xff] }
 0x228   :  { %v2715_v63 = vadd.f32 %v2714_v7, %v2666_v52  ;;  %v585_v18 = vpack.c.bf16 %v393_v37, %v369_v1  ;;  %v423_v52 = vpack.c.bf16 %v63_v53, %v39_v30  ;;  %v40_v7 = vld [vmem:[%s6643_s0 + $0xa0] sm:$0xff]  ;;  %v4462_v37 = vld [vmem:[%s6641_s1 + $0x5e8] sm:$0xff] }
 0x229   :  { %v2765_v44 = vpop.f32.mrf.mxu0  ;;  %v424_v12 = vpack.c.bf16 %v64_v41, %v40_v7  ;;  %3265 = vmatpush.bf16.msra.mxu3 %v4462_v37  ;;  %v135_v7 = vld [vmem:[%s6643_s0 + $0x398] sm:$0xff] }
 0x22a   :  { %v6012_v43 = vadd.f32 %v2763_v27, %v2715_v63  ;;  %v159_v41 = vld [vmem:[%s6643_s0 + $0x458] sm:$0xff] }
 0x22c   :  { %v2667_v55 = vpop.f32.mrf.mxu2 }
 0x22d   :  { %v2668_v11 = vadd.f32 %v2667_v55, %v2619_v59  ;;  %3266 = vmatpush.bf16.msra.mxu3 %v4461_v25 }
 0x22e   :  { %v2621_v54 = vpop.f32.mrf.mxu1 }
 0x22f   :  { %v2716_v45 = vpop.f32.mrf.mxu3  ;;  %v2622_v14 = vadd.f32 %v2621_v54, %v5715_v23  ;;  %v109_v54 = vld [vmem:[%s6643_s0 + $0x2c8] sm:$0xff] }
 0x230   :  { %v2717_v2 = vadd.f32 %v2716_v45, %v2668_v11  ;;  %v4446_v11 = vld [vmem:[%s6641_s1 + $0x568] sm:$0xff] }
 0x231   :  { %2816 = vmatmul.bf16.gmra.mxu1 %v585_v18  ;;  %2865 = vmatmul.bf16.gmra.mxu2 %v586_v9  ;;  %v2768_v4 = vpop.f32.mrf.mxu0  ;;  %v85_v18 = vld [vmem:[%s6643_s0 + $0x208] sm:$0xff] }
 0x232   :  { %v6039_v39 = vadd.f32 %v2765_v44, %v2717_v2  ;;  %v4454_v44 = vld [vmem:[%s6641_s1 + $0x5a8] sm:$0xff]  ;;  %3167 = vmatpush.bf16.msra.mxu1 %v4446_v11 }
 0x233   :  { %3216 = vmatpush.bf16.msra.mxu2 %v4454_v44 }
 0x234   :  { %2914 = vmatmul.bf16.gmra.mxu3 %v587_v24  ;;  %v2670_v13 = vpop.f32.mrf.mxu2  ;;  %2963 = vmatmul.bf16.gmra.mxu0 %v588_v3  ;;  %v110_v24 = vld [vmem:[%s6643_s0 + $0x2d0] sm:$0xff] }
 0x235   :  { %v2671_v15 = vadd.f32 %v2670_v13, %v2622_v14  ;;  %v447_v13 = vpack.c.bf16 %v111_v0, %v87_v21 }
 0x236   :  { %v2623_v38 = vpop.f32.mrf.mxu1 }
 0x237   :  { %v2719_v23 = vpop.f32.mrf.mxu3  ;;  %v2624_v28 = vadd.f32 %v2623_v38, %v5742_v56  ;;  %v38_v56 = vld [vmem:[%s6643_s0 + $0x90] sm:$0xff] }
 0x238   :  { %v2720_v17 = vadd.f32 %v2719_v23, %v2671_v15  ;;  %v422_v58 = vpack.c.bf16 %v62_v26, %v38_v56  ;;  %v88_v15 = vld [vmem:[%s6643_s0 + $0x220] sm:$0xff] }
 0x239   :  { %v2770_v19 = vpop.f32.mrf.mxu0  ;;  %v112_v23 = vld [vmem:[%s6643_s0 + $0x2e0] sm:$0xff] }
 0x23a   :  { %v6051_v29 = vadd.f32 %v2768_v4, %v2720_v17  ;;  %v445_v4 = vpack.c.bf16 %v109_v54, %v85_v18  ;;  %v448_v60 = vpack.c.bf16 %v112_v23, %v88_v15  ;;  %v4460_v54 = vld [vmem:[%s6641_s1 + $0x5d8] sm:$0xff] }
 0x23b   :  { %3267 = vmatpush.bf16.msra.mxu3 %v4460_v54  ;;  %v183_v15 = vld [vmem:[%s6643_s0 + $0x518] sm:$0xff] }
 0x23c   :  { %v2672_v31 = vpop.f32.mrf.mxu2  ;;  %v207_v23 = vld [vmem:[%s6643_s0 + $0x5d8] sm:$0xff] }
 0x23d   :  { %v2673_v27 = vadd.f32 %v2672_v31, %v2624_v28 }
 0x23e   :  { %v2782_v40 = vpop.f32.mrf.mxu1 }
 0x23f   :  { %v2721_v33 = vpop.f32.mrf.mxu3  ;;  %v2783_v59 = vadd.f32 %v2782_v40, %v5754_v62  ;;  %v157_v40 = vld [vmem:[%s6643_s0 + $0x448] sm:$0xff] }
 0x240   :  { %v2722_v63 = vadd.f32 %v2721_v33, %v2673_v27  ;;  %v4445_v27 = vld [vmem:[%s6641_s1 + $0x560] sm:$0xff] }
 0x241   :  { %2977 = vmatmul.bf16.vlgmr.msrb.gmra.mxu1 %v421_v47  ;;  %3026 = vmatmul.bf16.vlgmr.msrb.gmra.mxu2 %v422_v58  ;;  %v2929_v1 = vpop.f32.mrf.mxu0  ;;  %v133_v47 = vld [vmem:[%s6643_s0 + $0x388] sm:$0xff] }
 0x242   :  { %v6078_v51 = vadd.f32 %v2770_v19, %v2722_v63  ;;  %v4453_v19 = vld [vmem:[%s6641_s1 + $0x5a0] sm:$0xff]  ;;  %3168 = vmatpush.bf16.msra.mxu1 %v4445_v27 }
 0x243   :  { %3217 = vmatpush.bf16.msra.mxu2 %v4453_v19 }
 0x244   :  { %3075 = vmatmul.bf16.vlgmr.msrb.gmra.mxu3 %v423_v52  ;;  %v2831_v49 = vpop.f32.mrf.mxu2  ;;  %3124 = vmatmul.bf16.vlgmr.msrb.gmra.mxu0 %v424_v12  ;;  %v158_v52 = vld [vmem:[%s6643_s0 + $0x450] sm:$0xff] }
 0x245   :  { %v2832_v35 = vadd.f32 %v2831_v49, %v2783_v59  ;;  %v471_v49 = vpack.c.bf16 %v159_v41, %v135_v7 }
 0x246   :  { %v2784_v10 = vpop.f32.mrf.mxu1 }
 0x247   :  { %v2880_v62 = vpop.f32.mrf.mxu3  ;;  %v2785_v55 = vadd.f32 %v2784_v10, %v5781_v32  ;;  %v86_v32 = vld [vmem:[%s6643_s0 + $0x210] sm:$0xff] }
 0x248   :  { %v2881_v22 = vadd.f32 %v2880_v62, %v2832_v35  ;;  %v446_v16 = vpack.c.bf16 %v110_v24, %v86_v32  ;;  %v136_v35 = vld [vmem:[%s6643_s0 + $0x3a0] sm:$0xff] }
 0x249   :  { %v2931_v9 = vpop.f32.mrf.mxu0  ;;  %v160_v62 = vld [vmem:[%s6643_s0 + $0x460] sm:$0xff] }
 0x24a   :  { %v6090_v45 = vadd.f32 %v2929_v1, %v2881_v22  ;;  %v469_v1 = vpack.c.bf16 %v157_v40, %v133_v47  ;;  %v472_v11 = vpack.c.bf16 %v160_v62, %v136_v35  ;;  %v4459_v40 = vld [vmem:[%s6641_s1 + $0x5d0] sm:$0xff]  ;;  %v231_v35 = vld [vmem:[%s6643_s0 + $0x698] sm:$0xff] }
 0x24b   :  { %3268 = vmatpush.bf16.msra.mxu3 %v4459_v40  ;;  %v255_v62 = vld [vmem:[%s6643_s0 + $0x758] sm:$0xff] }
 0x24c   :  { %v2833_v2 = vpop.f32.mrf.mxu2 }
 0x24d   :  { %v2834_v14 = vadd.f32 %v2833_v2, %v2785_v55 }
 0x24e   :  { %v2787_v8 = vpop.f32.mrf.mxu1 }
 0x24f   :  { %v2882_v3 = vpop.f32.mrf.mxu3  ;;  %v2788_v17 = vadd.f32 %v2787_v8, %v5793_v36  ;;  %v205_v8 = vld [vmem:[%s6643_s0 + $0x5c8] sm:$0xff] }
 0x250   :  { %v2883_v38 = vadd.f32 %v2882_v3, %v2834_v14  ;;  %v4444_v14 = vld [vmem:[%s6641_s1 + $0x558] sm:$0xff] }
 0x251   :  { %2982 = vmatmul.bf16.gmra.mxu1 %v445_v4  ;;  %3031 = vmatmul.bf16.gmra.mxu2 %v446_v16  ;;  %v2934_v42 = vpop.f32.mrf.mxu0  ;;  %v181_v4 = vld [vmem:[%s6643_s0 + $0x508] sm:$0xff] }
 0x252   :  { %v6117_v28 = vadd.f32 %v2931_v9, %v2883_v38  ;;  %v4452_v9 = vld [vmem:[%s6641_s1 + $0x598] sm:$0xff]  ;;  %3169 = vmatpush.bf16.msra.mxu1 %v4444_v14 }
 0x253   :  { %3218 = vmatpush.bf16.msra.mxu2 %v4452_v9 }
 0x254   :  { %3080 = vmatmul.bf16.gmra.mxu3 %v447_v13  ;;  %v2836_v56 = vpop.f32.mrf.mxu2  ;;  %3129 = vmatmul.bf16.gmra.mxu0 %v448_v60  ;;  %v206_v13 = vld [vmem:[%s6643_s0 + $0x5d0] sm:$0xff] }
 0x255   :  { %v2837_v26 = vadd.f32 %v2836_v56, %v2788_v17  ;;  %v495_v56 = vpack.c.bf16 %v207_v23, %v183_v15 }
 0x256   :  { %v2789_v30 = vpop.f32.mrf.mxu1 }
 0x257   :  { %v2885_v36 = vpop.f32.mrf.mxu3  ;;  %v2790_v31 = vadd.f32 %v2789_v30, %v5820_v61  ;;  %v134_v61 = vld [vmem:[%s6643_s0 + $0x390] sm:$0xff] }
 0x258   :  { %v2886_v53 = vadd.f32 %v2885_v36, %v2837_v26  ;;  %v470_v44 = vpack.c.bf16 %v158_v52, %v134_v61  ;;  %v184_v26 = vld [vmem:[%s6643_s0 + $0x520] sm:$0xff] }
 0x259   :  { %v2936_v58 = vpop.f32.mrf.mxu0  ;;  %v208_v36 = vld [vmem:[%s6643_s0 + $0x5e0] sm:$0xff] }
 0x25a   :  { %v6129_v33 = vadd.f32 %v2934_v42, %v2886_v53  ;;  %v493_v42 = vpack.c.bf16 %v205_v8, %v181_v4  ;;  %v496_v27 = vpack.c.bf16 %v208_v36, %v184_v26  ;;  %v4458_v8 = vld [vmem:[%s6641_s1 + $0x5c8] sm:$0xff]  ;;  %v279_v26 = vld [vmem:[%s6643_s0 + $0x818] sm:$0xff] }
 0x25b   :  { %3269 = vmatpush.bf16.msra.mxu3 %v4458_v8  ;;  %v303_v36 = vld [vmem:[%s6643_s0 + $0x8d8] sm:$0xff] }
 0x25c   :  { %v2838_v63 = vpop.f32.mrf.mxu2 }
 0x25d   :  { %v2839_v59 = vadd.f32 %v2838_v63, %v2790_v31 }
 0x25e   :  { %v2792_v37 = vpop.f32.mrf.mxu1 }
 0x25f   :  { %v2887_v12 = vpop.f32.mrf.mxu3  ;;  %v2793_v22 = vadd.f32 %v2792_v37, %v5832_v6  ;;  %v253_v37 = vld [vmem:[%s6643_s0 + $0x748] sm:$0xff] }
 0x260   :  { %v2888_v10 = vadd.f32 %v2887_v12, %v2839_v59  ;;  %v4443_v59 = vld [vmem:[%s6641_s1 + $0x550] sm:$0xff] }
 0x261   :  { %2987 = vmatmul.bf16.gmra.mxu1 %v469_v1  ;;  %3036 = vmatmul.bf16.gmra.mxu2 %v470_v44  ;;  %v2939_v18 = vpop.f32.mrf.mxu0  ;;  %v229_v1 = vld [vmem:[%s6643_s0 + $0x688] sm:$0xff] }
 0x262   :  { %v6156_v55 = vadd.f32 %v2936_v58, %v2888_v10  ;;  %v4451_v58 = vld [vmem:[%s6641_s1 + $0x590] sm:$0xff]  ;;  %3170 = vmatpush.bf16.msra.mxu1 %v4443_v59 }
 0x263   :  { %3219 = vmatpush.bf16.msra.mxu2 %v4451_v58 }
 0x264   :  { %3085 = vmatmul.bf16.gmra.mxu3 %v471_v49  ;;  %v2841_v32 = vpop.f32.mrf.mxu2  ;;  %3134 = vmatmul.bf16.gmra.mxu0 %v472_v11  ;;  %v254_v49 = vld [vmem:[%s6643_s0 + $0x750] sm:$0xff] }
 0x265   :  { %v2842_v24 = vadd.f32 %v2841_v32, %v2793_v22  ;;  %v519_v32 = vpack.c.bf16 %v255_v62, %v231_v35 }
 0x266   :  { %v2794_v21 = vpop.f32.mrf.mxu1 }
 0x267   :  { %v2890_v6 = vpop.f32.mrf.mxu3  ;;  %v2795_v2 = vadd.f32 %v2794_v21, %v5859_v34  ;;  %v182_v34 = vld [vmem:[%s6643_s0 + $0x510] sm:$0xff] }
 0x268   :  { %v2891_v0 = vadd.f32 %v2890_v6, %v2842_v24  ;;  %v494_v19 = vpack.c.bf16 %v206_v13, %v182_v34  ;;  %v232_v24 = vld [vmem:[%s6643_s0 + $0x6a0] sm:$0xff] }
 0x269   :  { %v2941_v16 = vpop.f32.mrf.mxu0  ;;  %v256_v6 = vld [vmem:[%s6643_s0 + $0x760] sm:$0xff] }
 0x26a   :  { %v6168_v3 = vadd.f32 %v2939_v18, %v2891_v0  ;;  %v517_v18 = vpack.c.bf16 %v253_v37, %v229_v1  ;;  %v520_v14 = vpack.c.bf16 %v256_v6, %v232_v24  ;;  %v4449_v1 = vld [vmem:[%s6641_s1 + $0x580] sm:$0xff]  ;;  %v351_v24 = vld [vmem:[%s6643_s0 + $0xa58] sm:$0xff] }
 0x26c   :  { %v2843_v38 = vpop.f32.mrf.mxu2 }
 0x26d   :  { %v2844_v17 = vadd.f32 %v2843_v38, %v2795_v2 }
 0x26e   :  { %v2797_v25 = vpop.f32.mrf.mxu1 }
 0x26f   :  { %v2892_v60 = vpop.f32.mrf.mxu3  ;;  %v2798_v53 = vadd.f32 %v2797_v25, %v5871_v46  ;;  %v301_v25 = vld [vmem:[%s6643_s0 + $0x8c8] sm:$0xff] }
 0x270   :  { %v2893_v30 = vadd.f32 %v2892_v60, %v2844_v17  ;;  %v4442_v17 = vld [vmem:[%s6641_s1 + $0x548] sm:$0xff] }
 0x271   :  { %2992 = vmatmul.bf16.gmra.mxu1 %v493_v42  ;;  %3041 = vmatmul.bf16.gmra.mxu2 %v494_v19  ;;  %v2944_v47 = vpop.f32.mrf.mxu0  ;;  %v277_v42 = vld [vmem:[%s6643_s0 + $0x808] sm:$0xff] }
 0x272   :  { %v6195_v31 = vadd.f32 %v2941_v16, %v2893_v30  ;;  %v4450_v16 = vld [vmem:[%s6641_s1 + $0x588] sm:$0xff]  ;;  %3171 = vmatpush.bf16.msra.mxu1 %v4442_v17 }
 0x273   :  { %3220 = vmatpush.bf16.msra.mxu2 %v4450_v16 }
 0x274   :  { %3090 = vmatmul.bf16.gmra.mxu3 %v495_v56  ;;  %v2846_v61 = vpop.f32.mrf.mxu2  ;;  %3139 = vmatmul.bf16.gmra.mxu0 %v496_v27  ;;  %v302_v56 = vld [vmem:[%s6643_s0 + $0x8d0] sm:$0xff] }
 0x275   :  { %v2847_v52 = vadd.f32 %v2846_v61, %v2798_v53  ;;  %v543_v61 = vpack.c.bf16 %v303_v36, %v279_v26 }
 0x276   :  { %v2799_v7 = vpop.f32.mrf.mxu1 }
 0x277   :  { %v2895_v46 = vpop.f32.mrf.mxu3  ;;  %v2800_v63 = vadd.f32 %v2799_v7, %v5898_v5  ;;  %v230_v5 = vld [vmem:[%s6643_s0 + $0x690] sm:$0xff]  ;;  %3221 = vmatpush.bf16.msra.mxu2 %v4449_v1  ;;  %v376_v1 = vld [vmem:[%s6643_s0 + $0xb20] sm:$0xff] }
 0x278   :  { %v2896_v41 = vadd.f32 %v2895_v46, %v2847_v52  ;;  %v518_v9 = vpack.c.bf16 %v254_v49, %v230_v5  ;;  %v280_v52 = vld [vmem:[%s6643_s0 + $0x820] sm:$0xff] }
 0x279   :  { %v2946_v44 = vpop.f32.mrf.mxu0  ;;  %v304_v46 = vld [vmem:[%s6643_s0 + $0x8e0] sm:$0xff] }
 0x27a   :  { %v6207_v12 = vadd.f32 %v2944_v47, %v2896_v41  ;;  %v541_v47 = vpack.c.bf16 %v301_v25, %v277_v42 }
 0x27c   :  { %v2848_v10 = vpop.f32.mrf.mxu2 }
 0x27d   :  { %v2849_v22 = vadd.f32 %v2848_v10, %v2800_v63  ;;  %v544_v63 = vpack.c.bf16 %v304_v46, %v280_v52  ;;  %v4441_v10 = vld [vmem:[%s6641_s1 + $0x540] sm:$0xff] }
 0x27e   :  { %v2802_v54 = vpop.f32.mrf.mxu1  ;;  %3172 = vmatpush.bf16.msra.mxu1 %v4441_v10 }
 0x27f   :  { %v2897_v11 = vpop.f32.mrf.mxu3  ;;  %v2803_v0 = vadd.f32 %v2802_v54, %v5910_v20  ;;  %v350_v54 = vld [vmem:[%s6643_s0 + $0xa50] sm:$0xff] }
 0x280   :  { %v2898_v21 = vadd.f32 %v2897_v11, %v2849_v22  ;;  %v325_v11 = vld [vmem:[%s6643_s0 + $0x988] sm:$0xff] }
 0x281   :  { %2997 = vmatmul.bf16.gmra.mxu1 %v517_v18  ;;  %3046 = vmatmul.bf16.gmra.mxu2 %v518_v9  ;;  %v2949_v4 = vpop.f32.mrf.mxu0  ;;  %v349_v9 = vld [vmem:[%s6643_s0 + $0xa48] sm:$0xff] }
 0x282   :  { %v6234_v2 = vadd.f32 %v2946_v44, %v2898_v21  ;;  %v4457_v44 = vld [vmem:[%s6641_s1 + $0x5c0] sm:$0xff] }
 0x283   :  { %3270 = vmatpush.bf16.msra.mxu3 %v4457_v44  ;;  %v400_v44 = vld [vmem:[%s6643_s0 + $0xbe0] sm:$0xff] }
 0x284   :  { %3095 = vmatmul.bf16.gmra.mxu3 %v519_v32  ;;  %v2851_v34 = vpop.f32.mrf.mxu2  ;;  %3144 = vmatmul.bf16.gmra.mxu0 %v520_v14  ;;  %v327_v32 = vld [vmem:[%s6643_s0 + $0x998] sm:$0xff]  ;;  %v565_v14 = vpack.c.bf16 %v349_v9, %v325_v11 }
 0x285   :  { %v2852_v13 = vadd.f32 %v2851_v34, %v2803_v0  ;;  %v567_v8 = vpack.c.bf16 %v351_v24, %v327_v32  ;;  %v328_v34 = vld [vmem:[%s6643_s0 + $0x9a0] sm:$0xff]  ;;  %v65_v24 = vld [vmem:[%s6643_s0 + $0x168] sm:$0xff] }
 0x286   :  { %v2804_v15 = vpop.f32.mrf.mxu1 }
 0x287   :  { %v2900_v20 = vpop.f32.mrf.mxu3  ;;  %v2805_v38 = vadd.f32 %v2804_v15, %v5943_v48  ;;  %v278_v48 = vld [vmem:[%s6643_s0 + $0x810] sm:$0xff] }
 0x288   :  { %v2901_v23 = vadd.f32 %v2900_v20, %v2852_v13  ;;  %v542_v58 = vpack.c.bf16 %v302_v56, %v278_v48  ;;  %v352_v13 = vld [vmem:[%s6643_s0 + $0xa60] sm:$0xff] }
 0x289   :  { %v6251_v19 = vpop.f32.mrf.mxu0 }
 0x28a   :  { %v6246_v60 = vadd.f32 %v2949_v4, %v2901_v23  ;;  %v568_v23 = vpack.c.bf16 %v352_v13, %v328_v34 }
 0x28c   :  { %v2853_v30 = vpop.f32.mrf.mxu2 }
 0x28d   :  { %v2854_v53 = vadd.f32 %v2853_v30, %v2805_v38  ;;  %v373_v30 = vld [vmem:[%s6643_s0 + $0xb08] sm:$0xff] }
 0x28e   :  { %v2807_v40 = vpop.f32.mrf.mxu1 }
 0x28f   :  { %v2902_v27 = vpop.f32.mrf.mxu3  ;;  %v2808_v41 = vadd.f32 %v2807_v40, %v5961_v57 }
 0x290   :  { %v6274_v7 = vadd.f32 %v2902_v27, %v2854_v53  ;;  %v374_v53 = vld [vmem:[%s6643_s0 + $0xb10] sm:$0xff] }
 0x291   :  { %3002 = vmatmul.bf16.gmra.mxu1 %v541_v47  ;;  %3051 = vmatmul.bf16.gmra.mxu2 %v542_v58  ;;  %v2954_v59 = vpop.f32.mrf.mxu0  ;;  %v398_v27 = vld [vmem:[%s6643_s0 + $0xbd0] sm:$0xff]  ;;  %v399_v47 = vld [vmem:[%s6643_s0 + $0xbd8] sm:$0xff] }
 0x294   :  { %3100 = vmatmul.bf16.gmra.mxu3 %v543_v61  ;;  %v2856_v37 = vpop.f32.mrf.mxu2  ;;  %3149 = vmatmul.bf16.gmra.mxu0 %v544_v63 }
 0x295   :  { %v2857_v5 = vadd.f32 %v2856_v37, %v2808_v41  ;;  %v590_v41 = vpack.c.bf16 %v398_v27, %v374_v53  ;;  %v90_v53 = vld [vmem:[%s6643_s0 + $0x230] sm:$0xff]  ;;  %v91_v27 = vld [vmem:[%s6643_s0 + $0x238] sm:$0xff] }
 0x296   :  { %v2809_v57 = vpop.f32.mrf.mxu1 }
 0x297   :  { %v2905_v49 = vpop.f32.mrf.mxu3  ;;  %v2810_v62 = vadd.f32 %v2809_v57, %v5994_v50  ;;  %v326_v50 = vld [vmem:[%s6643_s0 + $0x990] sm:$0xff] }
 0x298   :  { %v2906_v35 = vadd.f32 %v2905_v49, %v2857_v5  ;;  %v566_v4 = vpack.c.bf16 %v350_v54, %v326_v50  ;;  %v592_v49 = vpack.c.bf16 %v400_v44, %v376_v1  ;;  %v4472_v54 = vld [vmem:[%s6644_s3 + $0x38] sm:$0xff] }
 0x299   :  { %v6292_v18 = vpop.f32.mrf.mxu0  ;;  %3404 = vmatpush.bf16.msra.mxu0 %v4472_v54  ;;  %v163_v54 = vld [vmem:[%s6643_s0 + $0x478] sm:$0xff] }
 0x29a   :  { %v6287_v22 = vadd.f32 %v2954_v59, %v2906_v35 }
 0x29c   :  { %v2858_v6 = vpop.f32.mrf.mxu2 }
 0x29d   :  { %v2859_v21 = vadd.f32 %v2858_v6, %v2810_v62  ;;  %v42_v6 = vld [vmem:[%s6643_s0 + $0xb0] sm:$0xff] }
 0x29e   :  { %v2812_v16 = vpop.f32.mrf.mxu1 }
 0x29f   :  { %v2907_v0 = vpop.f32.mrf.mxu3  ;;  %v2813_v15 = vadd.f32 %v2812_v16, %v6012_v43  ;;  %v397_v43 = vld [vmem:[%s6643_s0 + $0xbc8] sm:$0xff] }
 0x2a0   :  { %v6315_v20 = vadd.f32 %v2907_v0, %v2859_v21  ;;  %v589_v46 = vpack.c.bf16 %v397_v43, %v373_v30  ;;  %v43_v21 = vld [vmem:[%s6643_s0 + $0xb8] sm:$0xff]  ;;  %v4471_v30 = vld [vmem:[%s6644_s3 + $0x30] sm:$0xff]  ;;  %v89_v43 = vld [vmem:[%s6643_s0 + $0x228] sm:$0xff] }
 0x2a1   :  { %3007 = vmatmul.bf16.gmra.mxu1 %v565_v14  ;;  %3056 = vmatmul.bf16.gmra.mxu2 %v566_v4  ;;  %v2959_v38 = vpop.f32.mrf.mxu0  ;;  %v67_v0 = vld [vmem:[%s6643_s0 + $0x178] sm:$0xff] }
 0x2a2   :  { %3405 = vmatpush.bf16.msra.mxu0 %v4471_v30  ;;  %v211_v30 = vld [vmem:[%s6643_s0 + $0x5f8] sm:$0xff] }
 0x2a4   :  { %3105 = vmatmul.bf16.gmra.mxu3 %v567_v8  ;;  %v2861_v17 = vpop.f32.mrf.mxu2  ;;  %3154 = vmatmul.bf16.gmra.mxu0 %v568_v23 }
 0x2a5   :  { %v2862_v42 = vadd.f32 %v2861_v17, %v2813_v15  ;;  %v427_v15 = vpack.c.bf16 %v67_v0, %v43_v21 }
 0x2a6   :  { %v2814_v48 = vpop.f32.mrf.mxu1 }
 0x2a7   :  { %v2910_v25 = vpop.f32.mrf.mxu3  ;;  %v2815_v26 = vadd.f32 %v2814_v48, %v6039_v39  ;;  %v375_v39 = vld [vmem:[%s6643_s0 + $0xb18] sm:$0xff] }
 0x2a8   :  { %v2911_v56 = vadd.f32 %v2910_v25, %v2862_v42  ;;  %v591_v59 = vpack.c.bf16 %v399_v47, %v375_v39  ;;  %v115_v39 = vld [vmem:[%s6643_s0 + $0x2f8] sm:$0xff] }
 0x2a9   :  { %v6339_v40 = vpop.f32.mrf.mxu0 }
 0x2aa   :  { %v6319_v36 = vadd.f32 %v2959_v38, %v2911_v56 }
 0x2ac   :  { %v2863_v58 = vpop.f32.mrf.mxu2 }
 0x2ad   :  { %v2864_v61 = vadd.f32 %v2863_v58, %v2815_v26 }
 0x2ae   :  { %v2817_v63 = vpop.f32.mrf.mxu1 }
 0x2af   :  { %v2912_v52 = vpop.f32.mrf.mxu3  ;;  %v2818_v5 = vadd.f32 %v2817_v63, %v6051_v29  ;;  %v41_v29 = vld [vmem:[%s6643_s0 + $0xa8] sm:$0xff]  ;;  %v451_v63 = vpack.c.bf16 %v115_v39, %v91_v27 }
 0x2b0   :  { %v6347_v37 = vadd.f32 %v2912_v52, %v2864_v61  ;;  %v425_v8 = vpack.c.bf16 %v65_v24, %v41_v29 }
 0x2b1   :  { %3012 = vmatmul.bf16.gmra.mxu1 %v589_v46  ;;  %3061 = vmatmul.bf16.gmra.mxu2 %v590_v41  ;;  %v2964_v11 = vpop.f32.mrf.mxu0 }
 0x2b4   :  { %3110 = vmatmul.bf16.gmra.mxu3 %v591_v59  ;;  %v2866_v57 = vpop.f32.mrf.mxu2  ;;  %3159 = vmatmul.bf16.gmra.mxu0 %v592_v49 }
 0x2b5   :  { %v2867_v35 = vadd.f32 %v2866_v57, %v2818_v5 }
 0x2b6   :  { %v2819_v10 = vpop.f32.mrf.mxu1 }
 0x2b7   :  { %v2915_v62 = vpop.f32.mrf.mxu3  ;;  %v2820_v50 = vadd.f32 %v2819_v10, %v6078_v51  ;;  %v66_v51 = vld [vmem:[%s6643_s0 + $0x170] sm:$0xff]  ;;  %v4470_v10 = vld [vmem:[%s6644_s3 + $0x28] sm:$0xff] }
 0x2b8   :  { %v2916_v9 = vadd.f32 %v2915_v62, %v2867_v35  ;;  %v426_v34 = vpack.c.bf16 %v66_v51, %v42_v6  ;;  %3406 = vmatpush.bf16.msra.mxu0 %v4470_v10  ;;  %v259_v10 = vld [vmem:[%s6643_s0 + $0x778] sm:$0xff] }
 0x2ba   :  { %v6354_v32 = vadd.f32 %v2964_v11, %v2916_v9  ;;  %v137_v11 = vld [vmem:[%s6643_s0 + $0x3a8] sm:$0xff]  ;;  %v138_v9 = vld [vmem:[%s6643_s0 + $0x3b0] sm:$0xff] }
 0x2bc   :  { %v2868_v14 = vpop.f32.mrf.mxu2 }
 0x2bd   :  { %v2869_v4 = vadd.f32 %v2868_v14, %v2820_v50  ;;  %v139_v50 = vld [vmem:[%s6643_s0 + $0x3b8] sm:$0xff] }
 0x2be   :  { %v2978_v13 = vpop.f32.mrf.mxu1  ;;  %v475_v14 = vpack.c.bf16 %v163_v54, %v139_v50 }
 0x2bf   :  { %v2917_v16 = vpop.f32.mrf.mxu3  ;;  %v2979_v38 = vadd.f32 %v2978_v13, %v6090_v45  ;;  %v113_v45 = vld [vmem:[%s6643_s0 + $0x2e8] sm:$0xff] }
 0x2c0   :  { %v6374_v23 = vadd.f32 %v2917_v16, %v2869_v4  ;;  %v449_v52 = vpack.c.bf16 %v113_v45, %v89_v43 }
 0x2c1   :  { %3173 = vmatmul.bf16.vlgmr.msra.gmra.mxu1 %v425_v8  ;;  %3222 = vmatmul.bf16.vlgmr.msra.gmra.mxu2 %v426_v34 }
 0x2c4   :  { %3271 = vmatmul.bf16.vlgmr.msra.gmra.mxu3 %v427_v15  ;;  %v3027_v17 = vpop.f32.mrf.mxu2 }
 0x2c5   :  { %v3028_v42 = vadd.f32 %v3027_v17, %v2979_v38 }
 0x2c6   :  { %v2980_v48 = vpop.f32.mrf.mxu1 }
 0x2c7   :  { %v3076_v25 = vpop.f32.mrf.mxu3  ;;  %v2981_v26 = vadd.f32 %v2980_v48, %v6117_v28  ;;  %v114_v28 = vld [vmem:[%s6643_s0 + $0x2f0] sm:$0xff] }
 0x2c8   :  { %v6377_v56 = vadd.f32 %v3076_v25, %v3028_v42  ;;  %v450_v46 = vpack.c.bf16 %v114_v28, %v90_v53  ;;  %v4469_v42 = vld [vmem:[%s6644_s3 + $0x20] sm:$0xff]  ;;  %v185_v25 = vld [vmem:[%s6643_s0 + $0x528] sm:$0xff]  ;;  %v186_v48 = vld [vmem:[%s6643_s0 + $0x530] sm:$0xff] }
 0x2c9   :  { %3407 = vmatpush.bf16.msra.mxu0 %v4469_v42  ;;  %v307_v42 = vld [vmem:[%s6643_s0 + $0x8f8] sm:$0xff] }
 0x2cc   :  { %v3029_v47 = vpop.f32.mrf.mxu2 }
 0x2cd   :  { %v3030_v58 = vadd.f32 %v3029_v47, %v2981_v26  ;;  %v187_v26 = vld [vmem:[%s6643_s0 + $0x538] sm:$0xff] }
 0x2ce   :  { %v2983_v41 = vpop.f32.mrf.mxu1  ;;  %v499_v47 = vpack.c.bf16 %v211_v30, %v187_v26 }
 0x2cf   :  { %v3078_v61 = vpop.f32.mrf.mxu3  ;;  %v2984_v1 = vadd.f32 %v2983_v41, %v6129_v33  ;;  %v161_v33 = vld [vmem:[%s6643_s0 + $0x468] sm:$0xff] }
 0x2d0   :  { %v6401_v59 = vadd.f32 %v3078_v61, %v3030_v58  ;;  %v473_v51 = vpack.c.bf16 %v161_v33, %v137_v11 }
 0x2d1   :  { %3178 = vmatmul.bf16.gmra.mxu1 %v449_v52  ;;  %3227 = vmatmul.bf16.gmra.mxu2 %v450_v46 }
 0x2d4   :  { %3276 = vmatmul.bf16.gmra.mxu3 %v451_v63  ;;  %v3032_v44 = vpop.f32.mrf.mxu2 }
 0x2d5   :  { %v3033_v5 = vadd.f32 %v3032_v44, %v2984_v1 }
 0x2d6   :  { %v2985_v57 = vpop.f32.mrf.mxu1 }
 0x2d7   :  { %v3081_v49 = vpop.f32.mrf.mxu3  ;;  %v2986_v62 = vadd.f32 %v2985_v57, %v6156_v55  ;;  %v162_v55 = vld [vmem:[%s6643_s0 + $0x470] sm:$0xff] }
 0x2d8   :  { %v6404_v35 = vadd.f32 %v3081_v49, %v3033_v5  ;;  %v474_v21 = vpack.c.bf16 %v162_v55, %v138_v9  ;;  %v4468_v5 = vld [vmem:[%s6644_s3 + $0x18] sm:$0xff]  ;;  %v233_v49 = vld [vmem:[%s6643_s0 + $0x6a8] sm:$0xff]  ;;  %v234_v57 = vld [vmem:[%s6643_s0 + $0x6b0] sm:$0xff] }
 0x2d9   :  { %3408 = vmatpush.bf16.msra.mxu0 %v4468_v5  ;;  %v331_v5 = vld [vmem:[%s6643_s0 + $0x9b8] sm:$0xff] }
 0x2dc   :  { %v3034_v29 = vpop.f32.mrf.mxu2 }
 0x2dd   :  { %v3035_v24 = vadd.f32 %v3034_v29, %v2986_v62  ;;  %v235_v62 = vld [vmem:[%s6643_s0 + $0x6b8] sm:$0xff] }
 0x2de   :  { %v2988_v0 = vpop.f32.mrf.mxu1  ;;  %v523_v29 = vpack.c.bf16 %v259_v10, %v235_v62 }
 0x2df   :  { %v3083_v6 = vpop.f32.mrf.mxu3  ;;  %v2989_v16 = vadd.f32 %v2988_v0, %v6168_v3  ;;  %v209_v3 = vld [vmem:[%s6643_s0 + $0x5e8] sm:$0xff] }
 0x2e0   :  { %v6428_v4 = vadd.f32 %v3083_v6, %v3035_v24  ;;  %v497_v28 = vpack.c.bf16 %v209_v3, %v185_v25 }
 0x2e1   :  { %3183 = vmatmul.bf16.gmra.mxu1 %v473_v51  ;;  %3232 = vmatmul.bf16.gmra.mxu2 %v474_v21  ;;  %v2952_v21 = vadd.f32 %v6251_v19, %v6274_v7  ;;  %v282_v19 = vld [vmem:[%s6643_s0 + $0x830] sm:$0xff] }
 0x2e2   :  { %v306_v7 = vld [vmem:[%s6643_s0 + $0x8f0] sm:$0xff] }
 0x2e3   :  { %v546_v26 = vpack.c.bf16 %v306_v7, %v282_v19 }
 0x2e4   :  { %3281 = vmatmul.bf16.gmra.mxu3 %v475_v14  ;;  %v3037_v8 = vpop.f32.mrf.mxu2 }
 0x2e5   :  { %v3038_v34 = vadd.f32 %v3037_v8, %v2989_v16 }
 0x2e6   :  { %v2990_v15 = vpop.f32.mrf.mxu1 }
 0x2e7   :  { %v3086_v13 = vpop.f32.mrf.mxu3  ;;  %v2991_v17 = vadd.f32 %v2990_v15, %v6195_v31  ;;  %v210_v31 = vld [vmem:[%s6643_s0 + $0x5f0] sm:$0xff]  ;;  %v305_v15 = vld [vmem:[%s6643_s0 + $0x8e8] sm:$0xff] }
 0x2e8   :  { %v6431_v38 = vadd.f32 %v3086_v13, %v3038_v34  ;;  %v498_v27 = vpack.c.bf16 %v210_v31, %v186_v48  ;;  %v4467_v13 = vld [vmem:[%s6644_s3 + $0x10] sm:$0xff] }
 0x2e9   :  { %3409 = vmatpush.bf16.msra.mxu0 %v4467_v13  ;;  %v401_v13 = vld [vmem:[%s6643_s0 + $0xbe8] sm:$0xff] }
 0x2ec   :  { %v3039_v43 = vpop.f32.mrf.mxu2 }
 0x2ed   :  { %v3040_v45 = vadd.f32 %v3039_v43, %v2991_v17  ;;  %v283_v17 = vld [vmem:[%s6643_s0 + $0x838] sm:$0xff] }
 0x2ee   :  { %v2993_v39 = vpop.f32.mrf.mxu1  ;;  %v547_v43 = vpack.c.bf16 %v307_v42, %v283_v17 }
 0x2ef   :  { %v3088_v53 = vpop.f32.mrf.mxu3  ;;  %v2994_v61 = vadd.f32 %v2993_v39, %v6207_v12  ;;  %v257_v12 = vld [vmem:[%s6643_s0 + $0x768] sm:$0xff] }
 0x2f0   :  { %v6455_v58 = vadd.f32 %v3088_v53, %v3040_v45  ;;  %v521_v55 = vpack.c.bf16 %v257_v12, %v233_v49  ;;  %v355_v49 = vld [vmem:[%s6643_s0 + $0xa78] sm:$0xff] }
 0x2f1   :  { %3188 = vmatmul.bf16.gmra.mxu1 %v497_v28  ;;  %3237 = vmatmul.bf16.gmra.mxu2 %v498_v27  ;;  %v2957_v27 = vadd.f32 %v6292_v18, %v6315_v20  ;;  %v353_v18 = vld [vmem:[%s6643_s0 + $0xa68] sm:$0xff]  ;;  %v330_v20 = vld [vmem:[%s6643_s0 + $0x9b0] sm:$0xff] }
 0x2f4   :  { %3286 = vmatmul.bf16.gmra.mxu3 %v499_v47  ;;  %v3042_v52 = vpop.f32.mrf.mxu2 }
 0x2f5   :  { %v3043_v46 = vadd.f32 %v3042_v52, %v2994_v61  ;;  %v2966_v61 = vpop.f32.mrf.mxu0 }
 0x2f6   :  { %v2995_v63 = vpop.f32.mrf.mxu1 }
 0x2f7   :  { %v3091_v41 = vpop.f32.mrf.mxu3  ;;  %v2996_v44 = vadd.f32 %v2995_v63, %v6234_v2  ;;  %v258_v2 = vld [vmem:[%s6643_s0 + $0x770] sm:$0xff]  ;;  %v4466_v63 = vld [vmem:[%s6644_s3 + $0x8] sm:$0xff] }
 0x2f8   :  { %v6458_v1 = vadd.f32 %v3091_v41, %v3043_v46  ;;  %v522_v50 = vpack.c.bf16 %v258_v2, %v234_v57  ;;  %3410 = vmatpush.bf16.msra.mxu0 %v4466_v63 }
 0x2fc   :  { %v3044_v11 = vpop.f32.mrf.mxu2 }
 0x2fd   :  { %v3045_v33 = vadd.f32 %v3044_v11, %v2996_v44  ;;  %v354_v44 = vld [vmem:[%s6643_s0 + $0xa70] sm:$0xff] }
 0x2fe   :  { %v2998_v54 = vpop.f32.mrf.mxu1  ;;  %v570_v10 = vpack.c.bf16 %v354_v44, %v330_v20 }
 0x2ff   :  { %v3093_v9 = vpop.f32.mrf.mxu3  ;;  %v2999_v6 = vadd.f32 %v2998_v54, %v6246_v60  ;;  %v281_v60 = vld [vmem:[%s6643_s0 + $0x828] sm:$0xff] }
 0x300   :  { %v6482_v24 = vadd.f32 %v3093_v9, %v3045_v33  ;;  %v545_v31 = vpack.c.bf16 %v305_v15, %v281_v60  ;;  %v571_v33 = vpack.c.bf16 %v355_v49, %v331_v5  ;;  %v379_v60 = vld [vmem:[%s6643_s0 + $0xb38] sm:$0xff] }
 0x301   :  { %3193 = vmatmul.bf16.gmra.mxu1 %v521_v55  ;;  %3242 = vmatmul.bf16.gmra.mxu2 %v522_v50  ;;  %v3125_v50 = vpop.f32.mrf.mxu0  ;;  %v403_v15 = vld [vmem:[%s6643_s0 + $0xbf8] sm:$0xff] }
 0x302   :  { %v3126_v5 = vadd.f32 %v3125_v50, %v6377_v56 }
 0x304   :  { %3291 = vmatmul.bf16.gmra.mxu3 %v523_v29  ;;  %v3047_v51 = vpop.f32.mrf.mxu2  ;;  %v2962_v29 = vadd.f32 %v6339_v40, %v6347_v37  ;;  %v378_v40 = vld [vmem:[%s6643_s0 + $0xb30] sm:$0xff] }
 0x305   :  { %v3048_v0 = vadd.f32 %v3047_v51, %v2999_v6  ;;  %v402_v37 = vld [vmem:[%s6643_s0 + $0xbf0] sm:$0xff] }
 0x306   :  { %v3000_v16 = vpop.f32.mrf.mxu1 }
 0x307   :  { %v3096_v14 = vpop.f32.mrf.mxu3  ;;  %v3001_v34 = vadd.f32 %v3000_v16, %v2952_v21  ;;  %v377_v16 = vld [vmem:[%s6643_s0 + $0xb28] sm:$0xff] }
 0x308   :  { %v6487_v8 = vadd.f32 %v3096_v14, %v3048_v0  ;;  %v593_v42 = vpack.c.bf16 %v401_v13, %v377_v16 }
 0x30c   :  { %v3049_v25 = vpop.f32.mrf.mxu2 }
 0x30d   :  { %v3050_v3 = vadd.f32 %v3049_v25, %v3001_v34  ;;  %v3127_v34 = vpop.f32.mrf.mxu0  ;;  %v594_v25 = vpack.c.bf16 %v402_v37, %v378_v40 }
 0x30e   :  { %v3003_v30 = vpop.f32.mrf.mxu1 }
 0x30f   :  { %v3098_v48 = vpop.f32.mrf.mxu3  ;;  %v3004_v53 = vadd.f32 %v3003_v30, %v6287_v22  ;;  %v329_v22 = vld [vmem:[%s6643_s0 + $0x9a8] sm:$0xff] }
 0x310   :  { %v6510_v45 = vadd.f32 %v3098_v48, %v3050_v3  ;;  %v569_v62 = vpack.c.bf16 %v353_v18, %v329_v22  ;;  %v595_v48 = vpack.c.bf16 %v403_v15, %v379_v60 }
 0x311   :  { %3198 = vmatmul.bf16.gmra.mxu1 %v545_v31  ;;  %3247 = vmatmul.bf16.gmra.mxu2 %v546_v26 }
 0x314   :  { %3296 = vmatmul.bf16.gmra.mxu3 %v547_v43  ;;  %v3052_v28 = vpop.f32.mrf.mxu2 }
 0x315   :  { %v3053_v39 = vadd.f32 %v3052_v28, %v3004_v53  ;;  %v3130_v30 = vpop.f32.mrf.mxu0  ;;  %v2967_v53 = vadd.f32 %v2966_v61, %v6374_v23  ;;  %v3128_v61 = vadd.f32 %v3127_v34, %v6401_v59 }
 0x316   :  { %v3005_v52 = vpop.f32.mrf.mxu1  ;;  %v3131_v56 = vadd.f32 %v3130_v30, %v6404_v35 }
 0x317   :  { %v3101_v47 = vpop.f32.mrf.mxu3  ;;  %v3006_v41 = vadd.f32 %v3005_v52, %v2957_v27 }
 0x318   :  { %v6515_v46 = vadd.f32 %v3101_v47, %v3053_v39 }
 0x31c   :  { %v3054_v12 = vpop.f32.mrf.mxu2 }
 0x31d   :  { %v3055_v57 = vadd.f32 %v3054_v12, %v3006_v41  ;;  %v3132_v18 = vpop.f32.mrf.mxu0 }
 0x31e   :  { %v3008_v11 = vpop.f32.mrf.mxu1  ;;  %v3133_v59 = vadd.f32 %v3132_v18, %v6428_v4 }
 0x31f   :  { %v3103_v2 = vpop.f32.mrf.mxu3  ;;  %v3009_v55 = vadd.f32 %v3008_v11, %v6319_v36  ;;  %v4465_v36 = vld [vmem:[%s6644_s3] sm:$0xff] }
 0x320   :  { %v6538_v9 = vadd.f32 %v3103_v2, %v3055_v57  ;;  %3411 = vmatpush.bf16.msra.mxu0 %v4465_v36 }
 0x321   :  { %3203 = vmatmul.bf16.gmra.mxu1 %v569_v62  ;;  %3252 = vmatmul.bf16.gmra.mxu2 %v570_v10 }
 0x324   :  { %3301 = vmatmul.bf16.gmra.mxu3 %v571_v33  ;;  %v3057_v54 = vpop.f32.mrf.mxu2 }
 0x325   :  { %v3058_v6 = vadd.f32 %v3057_v54, %v3009_v55  ;;  %v3135_v23 = vpop.f32.mrf.mxu0 }
 0x326   :  { %v3010_v21 = vpop.f32.mrf.mxu1  ;;  %v3136_v35 = vadd.f32 %v3135_v23, %v6431_v38 }
 0x327   :  { %v3106_v51 = vpop.f32.mrf.mxu3  ;;  %v3011_v14 = vadd.f32 %v3010_v21, %v2962_v29 }
 0x328   :  { %v6543_v0 = vadd.f32 %v3106_v51, %v3058_v6 }
 0x32c   :  { %v3059_v19 = vpop.f32.mrf.mxu2 }
 0x32d   :  { %v3060_v7 = vadd.f32 %v3059_v19, %v3011_v14  ;;  %v3137_v21 = vpop.f32.mrf.mxu0 }
 0x32e   :  { %v3013_v3 = vpop.f32.mrf.mxu1 }
 0x32f   :  { %v3108_v17 = vpop.f32.mrf.mxu3  ;;  %v3014_v26 = vadd.f32 %v3013_v3, %v6354_v32 }
 0x330   :  { %v6566_v31 = vadd.f32 %v3108_v17, %v3060_v7 }
 0x331   :  { %3208 = vmatmul.bf16.gmra.mxu1 %v593_v42  ;;  %3257 = vmatmul.bf16.gmra.mxu2 %v594_v25 }
 0x334   :  { %3306 = vmatmul.bf16.gmra.mxu3 %v595_v48  ;;  %v3062_v43 = vpop.f32.mrf.mxu2 }
 0x335   :  { %v3063_v28 = vadd.f32 %v3062_v43, %v3014_v26  ;;  %v3140_v37 = vpop.f32.mrf.mxu0 }
 0x336   :  { %v3015_v39 = vpop.f32.mrf.mxu1 }
 0x337   :  { %v3111_v27 = vpop.f32.mrf.mxu3  ;;  %v3016_v52 = vadd.f32 %v3015_v39, %v2967_v53 }
 0x338   :  { %v6570_v47 = vadd.f32 %v3111_v27, %v3063_v28  ;;  %v3138_v28 = vadd.f32 %v3137_v21, %v6455_v58 }
 0x33c   :  { %v3064_v41 = vpop.f32.mrf.mxu2 }
 0x33d   :  { %v3065_v63 = vadd.f32 %v3064_v41, %v3016_v52  ;;  %v3142_v43 = vpop.f32.mrf.mxu0 }
 0x33e   :  { %v3174_v20 = vpop.f32.mrf.mxu1  ;;  %v3143_v58 = vadd.f32 %v3142_v43, %v6482_v24 }
 0x33f   :  { %v3113_v22 = vpop.f32.mrf.mxu3  ;;  %v3175_v57 = vadd.f32 %v3174_v20, %v3126_v5 }
 0x340   :  { %v6572_v44 = vadd.f32 %v3113_v22, %v3065_v63 }
 0x344   :  { %v3223_v32 = vpop.f32.mrf.mxu2 }
 0x345   :  { %v3224_v2 = vadd.f32 %v3223_v32, %v3175_v57  ;;  %v3145_v32 = vpop.f32.mrf.mxu0  ;;  %v3141_v57 = vadd.f32 %v3140_v37, %v6458_v1 }
 0x346   :  { %v3176_v12 = vpop.f32.mrf.mxu1 }
 0x347   :  { %v3272_v49 = vpop.f32.mrf.mxu3  ;;  %v3177_v62 = vadd.f32 %v3176_v12, %v3128_v61 }
 0x348   :  { %v3273_v11 = vadd.f32 %v3272_v49, %v3224_v2 }
 0x34a   :  { %v3312_v6 = vmax.f32 %v3273_v11, 0.0 }
 0x34c   :  { %v3225_v10 = vpop.f32.mrf.mxu2 }
 0x34d   :  { %v3226_v33 = vadd.f32 %v3225_v10, %v3177_v62  ;;  %v3147_v10 = vpop.f32.mrf.mxu0 }
 0x34e   :  { %v3179_v54 = vpop.f32.mrf.mxu1 }
 0x34f   :  { %v3274_v55 = vpop.f32.mrf.mxu3  ;;  %v3180_v13 = vadd.f32 %v3179_v54, %v3131_v56 }
 0x350   :  { %v3275_v29 = vadd.f32 %v3274_v55, %v3226_v33 }
 0x352   :  { %v3313_v51 = vmax.f32 %v3275_v29, 0.0 }
 0x354   :  { %v3328_v14 = vpack.c.bf16 %v3313_v51, %v3312_v6  ;;  %v3228_v16 = vpop.f32.mrf.mxu2 }
 0x355   :  { %v3229_v34 = vadd.f32 %v3228_v16, %v3180_v13  ;;  %v3150_v56 = vpop.f32.mrf.mxu0 }
 0x356   :  { %3412 = vmatmul.bf16.vlgmr.msra.gmra.mxu0 %v3328_v14  ;;  %v3181_v36 = vpop.f32.mrf.mxu1 }
 0x357   :  { %v3277_v50 = vpop.f32.mrf.mxu3  ;;  %v3182_v40 = vadd.f32 %v3181_v36, %v3133_v59  ;;  %v3148_v59 = vadd.f32 %v3147_v10, %v6510_v45 }
 0x358   :  { %v3278_v15 = vadd.f32 %v3277_v50, %v3229_v34  ;;  %v3146_v50 = vadd.f32 %v3145_v32, %v6487_v8  ;;  %v3151_v8 = vadd.f32 %v3150_v56, %v6515_v46 }
 0x35a   :  { %v3314_v25 = vmax.f32 %v3278_v15, 0.0 }
 0x35c   :  { %v3230_v60 = vpop.f32.mrf.mxu2 }
 0x35d   :  { %v3231_v19 = vadd.f32 %v3230_v60, %v3182_v40 }
 0x35e   :  { %v3184_v17 = vpop.f32.mrf.mxu1 }
 0x35f   :  { %v3279_v7 = vpop.f32.mrf.mxu3  ;;  %v3185_v4 = vadd.f32 %v3184_v17, %v3136_v35 }
 0x360   :  { %v3280_v42 = vadd.f32 %v3279_v7, %v3231_v19  ;;  %v3152_v7 = vpop.f32.mrf.mxu0 }
 0x362   :  { %v3315_v3 = vmax.f32 %v3280_v42, 0.0 }
 0x364   :  { %v3329_v48 = vpack.c.bf16 %v3315_v3, %v3314_v25  ;;  %v3233_v26 = vpop.f32.mrf.mxu2 }
 0x365   :  { %v3234_v27 = vadd.f32 %v3233_v26, %v3185_v4 }
 0x366   :  { %3417 = vmatmul.bf16.gmra.mxu0 %v3329_v48  ;;  %v3186_v53 = vpop.f32.mrf.mxu1 }
 0x367   :  { %v3282_v30 = vpop.f32.mrf.mxu3  ;;  %v3187_v39 = vadd.f32 %v3186_v53, %v3138_v28  ;;  %v3153_v53 = vadd.f32 %v3152_v7, %v6538_v9 }
 0x368   :  { %v3283_v41 = vadd.f32 %v3282_v30, %v3234_v27  ;;  %v3155_v45 = vpop.f32.mrf.mxu0 }
 0x36a   :  { %v3316_v5 = vmax.f32 %v3283_v41, 0.0 }
 0x36c   :  { %v3235_v52 = vpop.f32.mrf.mxu2 }
 0x36d   :  { %v3236_v63 = vadd.f32 %v3235_v52, %v3187_v39 }
 0x36e   :  { %v3189_v18 = vpop.f32.mrf.mxu1 }
 0x36f   :  { %v3284_v22 = vpop.f32.mrf.mxu3  ;;  %v3190_v2 = vadd.f32 %v3189_v18, %v3141_v57 }
 0x370   :  { %v3285_v20 = vadd.f32 %v3284_v22, %v3236_v63  ;;  %v3157_v32 = vpop.f32.mrf.mxu0 }
 0x371   :  { %v3158_v9 = vadd.f32 %v3157_v32, %v6566_v31 }
 0x372   :  { %v3317_v49 = vmax.f32 %v3285_v20, 0.0 }
 0x374   :  { %v3330_v12 = vpack.c.bf16 %v3317_v49, %v3316_v5  ;;  %v3238_v38 = vpop.f32.mrf.mxu2  ;;  %v3156_v49 = vadd.f32 %v3155_v45, %v6543_v0 }
 0x375   :  { %v3239_v62 = vadd.f32 %v3238_v38, %v3190_v2 }
 0x376   :  { %3422 = vmatmul.bf16.gmra.mxu0 %v3330_v12  ;;  %v3191_v61 = vpop.f32.mrf.mxu1 }
 0x377   :  { %v3287_v23 = vpop.f32.mrf.mxu3  ;;  %v3192_v11 = vadd.f32 %v3191_v61, %v3143_v58 }
 0x378   :  { %v3288_v55 = vadd.f32 %v3287_v23, %v3239_v62  ;;  %v3160_v2 = vpop.f32.mrf.mxu0 }
 0x379   :  { %v3161_v0 = vadd.f32 %v3160_v2, %v6570_v47  ;;  %v4498_v47 = vld [vmem:[%s6645_s4] ss:$0 sm:$0xff] }
 0x37a   :  { %v3318_v21 = vmax.f32 %v3288_v55, 0.0 }
 0x37c   :  { %v3240_v33 = vpop.f32.mrf.mxu2 }
 0x37d   :  { %v3241_v54 = vadd.f32 %v3240_v33, %v3192_v11 }
 0x37e   :  { %v3194_v6 = vpop.f32.mrf.mxu1 }
 0x37f   :  { %v3289_v29 = vpop.f32.mrf.mxu3  ;;  %v3195_v24 = vadd.f32 %v3194_v6, %v3146_v50 }
 0x380   :  { %v3290_v51 = vadd.f32 %v3289_v29, %v3241_v54 }
 0x382   :  { %v3319_v14 = vmax.f32 %v3290_v51, 0.0 }
 0x384   :  { %v3331_v16 = vpack.c.bf16 %v3319_v14, %v3318_v21  ;;  %v3243_v1 = vpop.f32.mrf.mxu2  ;;  %v3162_v14 = vpop.f32.mrf.mxu0 }
 0x385   :  { %v3244_v34 = vadd.f32 %v3243_v1, %v3195_v24  ;;  %v3163_v56 = vadd.f32 %v3162_v14, %v6572_v44 }
 0x386   :  { %3427 = vmatmul.bf16.gmra.mxu0 %v3331_v16  ;;  %v3196_v13 = vpop.f32.mrf.mxu1 }
 0x387   :  { %v3292_v36 = vpop.f32.mrf.mxu3  ;;  %v3197_v40 = vadd.f32 %v3196_v13, %v3148_v59 }
 0x388   :  { %v3293_v60 = vadd.f32 %v3292_v36, %v3244_v34 }
 0x38a   :  { %v3320_v25 = vmax.f32 %v3293_v60, 0.0 }
 0x38c   :  { %v3245_v37 = vpop.f32.mrf.mxu2 }
 0x38d   :  { %v3246_v15 = vadd.f32 %v3245_v37, %v3197_v40 }
 0x38e   :  { %v3199_v17 = vpop.f32.mrf.mxu1 }
 0x38f   :  { %v3294_v19 = vpop.f32.mrf.mxu3  ;;  %v3200_v43 = vadd.f32 %v3199_v17, %v3151_v8 }
 0x390   :  { %v3295_v42 = vadd.f32 %v3294_v19, %v3246_v15 }
 0x392   :  { %v3321_v3 = vmax.f32 %v3295_v42, 0.0 }
 0x394   :  { %v3332_v48 = vpack.c.bf16 %v3321_v3, %v3320_v25  ;;  %v3248_v26 = vpop.f32.mrf.mxu2 }
 0x395   :  { %v3249_v4 = vadd.f32 %v3248_v26, %v3200_v43 }
 0x396   :  { %3432 = vmatmul.bf16.gmra.mxu0 %v3332_v48  ;;  %v3201_v30 = vpop.f32.mrf.mxu1 }
 0x397   :  { %v3297_v35 = vpop.f32.mrf.mxu3  ;;  %v3202_v28 = vadd.f32 %v3201_v30, %v3153_v53 }
 0x398   :  { %v3298_v39 = vadd.f32 %v3297_v35, %v3249_v4 }
 0x39a   :  { %v3322_v18 = vmax.f32 %v3298_v39, 0.0 }
 0x39c   :  { %v3250_v27 = vpop.f32.mrf.mxu2 }
 0x39d   :  { %v3251_v52 = vadd.f32 %v3250_v27, %v3202_v28 }
 0x39e   :  { %v3204_v63 = vpop.f32.mrf.mxu1 }
 0x39f   :  { %v3299_v41 = vpop.f32.mrf.mxu3  ;;  %v3205_v57 = vadd.f32 %v3204_v63, %v3156_v49 }
 0x3a0   :  { %v3300_v22 = vadd.f32 %v3299_v41, %v3251_v52 }
 0x3a2   :  { %v3323_v20 = vmax.f32 %v3300_v22, 0.0 }
 0x3a4   :  { %v3333_v5 = vpack.c.bf16 %v3323_v20, %v3322_v18  ;;  %v3253_v46 = vpop.f32.mrf.mxu2 }
 0x3a5   :  { %v3254_v23 = vadd.f32 %v3253_v46, %v3205_v57 }
 0x3a6   :  { %3437 = vmatmul.bf16.gmra.mxu0 %v3333_v5  ;;  %v3206_v38 = vpop.f32.mrf.mxu1 }
 0x3a7   :  { %v3302_v12 = vpop.f32.mrf.mxu3  ;;  %v3207_v61 = vadd.f32 %v3206_v38, %v3158_v9 }
 0x3a8   :  { %v3303_v62 = vadd.f32 %v3302_v12, %v3254_v23 }
 0x3aa   :  { %v3324_v54 = vmax.f32 %v3303_v62, 0.0 }
 0x3ac   :  { %v3255_v58 = vpop.f32.mrf.mxu2 }
 0x3ad   :  { %v3256_v10 = vadd.f32 %v3255_v58, %v3207_v61 }
 0x3ae   :  { %v3209_v33 = vpop.f32.mrf.mxu1 }
 0x3af   :  { %v3304_v11 = vpop.f32.mrf.mxu3  ;;  %v3210_v16 = vadd.f32 %v3209_v33, %v3161_v0 }
 0x3b0   :  { %v3305_v55 = vadd.f32 %v3304_v11, %v3256_v10 }
 0x3b2   :  { %v3325_v29 = vmax.f32 %v3305_v55, 0.0 }
 0x3b4   :  { %v3334_v6 = vpack.c.bf16 %v3325_v29, %v3324_v54  ;;  %v3258_v51 = vpop.f32.mrf.mxu2 }
 0x3b5   :  { %v3259_v1 = vadd.f32 %v3258_v51, %v3210_v16 }
 0x3b6   :  { %3442 = vmatmul.bf16.gmra.mxu0 %v3334_v6  ;;  %v3211_v31 = vpop.f32.mrf.mxu1 }
 0x3b7   :  { %v3307_v21 = vpop.f32.mrf.mxu3  ;;  %v3212_v50 = vadd.f32 %v3211_v31, %v3163_v56 }
 0x3b8   :  { %v3308_v13 = vadd.f32 %v3307_v21, %v3259_v1 }
 0x3ba   :  { %v3326_v40 = vmax.f32 %v3308_v13, 0.0 }
 0x3bc   :  { %v3260_v36 = vpop.f32.mrf.mxu2 }
 0x3bd   :  { %v3261_v24 = vadd.f32 %v3260_v36, %v3212_v50 }
 0x3bf   :  { %v3309_v59 = vpop.f32.mrf.mxu3 }
 0x3c0   :  { %v3310_v34 = vadd.f32 %v3309_v59, %v3261_v24 }
 0x3c2   :  { %v3327_v37 = vmax.f32 %v3310_v34, 0.0 }
 0x3c4   :  { %v3335_v60 = vpack.c.bf16 %v3327_v37, %v3326_v40 }
 0x3c6   :  { %3447 = vmatmul.bf16.gmra.mxu0 %v3335_v60 }
 0x3d3   :  { %v3413_v15 = vpop.f32.mrf.mxu0 }
 0x3d4   :  { %v3414_v19 = vadd.f32 %v4498_v47, %v3413_v15 }
 0x3d6   :  { %3453 = vst [vmem:[%s6646_s5] sm:$0xff] %v3414_v19 }
 0x3db   :  { %v3415_v44 = vpop.f32.mrf.mxu0 }
 0x3dc   :  { %v3416_v7 = vadd.f32 %v4498_v47, %v3415_v44 }
 0x3de   :  { %3454 = vst [vmem:[%s6646_s5 + $0x8] sm:$0xff] %v3416_v7 }
 0x3e3   :  { %v3418_v17 = vpop.f32.mrf.mxu0 }
 0x3e4   :  { %v3419_v42 = vadd.f32 %v4498_v47, %v3418_v17 }
 0x3e6   :  { %3455 = vst [vmem:[%s6646_s5 + $0x10] sm:$0xff] %v3419_v42 }
 0x3eb   :  { %v3420_v25 = vpop.f32.mrf.mxu0 }
 0x3ec   :  { %v3421_v3 = vadd.f32 %v4498_v47, %v3420_v25 }
 0x3ee   :  { %3456 = vst [vmem:[%s6646_s5 + $0x18] sm:$0xff] %v3421_v3 }
 0x3f3   :  { %v3423_v48 = vpop.f32.mrf.mxu0 }
 0x3f4   :  { %v3424_v26 = vadd.f32 %v4498_v47, %v3423_v48 }
 0x3f6   :  { %3457 = vst [vmem:[%s6646_s5 + $0x20] sm:$0xff] %v3424_v26 }
 0x3fb   :  { %v3425_v8 = vpop.f32.mrf.mxu0 }
 0x3fc   :  { %v3426_v35 = vadd.f32 %v4498_v47, %v3425_v8 }
 0x3fe   :  { %3458 = vst [vmem:[%s6646_s5 + $0x28] sm:$0xff] %v3426_v35 }
 0x403   :  { %v3428_v30 = vpop.f32.mrf.mxu0 }
 0x404   :  { %v3429_v43 = vadd.f32 %v4498_v47, %v3428_v30 }
 0x406   :  { %3459 = vst [vmem:[%s6646_s5 + $0x30] sm:$0xff] %v3429_v43 }
 0x40b   :  { %v3430_v45 = vpop.f32.mrf.mxu0 }
 0x40c   :  { %v3431_v53 = vadd.f32 %v4498_v47, %v3430_v45 }
 0x40e   :  { %3460 = vst [vmem:[%s6646_s5 + $0x38] sm:$0xff] %v3431_v53 }
 0x413   :  { %v3433_v4 = vpop.f32.mrf.mxu0 }
 0x414   :  { %v3434_v28 = vadd.f32 %v4498_v47, %v3433_v4 }
 0x416   :  { %3461 = vst [vmem:[%s6646_s5 + $0x40] sm:$0xff] %v3434_v28 }
 0x41b   :  { %v3435_v27 = vpop.f32.mrf.mxu0 }
 0x41c   :  { %v3436_v39 = vadd.f32 %v4498_v47, %v3435_v27 }
 0x41e   :  { %3462 = vst [vmem:[%s6646_s5 + $0x48] sm:$0xff] %v3436_v39 }
 0x423   :  { %v3438_v52 = vpop.f32.mrf.mxu0 }
 0x424   :  { %v3439_v41 = vadd.f32 %v4498_v47, %v3438_v52 }
 0x426   :  { %3463 = vst [vmem:[%s6646_s5 + $0x50] sm:$0xff] %v3439_v41 }
 0x42b   :  { %v3440_v63 = vpop.f32.mrf.mxu0 }
 0x42c   :  { %v3441_v22 = vadd.f32 %v4498_v47, %v3440_v63 }
 0x42e   :  { %3464 = vst [vmem:[%s6646_s5 + $0x58] sm:$0xff] %v3441_v22 }
 0x433   :  { %v3443_v18 = vpop.f32.mrf.mxu0 }
 0x434   :  { %v3444_v20 = vadd.f32 %v4498_v47, %v3443_v18 }
 0x436   :  { %3465 = vst [vmem:[%s6646_s5 + $0x60] sm:$0xff] %v3444_v20 }
 0x43b   :  { %v3445_v32 = vpop.f32.mrf.mxu0 }
 0x43c   :  { %v3446_v5 = vadd.f32 %v4498_v47, %v3445_v32 }
 0x43e   :  { %3466 = vst [vmem:[%s6646_s5 + $0x68] sm:$0xff] %v3446_v5 }
 0x443   :  { %v3448_v46 = vpop.f32.mrf.mxu0 }
 0x444   :  { %v3449_v49 = vadd.f32 %v4498_v47, %v3448_v46 }
 0x446   :  { %3467 = vst [vmem:[%s6646_s5 + $0x70] sm:$0xff] %v3449_v49 }
 0x44b   :  { %v3450_v12 = vpop.f32.mrf.mxu0 }
 0x44c   :  { %v3451_v38 = vadd.f32 %v4498_v47, %v3450_v12 }
 0x44e   :  { %3468 = vst [vmem:[%s6646_s5 + $0x78] sm:$0xff] %v3451_v38 }

</bundles_post_ra>
